<compile_context>
chip_gen: v7x
topology: tpu7x:2x2x1
jax: 0.10.0
libtpu: 0.0.40
codegen_flags: <defaults>
</compile_context>

<pallas_src>
import numpy as np

import jax
import jax.numpy as jnp
from jax.experimental import pallas as pl
from jax.experimental.pallas import tpu as pltpu

LEAKY_SLOPE = 0.01   # nn.LeakyReLU default
BN_EPS = 1e-5        # nn.BatchNorm1d default
OUT_LANES = 128      # lane-dense padding of the final Linear's output


def _round_up(x, m):
    return ((x + m - 1) // m) * m


def _pad_rows_np(m, n):
    return np.pad(m, ((0, n - m.shape[0]), (0, 0)))


# ----------------------------------------------------------------------------
# Exact dense lowering of Conv3d on a fixed, tiny spatial grid
# ----------------------------------------------------------------------------
def _conv3d_to_dense(w, b, S, stride=2, pad=1):
    """Exact dense matrix for Conv3d(k=3) on a fixed SxSxS input.

    Returns (Cin*S^3, Cout*So^3) matrix M and (Cout*So^3,) bias so that
        out_flat = in_flat @ M + b_flat
    with both flat vectors in NCDHW (channel, d, h, w) row-major order.
    Built once in numpy from the conv weights (parameter preprocessing).
    """
    Cout, Cin, k = w.shape[0], w.shape[1], w.shape[2]
    So = (S + 2 * pad - k) // stride + 1
    M = np.zeros((Cin * S ** 3, Cout * So ** 3), np.float32)
    cin_off = np.arange(Cin) * S ** 3
    cout_off = np.arange(Cout) * So ** 3
    for od in range(So):
        for oh in range(So):
            for ow in range(So):
                ocol = od * So ** 2 + oh * So + ow
                for kd in range(k):
                    idd = od * stride + kd - pad
                    if idd < 0 or idd >= S:
                        continue
                    for kh in range(k):
                        ih = oh * stride + kh - pad
                        if ih < 0 or ih >= S:
                            continue
                        for kw in range(k):
                            iw = ow * stride + kw - pad
                            if iw < 0 or iw >= S:
                                continue
                            irow = idd * S ** 2 + ih * S + iw
                            # (Cin, Cout) block: M[c, co] = w[co, c, kd, kh, kw]
                            M[np.ix_(cin_off + irow, cout_off + ocol)] = \
                                w[:, :, kd, kh, kw].T
    b_flat = np.repeat(np.asarray(b, np.float32), So ** 3)
    return M, b_flat


# ----------------------------------------------------------------------------
# The single fused Selector kernel (linear_depth = 2 trunk)
# ----------------------------------------------------------------------------
def _selector_kernel(occ_ref, st_ref, gl_ref, sm_ref,
                     wc1_ref, bc1_ref, wc2_ref, bc2_ref,
                     w1f_ref, w1s_ref, w1g_ref, w1m_ref, b1_ref,
                     w2_ref, b2_ref, w3_ref, b3_ref,
                     wh1_ref, bh1_ref, wh2_ref, bh2_ref,
                     o_ref):
    def leaky(v):
        return jnp.where(v >= 0.0, v, LEAKY_SLOPE * v)

    def mm(a, b):
        return jnp.dot(a, b, preferred_element_type=jnp.float32)

    # --- feature_extractor: two Conv3d+LeakyReLU layers as exact dense matmuls
    h = leaky(mm(occ_ref[...], wc1_ref[...]) + bc1_ref[...])
    f = leaky(mm(h, wc2_ref[...]) + bc2_ref[...])                 # (tm, occ_feat)

    # --- self.layers[0]: Linear on cat(f, start, goal, samples) expressed as a
    #     sum of split matmuls (no concat), BN folded into W/b, + LeakyReLU
    h = (mm(f, w1f_ref[...]) + mm(st_ref[...], w1s_ref[...])
         + mm(gl_ref[...], w1g_ref[...]) + mm(sm_ref[...], w1m_ref[...])
         + b1_ref[...])
    h = leaky(h)
    # --- self.layers[1..2]: Linear + folded-BN + LeakyReLU
    h = leaky(mm(h, w2_ref[...]) + b2_ref[...])
    h = leaky(mm(h, w3_ref[...]) + b3_ref[...])
    # --- head: Linear -> LeakyReLU -> Linear (lane-padded to 128) -> Sigmoid
    h = leaky(mm(h, wh1_ref[...]) + bh1_ref[...])
    y = mm(h, wh2_ref[...]) + bh2_ref[...]
    o_ref[...] = (1.0 / (1.0 + jnp.exp(-y))).astype(o_ref.dtype)


# ----------------------------------------------------------------------------
# Parameter construction (deterministic, synthetic) + folding
# ----------------------------------------------------------------------------
def _linear_init(key, fan_in, fan_out):
    kw, kb = jax.random.split(key)
    w = jax.random.normal(kw, (fan_in, fan_out), jnp.float32) / jnp.sqrt(float(fan_in))
    b = 0.01 * jax.random.normal(kb, (fan_out,), jnp.float32)
    return w, b


def _bn_affine(key, dim):
    k1, k2, k3, k4 = jax.random.split(key, 4)
    gamma = 0.5 + jax.random.uniform(k1, (dim,), jnp.float32)
    beta = 0.1 * jax.random.normal(k2, (dim,), jnp.float32)
    mean = 0.1 * jax.random.normal(k3, (dim,), jnp.float32)
    var = 0.5 + jax.random.uniform(k4, (dim,), jnp.float32)
    scale = gamma / jnp.sqrt(var + BN_EPS)
    shift = beta - mean * scale
    return scale, shift


def init_selector_params(key, state_dim, goal_dim, h_dim=128, linear_depth=2,
                         enc_channels=(4, 8, 16), occ_spatial=(8, 8, 8)):
    keys = jax.random.split(key, 32)
    ki = iter(keys)
    params = {}

    # encoder: two stride-2 Conv3d layers, kernel 3, padding 1
    enc = []
    for cin, cout in zip(enc_channels[:-1], enc_channels[1:]):
        kw, kb = jax.random.split(next(ki))
        w = jax.random.normal(kw, (cout, cin, 3, 3, 3), jnp.float32) / jnp.sqrt(cin * 27.0)
        b = 0.01 * jax.random.normal(kb, (cout,), jnp.float32)
        enc.append((w, b))
    params["enc"] = enc

    sp = [s // 4 for s in occ_spatial]           # two stride-2 convs
    occ_feat_size = enc_channels[-1] * sp[0] * sp[1] * sp[2]
    params["occ_feat_size"] = occ_feat_size

    # trunk: Linear+BN+LeakyReLU, then linear_depth x (Linear+BN+LeakyReLU)
    in_dim = state_dim * 2 + goal_dim + occ_feat_size
    mlp = []
    dims = [in_dim] + [h_dim] * (linear_depth + 1)
    for din, dout in zip(dims[:-1], dims[1:]):
        w, b = _linear_init(next(ki), din, dout)
        sc, sh = _bn_affine(next(ki), dout)
        mlp.append((w, b, sc, sh))
    params["mlp"] = mlp

    # head: Linear(h,256)+LeakyReLU, Linear(256,1)+Sigmoid
    params["head1"] = _linear_init(next(ki), h_dim, 256)
    params["head2"] = _linear_init(next(ki), 256, 1)
    return params


def fold_selector_params(params, state_dim, goal_dim, occ_spatial=(8, 8, 8)):
    """One-time preprocessing: conv -> dense, BN folded, W1 split by input block,
    head2 lane-padded to OUT_LANES columns."""
    assert occ_spatial[0] == occ_spatial[1] == occ_spatial[2]
    folded = {}

    # conv encoder -> exact dense matrices
    s = occ_spatial[0]
    for li, (w, b) in enumerate(params["enc"], start=1):
        W, bf = _conv3d_to_dense(np.asarray(w), np.asarray(b), s, stride=2, pad=1)
        folded[f"wc{li}"] = jnp.asarray(W)
        folded[f"bc{li}"] = jnp.asarray(bf).reshape(1, -1)
        s = (s + 2 - 3) // 2 + 1
    occ_feat = params["occ_feat_size"]

    # fold eval-mode BatchNorm1d into the preceding Linear
    def fold_bn(w, b, sc, sh):
        w = np.asarray(w) * np.asarray(sc)[None, :]
        b = np.asarray(b) * np.asarray(sc) + np.asarray(sh)
        return w.astype(np.float32), b.astype(np.float32)

    sdp = _round_up(state_dim, 8)
    gdp = _round_up(goal_dim, 8)

    w1, b1 = fold_bn(*params["mlp"][0])
    folded["w1f"] = jnp.asarray(w1[:occ_feat])
    folded["w1s"] = jnp.asarray(_pad_rows_np(w1[occ_feat:occ_feat + state_dim], sdp))
    folded["w1g"] = jnp.asarray(_pad_rows_np(
        w1[occ_feat + state_dim:occ_feat + state_dim + goal_dim], gdp))
    folded["w1m"] = jnp.asarray(_pad_rows_np(w1[occ_feat + state_dim + goal_dim:], sdp))
    folded["b1"] = jnp.asarray(b1).reshape(1, -1)

    for li, layer in enumerate(params["mlp"][1:], start=2):
        w, b = fold_bn(*layer)
        folded[f"w{li}"] = jnp.asarray(w)
        folded[f"b{li}"] = jnp.asarray(b).reshape(1, -1)

    w, b = params["head1"]
    folded["wh1"] = jnp.asarray(w, jnp.float32)
    folded["bh1"] = jnp.asarray(b, jnp.float32).reshape(1, -1)

    # head2 padded to OUT_LANES output columns (column 0 is the real logit) so
    # the kernel's output block is a full lane-dense vreg store.
    w, b = params["head2"]
    w = np.asarray(w, np.float32)
    b = np.asarray(b, np.float32).reshape(1, -1)
    folded["wh2"] = jnp.asarray(np.pad(w, ((0, 0), (0, OUT_LANES - w.shape[1]))))
    folded["bh2"] = jnp.asarray(np.pad(b, ((0, 0), (0, OUT_LANES - b.shape[1]))))
    return folded


# ----------------------------------------------------------------------------
# Selector forward (fixed_env=False path: num_of_sample == 1), one pallas_call
# ----------------------------------------------------------------------------
_WEIGHT_ORDER = ["wc1", "bc1", "wc2", "bc2",
                 "w1f", "w1s", "w1g", "w1m", "b1",
                 "w2", "b2", "w3", "b3",
                 "wh1", "bh1", "wh2", "bh2"]


@jax.jit
def selector_forward(folded, occ_grid, start, goal, samples):
    bs = occ_grid.shape[0]
    state_dim = start.shape[1]
    goal_dim = goal.shape[1]
    sdp = _round_up(state_dim, 8)
    gdp = _round_up(goal_dim, 8)

    occ2d = occ_grid.astype(jnp.float32).reshape(bs, -1)   # NCDHW -> (bs, C*D*H*W)
    k_occ = occ2d.shape[1]

    tm = min(128, _round_up(bs, 8))    # single full-height MXU pass at tiny batch
    mp = _round_up(bs, tm)

    def prep(x, ncols):
        x = x.astype(jnp.float32)
        # NOTE: padded rows produce garbage activations; they are sliced off below.
        return jnp.pad(x, ((0, mp - x.shape[0]), (0, ncols - x.shape[1])))

    occ_p = prep(occ2d, k_occ)
    st_p = prep(start, sdp)
    gl_p = prep(goal, gdp)
    sm_p = prep(samples, sdp)

    weights = [folded[n] for n in _WEIGHT_ORDER]

    def row_spec(ncols):
        return pl.BlockSpec((tm, ncols), lambda i: (i, 0))

    in_specs = ([row_spec(k_occ), row_spec(sdp), row_spec(gdp), row_spec(sdp)]
                + [pl.BlockSpec(w.shape, lambda i: (0, 0)) for w in weights])

    out = pl.pallas_call(
        _selector_kernel,
        out_shape=jax.ShapeDtypeStruct((mp, OUT_LANES), jnp.float32),
        grid=(mp // tm,),
        in_specs=in_specs,
        out_specs=pl.BlockSpec((tm, OUT_LANES), lambda i: (i, 0)),
        compiler_params=pltpu.CompilerParams(
            dimension_semantics=("parallel",),
            vmem_limit_bytes=32 * 1024 * 1024),
    )(occ_p, st_p, gl_p, sm_p, *weights)

    # column 0 is the real head output; padded lanes / padded rows are dropped.
    return out[:bs, :1]                      # (bs, 1)  -> num_of_sample = 1


if __name__ == "__main__":
    key = jax.random.PRNGKey(0)
    k_p, k_occ, k_s, k_g, k_smp = jax.random.split(key, 5)

    bs = 2
    state_dim = 11
    goal_dim = 11
    h_dim = 128
    occ_spatial = (8, 8, 8)

    params = init_selector_params(k_p, state_dim, goal_dim, h_dim=h_dim,
                                  linear_depth=2, occ_spatial=occ_spatial)
    folded = fold_selector_params(params, state_dim, goal_dim, occ_spatial)

    occ_grid = (jax.random.uniform(k_occ, (bs, 4) + occ_spatial) > 0.5).astype(jnp.float32)
    start = jax.random.normal(k_s, (bs, state_dim), jnp.float32)
    goal = jax.random.normal(k_g, (bs, goal_dim), jnp.float32)
    samples = jax.random.normal(k_smp, (bs, state_dim), jnp.float32)

    y = selector_forward(folded, occ_grid, start, goal, samples)
    y = jax.block_until_ready(y)

    assert y.shape == (bs, 1)
    assert bool(jnp.all(jnp.isfinite(y)))
    assert bool(jnp.all((y >= 0.0) & (y <= 1.0)))
    print("KERNEL_OK")
</pallas_src>

<mosaic_0001>
module attributes {stable_mosaic.version = 11 : i64} {
  func.func @_selector_kernel(%arg0: i32, %arg1: memref<8x2048xf32, #tpu.memory_space<vmem>>, %arg2: memref<8x16xf32, #tpu.memory_space<vmem>>, %arg3: memref<8x16xf32, #tpu.memory_space<vmem>>, %arg4: memref<8x16xf32, #tpu.memory_space<vmem>>, %arg5: memref<2048x512xf32, #tpu.memory_space<vmem>>, %arg6: memref<1x512xf32, #tpu.memory_space<vmem>>, %arg7: memref<512x128xf32, #tpu.memory_space<vmem>>, %arg8: memref<1x128xf32, #tpu.memory_space<vmem>>, %arg9: memref<128x128xf32, #tpu.memory_space<vmem>>, %arg10: memref<16x128xf32, #tpu.memory_space<vmem>>, %arg11: memref<16x128xf32, #tpu.memory_space<vmem>>, %arg12: memref<16x128xf32, #tpu.memory_space<vmem>>, %arg13: memref<1x128xf32, #tpu.memory_space<vmem>>, %arg14: memref<128x128xf32, #tpu.memory_space<vmem>>, %arg15: memref<1x128xf32, #tpu.memory_space<vmem>>, %arg16: memref<128x128xf32, #tpu.memory_space<vmem>>, %arg17: memref<1x128xf32, #tpu.memory_space<vmem>>, %arg18: memref<128x256xf32, #tpu.memory_space<vmem>>, %arg19: memref<1x256xf32, #tpu.memory_space<vmem>>, %arg20: memref<256x128xf32, #tpu.memory_space<vmem>>, %arg21: memref<1x128xf32, #tpu.memory_space<vmem>>, %arg22: memref<8x128xf32, #tpu.memory_space<vmem>>) attributes {dimension_semantics = [#tpu.dimension_semantics<parallel>], iteration_bounds = array<i64: 1>, scalar_prefetch = 0 : i64, scratch_operands = 0 : i64, tpu.core_type = #tpu.core_type<tc>, window_params = [{transform_indices = @transform_0, window_bounds = array<i64: 8, 2048>}, {transform_indices = @transform_1, window_bounds = array<i64: 8, 16>}, {transform_indices = @transform_2, window_bounds = array<i64: 8, 16>}, {transform_indices = @transform_3, window_bounds = array<i64: 8, 16>}, {pipeline_mode = #tpu.pipeline_mode<synchronous>, transform_indices = @transform_4, window_bounds = array<i64: 2048, 512>}, {pipeline_mode = #tpu.pipeline_mode<synchronous>, transform_indices = @transform_5, window_bounds = array<i64: 1, 512>}, {pipeline_mode = #tpu.pipeline_mode<synchronous>, transform_indices = @transform_6, window_bounds = array<i64: 512, 128>}, {pipeline_mode = #tpu.pipeline_mode<synchronous>, transform_indices = @transform_7, window_bounds = array<i64: 1, 128>}, {pipeline_mode = #tpu.pipeline_mode<synchronous>, transform_indices = @transform_8, window_bounds = array<i64: 128, 128>}, {pipeline_mode = #tpu.pipeline_mode<synchronous>, transform_indices = @transform_9, window_bounds = array<i64: 16, 128>}, {pipeline_mode = #tpu.pipeline_mode<synchronous>, transform_indices = @transform_10, window_bounds = array<i64: 16, 128>}, {pipeline_mode = #tpu.pipeline_mode<synchronous>, transform_indices = @transform_11, window_bounds = array<i64: 16, 128>}, {pipeline_mode = #tpu.pipeline_mode<synchronous>, transform_indices = @transform_12, window_bounds = array<i64: 1, 128>}, {pipeline_mode = #tpu.pipeline_mode<synchronous>, transform_indices = @transform_13, window_bounds = array<i64: 128, 128>}, {pipeline_mode = #tpu.pipeline_mode<synchronous>, transform_indices = @transform_14, window_bounds = array<i64: 1, 128>}, {pipeline_mode = #tpu.pipeline_mode<synchronous>, transform_indices = @transform_15, window_bounds = array<i64: 128, 128>}, {pipeline_mode = #tpu.pipeline_mode<synchronous>, transform_indices = @transform_16, window_bounds = array<i64: 1, 128>}, {pipeline_mode = #tpu.pipeline_mode<synchronous>, transform_indices = @transform_17, window_bounds = array<i64: 128, 256>}, {pipeline_mode = #tpu.pipeline_mode<synchronous>, transform_indices = @transform_18, window_bounds = array<i64: 1, 256>}, {pipeline_mode = #tpu.pipeline_mode<synchronous>, transform_indices = @transform_19, window_bounds = array<i64: 256, 128>}, {pipeline_mode = #tpu.pipeline_mode<synchronous>, transform_indices = @transform_20, window_bounds = array<i64: 1, 128>}, {transform_indices = @transform_21, window_bounds = array<i64: 8, 128>}]} {
    %c0 = arith.constant 0 : index
    %c0_0 = arith.constant 0 : index
    %0 = vector.load %arg1[%c0, %c0_0] : memref<8x2048xf32, #tpu.memory_space<vmem>>, vector<8x2048xf32>
    %c0_1 = arith.constant 0 : index
    %c0_2 = arith.constant 0 : index
    %1 = vector.load %arg5[%c0_1, %c0_2] : memref<2048x512xf32, #tpu.memory_space<vmem>>, vector<2048x512xf32>
    %cst = arith.constant dense<0.000000e+00> : vector<8x512xf32>
    %2 = tpu.matmul %0, %1, %cst {dimension_numbers = #tpu.dot_dimension_numbers<[1], [0], [0], [1], [0, 0, 1, 1], [], []>} : vector<8x2048xf32>, vector<2048x512xf32>, vector<8x512xf32> -> vector<8x512xf32>
    %c0_3 = arith.constant 0 : index
    %c0_4 = arith.constant 0 : index
    %3 = vector.load %arg6[%c0_3, %c0_4] : memref<1x512xf32, #tpu.memory_space<vmem>>, vector<1x512xf32>
    %4 = vector.broadcast %3 : vector<1x512xf32> to vector<8x512xf32>
    %5 = arith.addf %2, %4 : vector<8x512xf32>
    %cst_5 = arith.constant 0.000000e+00 : f32
    %6 = vector.broadcast %cst_5 : f32 to vector<8x512xf32>
    %7 = arith.cmpf oge, %5, %6 : vector<8x512xf32>
    %cst_6 = arith.constant 0.00999999977 : f32
    %8 = vector.broadcast %cst_6 : f32 to vector<8x512xf32>
    %9 = arith.mulf %8, %5 : vector<8x512xf32>
    %10 = arith.select %7, %5, %9 : vector<8x512xi1>, vector<8x512xf32>
    %c0_7 = arith.constant 0 : index
    %c0_8 = arith.constant 0 : index
    %11 = vector.load %arg7[%c0_7, %c0_8] : memref<512x128xf32, #tpu.memory_space<vmem>>, vector<512x128xf32>
    %cst_9 = arith.constant dense<0.000000e+00> : vector<8x128xf32>
    %12 = tpu.matmul %10, %11, %cst_9 {dimension_numbers = #tpu.dot_dimension_numbers<[1], [0], [0], [1], [0, 0, 1, 1], [], []>} : vector<8x512xf32>, vector<512x128xf32>, vector<8x128xf32> -> vector<8x128xf32>
    %c0_10 = arith.constant 0 : index
    %c0_11 = arith.constant 0 : index
    %13 = vector.load %arg8[%c0_10, %c0_11] : memref<1x128xf32, #tpu.memory_space<vmem>>, vector<1x128xf32>
    %14 = vector.broadcast %13 : vector<1x128xf32> to vector<8x128xf32>
    %15 = arith.addf %12, %14 : vector<8x128xf32>
    %cst_12 = arith.constant 0.000000e+00 : f32
    %16 = vector.broadcast %cst_12 : f32 to vector<8x128xf32>
    %17 = arith.cmpf oge, %15, %16 : vector<8x128xf32>
    %cst_13 = arith.constant 0.00999999977 : f32
    %18 = vector.broadcast %cst_13 : f32 to vector<8x128xf32>
    %19 = arith.mulf %18, %15 : vector<8x128xf32>
    %20 = arith.select %17, %15, %19 : vector<8x128xi1>, vector<8x128xf32>
    %c0_14 = arith.constant 0 : index
    %c0_15 = arith.constant 0 : index
    %21 = vector.load %arg9[%c0_14, %c0_15] : memref<128x128xf32, #tpu.memory_space<vmem>>, vector<128x128xf32>
    %cst_16 = arith.constant dense<0.000000e+00> : vector<8x128xf32>
    %22 = tpu.matmul %20, %21, %cst_16 {dimension_numbers = #tpu.dot_dimension_numbers<[1], [0], [0], [1], [0, 0, 1, 1], [], []>} : vector<8x128xf32>, vector<128x128xf32>, vector<8x128xf32> -> vector<8x128xf32>
    %c0_17 = arith.constant 0 : index
    %c0_18 = arith.constant 0 : index
    %23 = vector.load %arg2[%c0_17, %c0_18] : memref<8x16xf32, #tpu.memory_space<vmem>>, vector<8x16xf32>
    %c0_19 = arith.constant 0 : index
    %c0_20 = arith.constant 0 : index
    %24 = vector.load %arg10[%c0_19, %c0_20] : memref<16x128xf32, #tpu.memory_space<vmem>>, vector<16x128xf32>
    %cst_21 = arith.constant dense<0.000000e+00> : vector<8x128xf32>
    %25 = tpu.matmul %23, %24, %cst_21 {dimension_numbers = #tpu.dot_dimension_numbers<[1], [0], [0], [1], [0, 0, 1, 1], [], []>} : vector<8x16xf32>, vector<16x128xf32>, vector<8x128xf32> -> vector<8x128xf32>
    %26 = arith.addf %22, %25 : vector<8x128xf32>
    %c0_22 = arith.constant 0 : index
    %c0_23 = arith.constant 0 : index
    %27 = vector.load %arg3[%c0_22, %c0_23] : memref<8x16xf32, #tpu.memory_space<vmem>>, vector<8x16xf32>
    %c0_24 = arith.constant 0 : index
    %c0_25 = arith.constant 0 : index
    %28 = vector.load %arg11[%c0_24, %c0_25] : memref<16x128xf32, #tpu.memory_space<vmem>>, vector<16x128xf32>
    %cst_26 = arith.constant dense<0.000000e+00> : vector<8x128xf32>
    %29 = tpu.matmul %27, %28, %cst_26 {dimension_numbers = #tpu.dot_dimension_numbers<[1], [0], [0], [1], [0, 0, 1, 1], [], []>} : vector<8x16xf32>, vector<16x128xf32>, vector<8x128xf32> -> vector<8x128xf32>
    %30 = arith.addf %26, %29 : vector<8x128xf32>
    %c0_27 = arith.constant 0 : index
    %c0_28 = arith.constant 0 : index
    %31 = vector.load %arg4[%c0_27, %c0_28] : memref<8x16xf32, #tpu.memory_space<vmem>>, vector<8x16xf32>
    %c0_29 = arith.constant 0 : index
    %c0_30 = arith.constant 0 : index
    %32 = vector.load %arg12[%c0_29, %c0_30] : memref<16x128xf32, #tpu.memory_space<vmem>>, vector<16x128xf32>
    %cst_31 = arith.constant dense<0.000000e+00> : vector<8x128xf32>
    %33 = tpu.matmul %31, %32, %cst_31 {dimension_numbers = #tpu.dot_dimension_numbers<[1], [0], [0], [1], [0, 0, 1, 1], [], []>} : vector<8x16xf32>, vector<16x128xf32>, vector<8x128xf32> -> vector<8x128xf32>
    %34 = arith.addf %30, %33 : vector<8x128xf32>
    %c0_32 = arith.constant 0 : index
    %c0_33 = arith.constant 0 : index
    %35 = vector.load %arg13[%c0_32, %c0_33] : memref<1x128xf32, #tpu.memory_space<vmem>>, vector<1x128xf32>
    %36 = vector.broadcast %35 : vector<1x128xf32> to vector<8x128xf32>
    %37 = arith.addf %34, %36 : vector<8x128xf32>
    %cst_34 = arith.constant 0.000000e+00 : f32
    %38 = vector.broadcast %cst_34 : f32 to vector<8x128xf32>
    %39 = arith.cmpf oge, %37, %38 : vector<8x128xf32>
    %cst_35 = arith.constant 0.00999999977 : f32
    %40 = vector.broadcast %cst_35 : f32 to vector<8x128xf32>
    %41 = arith.mulf %40, %37 : vector<8x128xf32>
    %42 = arith.select %39, %37, %41 : vector<8x128xi1>, vector<8x128xf32>
    %c0_36 = arith.constant 0 : index
    %c0_37 = arith.constant 0 : index
    %43 = vector.load %arg14[%c0_36, %c0_37] : memref<128x128xf32, #tpu.memory_space<vmem>>, vector<128x128xf32>
    %cst_38 = arith.constant dense<0.000000e+00> : vector<8x128xf32>
    %44 = tpu.matmul %42, %43, %cst_38 {dimension_numbers = #tpu.dot_dimension_numbers<[1], [0], [0], [1], [0, 0, 1, 1], [], []>} : vector<8x128xf32>, vector<128x128xf32>, vector<8x128xf32> -> vector<8x128xf32>
    %c0_39 = arith.constant 0 : index
    %c0_40 = arith.constant 0 : index
    %45 = vector.load %arg15[%c0_39, %c0_40] : memref<1x128xf32, #tpu.memory_space<vmem>>, vector<1x128xf32>
    %46 = vector.broadcast %45 : vector<1x128xf32> to vector<8x128xf32>
    %47 = arith.addf %44, %46 : vector<8x128xf32>
    %cst_41 = arith.constant 0.000000e+00 : f32
    %48 = vector.broadcast %cst_41 : f32 to vector<8x128xf32>
    %49 = arith.cmpf oge, %47, %48 : vector<8x128xf32>
    %cst_42 = arith.constant 0.00999999977 : f32
    %50 = vector.broadcast %cst_42 : f32 to vector<8x128xf32>
    %51 = arith.mulf %50, %47 : vector<8x128xf32>
    %52 = arith.select %49, %47, %51 : vector<8x128xi1>, vector<8x128xf32>
    %c0_43 = arith.constant 0 : index
    %c0_44 = arith.constant 0 : index
    %53 = vector.load %arg16[%c0_43, %c0_44] : memref<128x128xf32, #tpu.memory_space<vmem>>, vector<128x128xf32>
    %cst_45 = arith.constant dense<0.000000e+00> : vector<8x128xf32>
    %54 = tpu.matmul %52, %53, %cst_45 {dimension_numbers = #tpu.dot_dimension_numbers<[1], [0], [0], [1], [0, 0, 1, 1], [], []>} : vector<8x128xf32>, vector<128x128xf32>, vector<8x128xf32> -> vector<8x128xf32>
    %c0_46 = arith.constant 0 : index
    %c0_47 = arith.constant 0 : index
    %55 = vector.load %arg17[%c0_46, %c0_47] : memref<1x128xf32, #tpu.memory_space<vmem>>, vector<1x128xf32>
    %56 = vector.broadcast %55 : vector<1x128xf32> to vector<8x128xf32>
    %57 = arith.addf %54, %56 : vector<8x128xf32>
    %cst_48 = arith.constant 0.000000e+00 : f32
    %58 = vector.broadcast %cst_48 : f32 to vector<8x128xf32>
    %59 = arith.cmpf oge, %57, %58 : vector<8x128xf32>
    %cst_49 = arith.constant 0.00999999977 : f32
    %60 = vector.broadcast %cst_49 : f32 to vector<8x128xf32>
    %61 = arith.mulf %60, %57 : vector<8x128xf32>
    %62 = arith.select %59, %57, %61 : vector<8x128xi1>, vector<8x128xf32>
    %c0_50 = arith.constant 0 : index
    %c0_51 = arith.constant 0 : index
    %63 = vector.load %arg18[%c0_50, %c0_51] : memref<128x256xf32, #tpu.memory_space<vmem>>, vector<128x256xf32>
    %cst_52 = arith.constant dense<0.000000e+00> : vector<8x256xf32>
    %64 = tpu.matmul %62, %63, %cst_52 {dimension_numbers = #tpu.dot_dimension_numbers<[1], [0], [0], [1], [0, 0, 1, 1], [], []>} : vector<8x128xf32>, vector<128x256xf32>, vector<8x256xf32> -> vector<8x256xf32>
    %c0_53 = arith.constant 0 : index
    %c0_54 = arith.constant 0 : index
    %65 = vector.load %arg19[%c0_53, %c0_54] : memref<1x256xf32, #tpu.memory_space<vmem>>, vector<1x256xf32>
    %66 = vector.broadcast %65 : vector<1x256xf32> to vector<8x256xf32>
    %67 = arith.addf %64, %66 : vector<8x256xf32>
    %cst_55 = arith.constant 0.000000e+00 : f32
    %68 = vector.broadcast %cst_55 : f32 to vector<8x256xf32>
    %69 = arith.cmpf oge, %67, %68 : vector<8x256xf32>
    %cst_56 = arith.constant 0.00999999977 : f32
    %70 = vector.broadcast %cst_56 : f32 to vector<8x256xf32>
    %71 = arith.mulf %70, %67 : vector<8x256xf32>
    %72 = arith.select %69, %67, %71 : vector<8x256xi1>, vector<8x256xf32>
    %c0_57 = arith.constant 0 : index
    %c0_58 = arith.constant 0 : index
    %73 = vector.load %arg20[%c0_57, %c0_58] : memref<256x128xf32, #tpu.memory_space<vmem>>, vector<256x128xf32>
    %cst_59 = arith.constant dense<0.000000e+00> : vector<8x128xf32>
    %74 = tpu.matmul %72, %73, %cst_59 {dimension_numbers = #tpu.dot_dimension_numbers<[1], [0], [0], [1], [0, 0, 1, 1], [], []>} : vector<8x256xf32>, vector<256x128xf32>, vector<8x128xf32> -> vector<8x128xf32>
    %c0_60 = arith.constant 0 : index
    %c0_61 = arith.constant 0 : index
    %75 = vector.load %arg21[%c0_60, %c0_61] : memref<1x128xf32, #tpu.memory_space<vmem>>, vector<1x128xf32>
    %76 = vector.broadcast %75 : vector<1x128xf32> to vector<8x128xf32>
    %77 = arith.addf %74, %76 : vector<8x128xf32>
    %cst_62 = arith.constant 0.000000e+00 : f32
    %78 = vector.broadcast %cst_62 : f32 to vector<8x128xf32>
    %79 = arith.subf %78, %77 : vector<8x128xf32>
    %80 = math.exp %79 : vector<8x128xf32>
    %cst_63 = arith.constant 1.000000e+00 : f32
    %81 = vector.broadcast %cst_63 : f32 to vector<8x128xf32>
    %82 = arith.addf %81, %80 : vector<8x128xf32>
    %cst_64 = arith.constant 1.000000e+00 : f32
    %83 = vector.broadcast %cst_64 : f32 to vector<8x128xf32>
    %84 = arith.divf %83, %82 : vector<8x128xf32>
    %c0_65 = arith.constant 0 : index
    %c0_66 = arith.constant 0 : index
    %85 = vector.load %arg22[%c0_65, %c0_66] : memref<8x128xf32, #tpu.memory_space<vmem>>, vector<8x128xf32>
    tpu.vector_store %arg22[%c0_65, %c0_66], %84 {strides = array<i32>} : memref<8x128xf32, #tpu.memory_space<vmem>>, vector<8x128xf32>,
    return
  }
  func.func @transform_0(%arg0: i32) -> (i32, i32) {
    %c0_i32 = arith.constant 0 : i32
    %c0_i32_0 = arith.constant 0 : i32
    return %arg0, %c0_i32 : i32, i32
  }
  func.func @transform_1(%arg0: i32) -> (i32, i32) {
    %c0_i32 = arith.constant 0 : i32
    %c0_i32_0 = arith.constant 0 : i32
    return %arg0, %c0_i32 : i32, i32
  }
  func.func @transform_2(%arg0: i32) -> (i32, i32) {
    %c0_i32 = arith.constant 0 : i32
    %c0_i32_0 = arith.constant 0 : i32
    return %arg0, %c0_i32 : i32, i32
  }
  func.func @transform_3(%arg0: i32) -> (i32, i32) {
    %c0_i32 = arith.constant 0 : i32
    %c0_i32_0 = arith.constant 0 : i32
    return %arg0, %c0_i32 : i32, i32
  }
  func.func @transform_4(%arg0: i32) -> (i32, i32) {
    %c0_i32 = arith.constant 0 : i32
    %c0_i32_0 = arith.constant 0 : i32
    %c0_i32_1 = arith.constant 0 : i32
    return %c0_i32, %c0_i32_0 : i32, i32
  }
  func.func @transform_5(%arg0: i32) -> (i32, i32) {
    %c0_i32 = arith.constant 0 : i32
    %c0_i32_0 = arith.constant 0 : i32
    %c0_i32_1 = arith.constant 0 : i32
    return %c0_i32, %c0_i32_0 : i32, i32
  }
  func.func @transform_6(%arg0: i32) -> (i32, i32) {
    %c0_i32 = arith.constant 0 : i32
    %c0_i32_0 = arith.constant 0 : i32
    %c0_i32_1 = arith.constant 0 : i32
    return %c0_i32, %c0_i32_0 : i32, i32
  }
  func.func @transform_7(%arg0: i32) -> (i32, i32) {
    %c0_i32 = arith.constant 0 : i32
    %c0_i32_0 = arith.constant 0 : i32
    %c0_i32_1 = arith.constant 0 : i32
    return %c0_i32, %c0_i32_0 : i32, i32
  }
  func.func @transform_8(%arg0: i32) -> (i32, i32) {
    %c0_i32 = arith.constant 0 : i32
    %c0_i32_0 = arith.constant 0 : i32
    %c0_i32_1 = arith.constant 0 : i32
    return %c0_i32, %c0_i32_0 : i32, i32
  }
  func.func @transform_9(%arg0: i32) -> (i32, i32) {
    %c0_i32 = arith.constant 0 : i32
    %c0_i32_0 = arith.constant 0 : i32
    %c0_i32_1 = arith.constant 0 : i32
    return %c0_i32, %c0_i32_0 : i32, i32
  }
  func.func @transform_10(%arg0: i32) -> (i32, i32) {
    %c0_i32 = arith.constant 0 : i32
    %c0_i32_0 = arith.constant 0 : i32
    %c0_i32_1 = arith.constant 0 : i32
    return %c0_i32, %c0_i32_0 : i32, i32
  }
  func.func @transform_11(%arg0: i32) -> (i32, i32) {
    %c0_i32 = arith.constant 0 : i32
    %c0_i32_0 = arith.constant 0 : i32
    %c0_i32_1 = arith.constant 0 : i32
    return %c0_i32, %c0_i32_0 : i32, i32
  }
  func.func @transform_12(%arg0: i32) -> (i32, i32) {
    %c0_i32 = arith.constant 0 : i32
    %c0_i32_0 = arith.constant 0 : i32
    %c0_i32_1 = arith.constant 0 : i32
    return %c0_i32, %c0_i32_0 : i32, i32
  }
  func.func @transform_13(%arg0: i32) -> (i32, i32) {
    %c0_i32 = arith.constant 0 : i32
    %c0_i32_0 = arith.constant 0 : i32
    %c0_i32_1 = arith.constant 0 : i32
    return %c0_i32, %c0_i32_0 : i32, i32
  }
  func.func @transform_14(%arg0: i32) -> (i32, i32) {
    %c0_i32 = arith.constant 0 : i32
    %c0_i32_0 = arith.constant 0 : i32
    %c0_i32_1 = arith.constant 0 : i32
    return %c0_i32, %c0_i32_0 : i32, i32
  }
  func.func @transform_15(%arg0: i32) -> (i32, i32) {
    %c0_i32 = arith.constant 0 : i32
    %c0_i32_0 = arith.constant 0 : i32
    %c0_i32_1 = arith.constant 0 : i32
    return %c0_i32, %c0_i32_0 : i32, i32
  }
  func.func @transform_16(%arg0: i32) -> (i32, i32) {
    %c0_i32 = arith.constant 0 : i32
    %c0_i32_0 = arith.constant 0 : i32
    %c0_i32_1 = arith.constant 0 : i32
    return %c0_i32, %c0_i32_0 : i32, i32
  }
  func.func @transform_17(%arg0: i32) -> (i32, i32) {
    %c0_i32 = arith.constant 0 : i32
    %c0_i32_0 = arith.constant 0 : i32
    %c0_i32_1 = arith.constant 0 : i32
    return %c0_i32, %c0_i32_0 : i32, i32
  }
  func.func @transform_18(%arg0: i32) -> (i32, i32) {
    %c0_i32 = arith.constant 0 : i32
    %c0_i32_0 = arith.constant 0 : i32
    %c0_i32_1 = arith.constant 0 : i32
    return %c0_i32, %c0_i32_0 : i32, i32
  }
  func.func @transform_19(%arg0: i32) -> (i32, i32) {
    %c0_i32 = arith.constant 0 : i32
    %c0_i32_0 = arith.constant 0 : i32
    %c0_i32_1 = arith.constant 0 : i32
    return %c0_i32, %c0_i32_0 : i32, i32
  }
  func.func @transform_20(%arg0: i32) -> (i32, i32) {
    %c0_i32 = arith.constant 0 : i32
    %c0_i32_0 = arith.constant 0 : i32
    %c0_i32_1 = arith.constant 0 : i32
    return %c0_i32, %c0_i32_0 : i32, i32
  }
  func.func @transform_21(%arg0: i32) -> (i32, i32) {
    %c0_i32 = arith.constant 0 : i32
    %c0_i32_0 = arith.constant 0 : i32
    return %arg0, %c0_i32 : i32, i32
  }
}

</mosaic_0001>

<bundles_post_ra>
// kernel: selector_forward.1
= control target key start
LH: loop header
LB: loop body
LE: loop exit
PB: predicated region body
PF: predicated region fallthrough
CT: control target
= control target key end

     0   :  { %s5959_s0 = inlined_call_operand.vmem [shape: f32[8,2048], index: 0, kind: input, shape index: {}]   ;;  %s5960_s1 = inlined_call_operand.vmem [shape: f32[8,16], index: 1, kind: input, shape index: {}]   ;;  %s5961_s2 = inlined_call_operand.vmem [shape: f32[8,16], index: 2, kind: input, shape index: {}]   ;;  %s5962_s3 = inlined_call_operand.vmem [shape: f32[8,16], index: 3, kind: input, shape index: {}]   ;;  %s5963_s4 = inlined_call_operand.hbm [shape: f32[2048,512], index: 4, kind: input, shape index: {}]   ;;  %s5964_s5 = inlined_call_operand.hbm [shape: f32[1,512], index: 5, kind: input, shape index: {}]   ;;  %s5965_s6 = inlined_call_operand.hbm [shape: f32[512,128], index: 6, kind: input, shape index: {}]   ;;  %s5966_s7 = inlined_call_operand.hbm [shape: f32[1,128], index: 7, kind: input, shape index: {}]   ;;  %s5967_s8 = inlined_call_operand.hbm [shape: f32[128,128], index: 8, kind: input, shape index: {}]   ;;  %s5968_s9 = inlined_call_operand.hbm [shape: f32[16,128], index: 9, kind: input, shape index: {}]   ;;  %s5969_s10 = inlined_call_operand.hbm [shape: f32[16,128], index: 10, kind: input, shape index: {}]   ;;  %s5970_s11 = inlined_call_operand.hbm [shape: f32[16,128], index: 11, kind: input, shape index: {}]   ;;  %s5971_s12 = inlined_call_operand.hbm [shape: f32[1,128], index: 12, kind: input, shape index: {}]   ;;  %s5972_s13 = inlined_call_operand.hbm [shape: f32[128,128], index: 13, kind: input, shape index: {}]   ;;  %s5973_s14 = inlined_call_operand.hbm [shape: f32[1,128], index: 14, kind: input, shape index: {}]   ;;  %s5974_s15 = inlined_call_operand.hbm [shape: f32[128,128], index: 15, kind: input, shape index: {}]   ;;  %s5975_s16 = inlined_call_operand.hbm [shape: f32[1,128], index: 16, kind: input, shape index: {}]   ;;  %s5976_s17 = inlined_call_operand.hbm [shape: f32[128,256], index: 17, kind: input, shape index: {}]   ;;  %s5977_s18 = inlined_call_operand.hbm [shape: f32[1,256], index: 18, kind: input, shape index: {}]   ;;  %s5978_s19 = inlined_call_operand.hbm [shape: f32[256,128], index: 19, kind: input, shape index: {}]   ;;  %s5979_s20 = inlined_call_operand.hbm [shape: f32[1,128], index: 20, kind: input, shape index: {}]   ;;  %s5980_s21 = inlined_call_operand.vmem [shape: f32[8,128], index: 21, kind: output, shape index: {}]  }
   0x1   :  { %5984 = sst [smem:[#allocation37_spill]] %s5959_s0 }
   0x2   :  { %5985 = sst [smem:[#allocation38_spill]] %s5960_s1 }
   0x3   :  { %5986 = sst [smem:[#allocation39_spill]] %s5961_s2 }
   0x4   :  { %5987 = sst [smem:[#allocation40_spill]] %s5962_s3 }
   0x5   :  { %5988 = sst [smem:[#allocation41_spill]] %s5963_s4 }
   0x6   :  { %5989 = sst [smem:[#allocation42_spill]] %s5964_s5 }
   0x7   :  { %26 = vsyncpa [#allocation3], 0 }
   0x8   :  { %27 = vsyncpa [#allocation5], 0 }
   0x9   :  { %28 = vsyncpa [#allocation8], 0 }
   0xa   :  { %29 = vsyncpa [#allocation11], 0 }
   0xb   :  { %30 = vsyncpa [#allocation14], 0 }
   0xc   :  { %31 = vsyncpa [#allocation17], 0 }
   0xd   :  { %32 = vsyncpa [#allocation20], 0 }
   0xe   :  { %33 = vsyncpa [#allocation23], 0 }
   0xf   :  { %34 = vsyncpa [#allocation26], 0  ;;  %s5464_s2 = smov [#allocation4]   ;;  %s5465_s26 = smov [#allocation7]  }
  0x10   :  { %s61_s25 = sshll.u32 %s5464_s2, 4  ;;  %s83_s27 = sshll.u32 %s5465_s26, 4  ;;  %s62_s25 = int_to_ptr.vmem [resolvable:$true] %s61_s25  ;;  %s84_s27 = int_to_ptr.vmem [resolvable:$true] %s83_s27 }
  0x11   :  { %s5990_s29 = sld [smem:[#allocation42_spill]] }
  0x17   :  { %s5072_s0 = scalar_lea.hbm %s5990_s29, 64 }
  0x18   :  { %p5073_p0 = scmp.ne.s32.totalorder %s5990_s29, %s5072_s0  ;;  %p5076_p1 = scmp.lt.u32.totalorder %s5072_s0, %s5990_s29 }
  0x1a   :  { %p5078_p2 = pnand %p5076_p1, %p5073_p0 }
  0x1c   :  { %5081 = shalt.err (!%p5078_p2)
}
  0x1d   :  { %s5082_s23 = scalar_lea.vmem %s62_s25, 64  ;;  %p5087_p4 = scmp.lt.s32.totalorder %s62_s25, %s62_s25 }
  0x1e   :  { %p5083_p3 = scmp.ne.s32.totalorder %s62_s25, %s5082_s23  ;;  %p5088_p5 = scmp.lt.s32.totalorder %s5082_s23, %s5082_s23 }
  0x20   :  { %p5089_p6 = por %p5088_p5, %p5087_p4 }
  0x22   :  { %p5090_p7 = pnand %p5089_p6, %p5083_p3 }
  0x24   :  { %5093 = shalt.err (!%p5090_p7)
}
  0x25   :  { %64 = dma.hbm_to_vmem [thread:$0]  %s5990_s29, 64, %s62_s25, [#allocation5]  }
  0x26   :  { %s5094_s3 = scalar_lea.hbm %s5966_s7, 16 }
  0x27   :  { %p5095_p8 = scmp.ne.s32.totalorder %s5966_s7, %s5094_s3  ;;  %p5098_p9 = scmp.lt.u32.totalorder %s5094_s3, %s5966_s7 }
  0x29   :  { %p5100_p10 = pnand %p5098_p9, %p5095_p8 }
  0x2b   :  { %5103 = shalt.err (!%p5100_p10)
}
  0x2c   :  { %s5104_s5 = scalar_lea.vmem %s84_s27, 16  ;;  %s5108_s22 = scalar_lea.vmem %s84_s27, 32 }
  0x2d   :  { %p5105_p11 = scmp.ne.s32.totalorder %s84_s27, %s5104_s5  ;;  %p5109_p12 = scmp.lt.s32.totalorder %s84_s27, %s84_s27 }
  0x2e   :  { %p5110_p13 = scmp.lt.s32.totalorder %s5108_s22, %s5104_s5 }
  0x30   :  { %p5111_p0 = por %p5110_p13, %p5109_p12 }
  0x32   :  { %p5112_p1 = pnand %p5111_p0, %p5105_p11 }
  0x34   :  { %5115 = shalt.err (!%p5112_p1)
}
  0x35   :  { %86 = dma.hbm_to_vmem [thread:$0]  %s5966_s7, 16, %s84_s27, [#allocation8]  }
  0x36   :  { %s5466_s23 = smov [#allocation10]   ;;  %s5467_s24 = smov [#allocation13]  }
  0x37   :  { %s104_s1 = sshll.u32 %s5466_s23, 4  ;;  %s128_s2 = sshll.u32 %s5467_s24, 4  ;;  %s105_s1 = int_to_ptr.vmem [resolvable:$true] %s104_s1  ;;  %s5624_s2 = int_to_ptr.vmem [resolvable:$true] %s128_s2 }
  0x38   :  { %s5116_s28 = scalar_lea.hbm %s5968_s9, 256 }
  0x39   :  { %p5117_p2 = scmp.ne.s32.totalorder %s5968_s9, %s5116_s28  ;;  %p5120_p3 = scmp.lt.u32.totalorder %s5116_s28, %s5968_s9 }
  0x3b   :  { %p5122_p4 = pnand %p5120_p3, %p5117_p2 }
  0x3d   :  { %5125 = shalt.err (!%p5122_p4)
}
  0x3e   :  { %s5126_s7 = scalar_lea.vmem %s105_s1, 256  ;;  %p5131_p6 = scmp.lt.s32.totalorder %s105_s1, %s105_s1 }
  0x3f   :  { %p5127_p5 = scmp.ne.s32.totalorder %s105_s1, %s5126_s7  ;;  %p5132_p7 = scmp.lt.s32.totalorder %s5126_s7, %s5126_s7 }
  0x41   :  { %p5133_p8 = por %p5132_p7, %p5131_p6 }
  0x43   :  { %p5134_p9 = pnand %p5133_p8, %p5127_p5 }
  0x45   :  { %5137 = shalt.err (!%p5134_p9)
}
  0x46   :  { %s5468_s27 = smov 128   ;;  %s5469_s22 = smov 8  }
  0x47   :  { %110 = dma.hbm_to_vmem [thread:$0]  %s5968_s9, 256, %s105_s1, [#allocation11], %s5468_s27, %s5468_s27, %s5469_s22  }
  0x48   :  { %s5138_s26 = scalar_lea.hbm %s5970_s11, 256 }
  0x49   :  { %p5139_p10 = scmp.ne.s32.totalorder %s5970_s11, %s5138_s26  ;;  %p5142_p11 = scmp.lt.u32.totalorder %s5138_s26, %s5970_s11 }
  0x4b   :  { %p5144_p12 = pnand %p5142_p11, %p5139_p10 }
  0x4d   :  { %5147 = shalt.err (!%p5144_p12)
}
  0x4e   :  { %s5148_s30 = scalar_lea.vmem %s5624_s2, 256  ;;  %p5153_p0 = scmp.lt.s32.totalorder %s5624_s2, %s5624_s2 }
  0x4f   :  { %p5149_p13 = scmp.ne.s32.totalorder %s5624_s2, %s5148_s30  ;;  %p5154_p1 = scmp.lt.s32.totalorder %s5148_s30, %s5148_s30 }
  0x51   :  { %p5155_p2 = por %p5154_p1, %p5153_p0 }
  0x53   :  { %p5156_p3 = pnand %p5155_p2, %p5149_p13 }
  0x55   :  { %5159 = shalt.err (!%p5156_p3)
}
  0x56   :  { %134 = dma.hbm_to_vmem [thread:$0]  %s5970_s11, 256, %s5624_s2, [#allocation14], %s5468_s27, %s5468_s27, %s5469_s22  }
  0x57   :  { %s5470_s5 = smov [#allocation16]   ;;  %s5471_s25 = smov [#allocation19]  }
  0x58   :  { %s150_s7 = sshll.u32 %s5470_s5, 4  ;;  %s172_s29 = sshll.u32 %s5471_s25, 4  ;;  %s151_s7 = int_to_ptr.vmem [resolvable:$true] %s150_s7  ;;  %s5661_s29 = int_to_ptr.vmem [resolvable:$true] %s172_s29 }
  0x59   :  { %s5160_s26 = scalar_lea.hbm %s5972_s13, 2048 }
  0x5a   :  { %p5161_p4 = scmp.ne.s32.totalorder %s5972_s13, %s5160_s26  ;;  %p5164_p5 = scmp.lt.u32.totalorder %s5160_s26, %s5972_s13 }
  0x5c   :  { %p5166_p6 = pnand %p5164_p5, %p5161_p4 }
  0x5e   :  { %5169 = shalt.err (!%p5166_p6)
}
  0x5f   :  { %s5170_s11 = scalar_lea.vmem %s151_s7, 2048  ;;  %p5175_p8 = scmp.lt.s32.totalorder %s151_s7, %s151_s7 }
  0x60   :  { %p5171_p7 = scmp.ne.s32.totalorder %s151_s7, %s5170_s11  ;;  %p5176_p9 = scmp.lt.s32.totalorder %s5170_s11, %s5170_s11 }
  0x62   :  { %p5177_p10 = por %p5176_p9, %p5175_p8 }
  0x64   :  { %p5178_p11 = pnand %p5177_p10, %p5171_p7 }
  0x66   :  { %5181 = shalt.err (!%p5178_p11)
}
  0x67   :  { %156 = dma.hbm_to_vmem [thread:$0]  %s5972_s13, 2048, %s151_s7, [#allocation17], %s5468_s27, %s5468_s27, %s5469_s22  }
  0x68   :  { %s5182_s5 = scalar_lea.hbm %s5974_s15, 2048 }
  0x69   :  { %p5183_p12 = scmp.ne.s32.totalorder %s5974_s15, %s5182_s5  ;;  %p5186_p13 = scmp.lt.u32.totalorder %s5182_s5, %s5974_s15 }
  0x6b   :  { %p5188_p0 = pnand %p5186_p13, %p5183_p12 }
  0x6d   :  { %5191 = shalt.err (!%p5188_p0)
}
  0x6e   :  { %s5192_s3 = scalar_lea.vmem %s5661_s29, 2048  ;;  %p5197_p2 = scmp.lt.s32.totalorder %s5661_s29, %s5661_s29 }
  0x6f   :  { %p5193_p1 = scmp.ne.s32.totalorder %s5661_s29, %s5192_s3  ;;  %p5198_p3 = scmp.lt.s32.totalorder %s5192_s3, %s5192_s3 }
  0x71   :  { %p5199_p4 = por %p5198_p3, %p5197_p2 }
  0x73   :  { %p5200_p5 = pnand %p5199_p4, %p5193_p1 }
  0x75   :  { %5203 = shalt.err (!%p5200_p5)
}
  0x76   :  { %178 = dma.hbm_to_vmem [thread:$0]  %s5974_s15, 2048, %s5661_s29, [#allocation20], %s5468_s27, %s5468_s27, %s5469_s22  }
  0x77   :  { %s5472_s28 = smov [#allocation22]   ;;  %s5204_s2 = scalar_lea.hbm %s5976_s17, 4096 }
  0x78   :  { %s194_s4 = sshll.u32 %s5472_s28, 4  ;;  %p5205_p6 = scmp.ne.s32.totalorder %s5976_s17, %s5204_s2  ;;  %s195_s4 = int_to_ptr.vmem [resolvable:$true] %s194_s4 }
  0x79   :  { %p5208_p7 = scmp.lt.u32.totalorder %s5204_s2, %s5976_s17 }
  0x7b   :  { %p5210_p8 = pnand %p5208_p7, %p5205_p6 }
  0x7d   :  { %5213 = shalt.err (!%p5210_p8)
}
  0x7e   :  { %s5214_s25 = scalar_lea.vmem %s195_s4, 4096  ;;  %p5219_p10 = scmp.lt.s32.totalorder %s195_s4, %s195_s4 }
  0x7f   :  { %p5215_p9 = scmp.ne.s32.totalorder %s195_s4, %s5214_s25  ;;  %p5220_p11 = scmp.lt.s32.totalorder %s5214_s25, %s5214_s25 }
  0x81   :  { %p5221_p12 = por %p5220_p11, %p5219_p10 }
  0x83   :  { %p5222_p13 = pnand %p5221_p12, %p5215_p9 }
  0x85   :  { %5225 = shalt.err (!%p5222_p13)
}
  0x86   :  { %s5473_s15 = smov 256   ;;  %s5474_s29 = smov 16  }
  0x87   :  { %200 = dma.hbm_to_vmem [thread:$0]  %s5976_s17, 4096, %s195_s4, [#allocation23], %s5473_s15, %s5473_s15, %s5474_s29  }
  0x88   :  { %s5475_s26 = smov [#allocation25]   ;;  %s5476_s13 = smov [#allocation2]  }
  0x89   :  { %s216_s3 = sshll.u32 %s5475_s26, 4  ;;  %s48_s7 = sshll.u32 %s5476_s13, 4  ;;  %s217_s3 = int_to_ptr.vmem [resolvable:$true] %s216_s3  ;;  %s49_s7 = int_to_ptr.vmem [resolvable:$true] %s48_s7 }
  0x8a   :  { %s5226_s11 = scalar_lea.hbm %s5978_s19, 4096 }
  0x8b   :  { %p5227_p0 = scmp.ne.s32.totalorder %s5978_s19, %s5226_s11  ;;  %p5230_p1 = scmp.lt.u32.totalorder %s5226_s11, %s5978_s19 }
  0x8d   :  { %p5232_p2 = pnand %p5230_p1, %p5227_p0 }
  0x8f   :  { %5235 = shalt.err (!%p5232_p2)
}
  0x90   :  { %s5236_s17 = scalar_lea.vmem %s217_s3, 4096  ;;  %p5241_p4 = scmp.lt.s32.totalorder %s217_s3, %s217_s3 }
  0x91   :  { %p5237_p3 = scmp.ne.s32.totalorder %s217_s3, %s5236_s17  ;;  %p5242_p5 = scmp.lt.s32.totalorder %s5236_s17, %s5236_s17 }
  0x93   :  { %p5243_p6 = por %p5242_p5, %p5241_p4 }
  0x95   :  { %p5244_p7 = pnand %p5243_p6, %p5237_p3 }
  0x97   :  { %5247 = shalt.err (!%p5244_p7)
}
  0x98   :  { %222 = dma.hbm_to_vmem [thread:$0]  %s5978_s19, 4096, %s217_s3, [#allocation26], %s5468_s27, %s5468_s27, %s5469_s22  }
  0x99   :  { %s5991_s29 = sld [smem:[#allocation41_spill]] }
  0x9f   :  { %s5248_s23 = scalar_lea.hbm %s5991_s29, 131072 }
  0xa0   :  { %p5249_p8 = scmp.ne.s32.totalorder %s5991_s29, %s5248_s23  ;;  %p5252_p9 = scmp.lt.u32.totalorder %s5248_s23, %s5991_s29 }
  0xa2   :  { %p5254_p10 = pnand %p5252_p9, %p5249_p8 }
  0xa4   :  { %5257 = shalt.err (!%p5254_p10)
}
  0xa5   :  { %s5258_s0 = scalar_lea.vmem %s49_s7, 131072  ;;  %p5263_p12 = scmp.lt.s32.totalorder %s49_s7, %s49_s7 }
  0xa6   :  { %p5259_p11 = scmp.ne.s32.totalorder %s49_s7, %s5258_s0  ;;  %p5264_p13 = scmp.lt.s32.totalorder %s5258_s0, %s5258_s0 }
  0xa8   :  { %p5265_p0 = por %p5264_p13, %p5263_p12 }
  0xaa   :  { %p5266_p1 = pnand %p5265_p0, %p5259_p11 }
  0xac   :  { %5269 = shalt.err (!%p5266_p1)
}
  0xad   :  { %s5477_s19 = smov 512   ;;  %s5478_s3 = smov 32  }
  0xae   :  { %54 = dma.hbm_to_vmem [thread:$0]  %s5991_s29, 131072, %s49_s7, [#allocation3], %s5477_s19, %s5477_s19, %s5478_s3  }
  0xaf   :  { %s5479_s30 = smov [#allocation6]   ;;  %s5480_s1 = smov [#allocation9]  }
  0xb0   :  { %s70_s9 = sshll.u32 %s5479_s30, 4  ;;  %s92_s17 = sshll.u32 %s5480_s1, 4  ;;  %s71_s9 = int_to_ptr.vmem [resolvable:$true] %s70_s9  ;;  %s93_s17 = int_to_ptr.vmem [resolvable:$true] %s92_s17 }
  0xb1   :  { %s5270_s25 = scalar_lea.hbm %s5965_s6, 8192 }
  0xb2   :  { %p5271_p2 = scmp.ne.s32.totalorder %s5965_s6, %s5270_s25  ;;  %p5274_p3 = scmp.lt.u32.totalorder %s5270_s25, %s5965_s6 }
  0xb4   :  { %p5276_p4 = pnand %p5274_p3, %p5271_p2 }
  0xb6   :  { %5279 = shalt.err (!%p5276_p4)
}
  0xb7   :  { %s5280_s7 = scalar_lea.vmem %s71_s9, 8192  ;;  %p5285_p6 = scmp.lt.s32.totalorder %s71_s9, %s71_s9 }
  0xb8   :  { %p5281_p5 = scmp.ne.s32.totalorder %s71_s9, %s5280_s7  ;;  %p5286_p7 = scmp.lt.s32.totalorder %s5280_s7, %s5280_s7 }
  0xba   :  { %p5287_p8 = por %p5286_p7, %p5285_p6 }
  0xbc   :  { %p5288_p9 = pnand %p5287_p8, %p5281_p5 }
  0xbe   :  { %5291 = shalt.err (!%p5288_p9)
}
  0xbf   :  { %76 = dma.hbm_to_vmem [thread:$0]  %s5965_s6, 8192, %s71_s9, [#allocation5], %s5468_s27, %s5468_s27, %s5469_s22  }
  0xc0   :  { %s5292_s19 = scalar_lea.hbm %s5967_s8, 2048 }
  0xc1   :  { %p5293_p10 = scmp.ne.s32.totalorder %s5967_s8, %s5292_s19  ;;  %p5296_p11 = scmp.lt.u32.totalorder %s5292_s19, %s5967_s8 }
  0xc3   :  { %p5298_p12 = pnand %p5296_p11, %p5293_p10 }
  0xc5   :  { %5301 = shalt.err (!%p5298_p12)
}
  0xc6   :  { %s5302_s1 = scalar_lea.vmem %s93_s17, 2048  ;;  %p5307_p0 = scmp.lt.s32.totalorder %s93_s17, %s93_s17 }
  0xc7   :  { %p5303_p13 = scmp.ne.s32.totalorder %s93_s17, %s5302_s1  ;;  %p5308_p1 = scmp.lt.s32.totalorder %s5302_s1, %s5302_s1 }
  0xc9   :  { %p5309_p2 = por %p5308_p1, %p5307_p0 }
  0xcb   :  { %p5310_p3 = pnand %p5309_p2, %p5303_p13 }
  0xcd   :  { %5313 = shalt.err (!%p5310_p3)
}
  0xce   :  { %98 = dma.hbm_to_vmem [thread:$0]  %s5967_s8, 2048, %s93_s17, [#allocation8], %s5468_s27, %s5468_s27, %s5469_s22  }
  0xcf   :  { %s5481_s4 = smov [#allocation12]   ;;  %s5482_s25 = smov [#allocation15]  }
  0xd0   :  { %s116_s5 = sshll.u32 %s5481_s4, 4  ;;  %s141_s15 = sshll.u32 %s5482_s25, 4  ;;  %s117_s5 = int_to_ptr.vmem [resolvable:$true] %s116_s5  ;;  %s142_s15 = int_to_ptr.vmem [resolvable:$true] %s141_s15 }
  0xd1   :  { %s5314_s26 = scalar_lea.hbm %s5969_s10, 256 }
  0xd2   :  { %p5315_p4 = scmp.ne.s32.totalorder %s5969_s10, %s5314_s26  ;;  %p5318_p5 = scmp.lt.u32.totalorder %s5314_s26, %s5969_s10 }
  0xd4   :  { %p5320_p6 = pnand %p5318_p5, %p5315_p4 }
  0xd6   :  { %5323 = shalt.err (!%p5320_p6)
}
  0xd7   :  { %s5324_s8 = scalar_lea.vmem %s117_s5, 256  ;;  %p5329_p8 = scmp.lt.s32.totalorder %s117_s5, %s117_s5 }
  0xd8   :  { %p5325_p7 = scmp.ne.s32.totalorder %s117_s5, %s5324_s8  ;;  %p5330_p9 = scmp.lt.s32.totalorder %s5324_s8, %s5324_s8 }
  0xda   :  { %p5331_p10 = por %p5330_p9, %p5329_p8 }
  0xdc   :  { %p5332_p11 = pnand %p5331_p10, %p5325_p7 }
  0xde   :  { %5335 = shalt.err (!%p5332_p11)
}
  0xdf   :  { %122 = dma.hbm_to_vmem [thread:$0]  %s5969_s10, 256, %s117_s5, [#allocation11], %s5468_s27, %s5468_s27, %s5469_s22  }
  0xe0   :  { %s5336_s11 = scalar_lea.hbm %s5971_s12, 16 }
  0xe1   :  { %p5337_p12 = scmp.ne.s32.totalorder %s5971_s12, %s5336_s11  ;;  %p5340_p13 = scmp.lt.u32.totalorder %s5336_s11, %s5971_s12 }
  0xe3   :  { %p5342_p0 = pnand %p5340_p13, %p5337_p12 }
  0xe5   :  { %5345 = shalt.err (!%p5342_p0)
}
  0xe6   :  { %s5346_s9 = scalar_lea.vmem %s142_s15, 16  ;;  %s5350_s4 = scalar_lea.vmem %s142_s15, 32 }
  0xe7   :  { %p5347_p1 = scmp.ne.s32.totalorder %s142_s15, %s5346_s9  ;;  %p5351_p2 = scmp.lt.s32.totalorder %s142_s15, %s142_s15 }
  0xe8   :  { %p5352_p3 = scmp.lt.s32.totalorder %s5350_s4, %s5346_s9 }
  0xea   :  { %p5353_p4 = por %p5352_p3, %p5351_p2 }
  0xec   :  { %p5354_p5 = pnand %p5353_p4, %p5347_p1 }
  0xee   :  { %5357 = shalt.err (!%p5354_p5)
}
  0xef   :  { %144 = dma.hbm_to_vmem [thread:$0]  %s5971_s12, 16, %s142_s15, [#allocation14]  }
  0xf0   :  { %s5483_s22 = smov [#allocation18]   ;;  %s5484_s25 = smov [#allocation21]  }
  0xf1   :  { %s163_s5 = sshll.u32 %s5483_s22, 4  ;;  %s185_s23 = sshll.u32 %s5484_s25, 4  ;;  %s164_s5 = int_to_ptr.vmem [resolvable:$true] %s163_s5  ;;  %s186_s23 = int_to_ptr.vmem [resolvable:$true] %s185_s23 }
  0xf2   :  { %s5358_s7 = scalar_lea.hbm %s5973_s14, 16 }
  0xf3   :  { %p5359_p6 = scmp.ne.s32.totalorder %s5973_s14, %s5358_s7  ;;  %p5362_p7 = scmp.lt.u32.totalorder %s5358_s7, %s5973_s14 }
  0xf5   :  { %p5364_p8 = pnand %p5362_p7, %p5359_p6 }
  0xf7   :  { %5367 = shalt.err (!%p5364_p8)
}
  0xf8   :  { %s5368_s12 = scalar_lea.vmem %s164_s5, 16  ;;  %s5372_s15 = scalar_lea.vmem %s164_s5, 32 }
  0xf9   :  { %p5369_p9 = scmp.ne.s32.totalorder %s164_s5, %s5368_s12  ;;  %p5373_p10 = scmp.lt.s32.totalorder %s164_s5, %s164_s5 }
  0xfa   :  { %p5374_p11 = scmp.lt.s32.totalorder %s5372_s15, %s5368_s12 }
  0xfc   :  { %p5375_p12 = por %p5374_p11, %p5373_p10 }
  0xfe   :  { %p5376_p13 = pnand %p5375_p12, %p5369_p9 }
 0x100   :  { %5379 = shalt.err (!%p5376_p13)
}
 0x101   :  { %166 = dma.hbm_to_vmem [thread:$0]  %s5973_s14, 16, %s164_s5, [#allocation17]  }
 0x102   :  { %s5380_s11 = scalar_lea.hbm %s5975_s16, 16 }
 0x103   :  { %p5381_p0 = scmp.ne.s32.totalorder %s5975_s16, %s5380_s11  ;;  %p5384_p1 = scmp.lt.u32.totalorder %s5380_s11, %s5975_s16 }
 0x105   :  { %p5386_p2 = pnand %p5384_p1, %p5381_p0 }
 0x107   :  { %5389 = shalt.err (!%p5386_p2)
}
 0x108   :  { %s5390_s9 = scalar_lea.vmem %s186_s23, 16  ;;  %s5394_s4 = scalar_lea.vmem %s186_s23, 32 }
 0x109   :  { %p5391_p3 = scmp.ne.s32.totalorder %s186_s23, %s5390_s9  ;;  %p5395_p4 = scmp.lt.s32.totalorder %s186_s23, %s186_s23 }
 0x10a   :  { %p5396_p5 = scmp.lt.s32.totalorder %s5394_s4, %s5390_s9 }
 0x10c   :  { %p5397_p6 = por %p5396_p5, %p5395_p4 }
 0x10e   :  { %p5398_p7 = pnand %p5397_p6, %p5391_p3 }
 0x110   :  { %5401 = shalt.err (!%p5398_p7)
}
 0x111   :  { %188 = dma.hbm_to_vmem [thread:$0]  %s5975_s16, 16, %s186_s23, [#allocation20]  }
 0x112   :  { %s5485_s27 = smov [#allocation24]   ;;  %s5486_s5 = smov [#allocation27]  }
 0x113   :  { %s207_s22 = sshll.u32 %s5485_s27, 4  ;;  %s229_s25 = sshll.u32 %s5486_s5, 4  ;;  %s208_s22 = int_to_ptr.vmem [resolvable:$true] %s207_s22  ;;  %s230_s25 = int_to_ptr.vmem [resolvable:$true] %s229_s25 }
 0x114   :  { %s5402_s7 = scalar_lea.hbm %s5977_s18, 32 }
 0x115   :  { %p5403_p8 = scmp.ne.s32.totalorder %s5977_s18, %s5402_s7  ;;  %p5406_p9 = scmp.lt.u32.totalorder %s5402_s7, %s5977_s18 }
 0x117   :  { %p5408_p10 = pnand %p5406_p9, %p5403_p8 }
 0x119   :  { %5411 = shalt.err (!%p5408_p10)
}
 0x11a   :  { %s5412_s16 = scalar_lea.vmem %s208_s22, 32  ;;  %p5417_p12 = scmp.lt.s32.totalorder %s208_s22, %s208_s22 }
 0x11b   :  { %p5413_p11 = scmp.ne.s32.totalorder %s208_s22, %s5412_s16  ;;  %p5418_p13 = scmp.lt.s32.totalorder %s5412_s16, %s5412_s16 }
 0x11d   :  { %p5419_p0 = por %p5418_p13, %p5417_p12 }
 0x11f   :  { %p5420_p1 = pnand %p5419_p0, %p5413_p11 }
 0x121   :  { %5423 = shalt.err (!%p5420_p1)
}
 0x122   :  { %210 = dma.hbm_to_vmem [thread:$0]  %s5977_s18, 32, %s208_s22, [#allocation23]  }
 0x123   :  { %s5424_s0 = scalar_lea.hbm %s5979_s20, 16 }
 0x124   :  { %p5425_p2 = scmp.ne.s32.totalorder %s5979_s20, %s5424_s0  ;;  %p5428_p3 = scmp.lt.u32.totalorder %s5424_s0, %s5979_s20 }
 0x126   :  { %p5430_p4 = pnand %p5428_p3, %p5425_p2 }
 0x128   :  { %5433 = shalt.err (!%p5430_p4)
}
 0x129   :  { %s5434_s30 = scalar_lea.vmem %s230_s25, 16  ;;  %s5438_s1 = scalar_lea.vmem %s230_s25, 32 }
 0x12a   :  { %p5435_p5 = scmp.ne.s32.totalorder %s230_s25, %s5434_s30  ;;  %p5439_p6 = scmp.lt.s32.totalorder %s230_s25, %s230_s25 }
 0x12b   :  { %p5440_p7 = scmp.lt.s32.totalorder %s5438_s1, %s5434_s30 }
 0x12d   :  { %p5441_p8 = por %p5440_p7, %p5439_p6 }
 0x12f   :  { %p5442_p9 = pnand %p5441_p8, %p5435_p5 }
 0x131   :  { %5445 = shalt.err (!%p5442_p9)
}
 0x132   :  { %232 = dma.hbm_to_vmem [thread:$0]  %s5979_s20, 16, %s230_s25, [#allocation26]  }
 0x133   :  { %5446 = dma.done.wait [#allocation3], 131072  }
 0x134   :  { %5447 = vsyncadd [#allocation3], 4294836224 }
 0x135   :  { %5448 = dma.done.wait [#allocation5], 8256  }
 0x136   :  { %5449 = vsyncadd [#allocation5], 4294959040 }
 0x137   :  { %5450 = dma.done.wait [#allocation8], 2064  }
 0x138   :  { %5451 = vsyncadd [#allocation8], 4294965232 }
 0x139   :  { %5452 = dma.done.wait [#allocation11], 512  }
 0x13a   :  { %5453 = vsyncadd [#allocation11], 4294966784 }
 0x13b   :  { %5454 = dma.done.wait [#allocation14], 272  }
 0x13c   :  { %5455 = vsyncadd [#allocation14], 4294967024 }
 0x13d   :  { %5456 = dma.done.wait [#allocation17], 2064  }
 0x13e   :  { %5457 = vsyncadd [#allocation17], 4294965232 }
 0x13f   :  { %5458 = dma.done.wait [#allocation20], 2064  }
 0x140   :  { %5459 = vsyncadd [#allocation20], 4294965232 }
 0x141   :  { %5460 = dma.done.wait [#allocation23], 4128  }
 0x142   :  { %5461 = vsyncadd [#allocation23], 4294963168 }
 0x143   :  { %5462 = dma.done.wait [#allocation26], 4112  }
 0x144   :  { %5463 = vsyncadd [#allocation26], 4294963184  ;;  %v301_v0 = vld [vmem:[#allocation2 + $0x8] sm:$0xff]  ;;  %v303_v2 = vld [vmem:[#allocation2 + $0x18] sm:$0xff]  ;;  %s5992_s4 = sld [smem:[#allocation37_spill]]  ;;  %vm5488_vm4 = vmmov 0  }
 0x145   :  { %v305_v1 = vld [vmem:[#allocation2 + $0x28] sm:$0xff]  ;;  %v307_v4 = vld [vmem:[#allocation2 + $0x38] sm:$0xff]  ;;  %v300_v5 = vld [vmem:[#allocation2] sm:$0xff]  ;;  %s5993_s27 = sld [smem:[#allocation38_spill]]  ;;  %vm2727_vm5 = vcmask 130048   ;;  %s5994_s25 = sld [smem:[#allocation39_spill]] }
 0x146   :  { %v3777_v3 = vpack.c.bf16 %v305_v1, %v301_v0  ;;  %v304_v6 = vld [vmem:[#allocation2 + $0x20] sm:$0xff]  ;;  %v4289_v7 = vpack.c.bf16 %v307_v4, %v303_v2  ;;  %v302_v9 = vld [vmem:[#allocation2 + $0x10] sm:$0xff]  ;;  %v309_v11 = vld [vmem:[#allocation2 + $0x48] sm:$0xff]  ;;  %s5995_s7 = sld [smem:[#allocation40_spill]] }
 0x147   :  { %v3779_v8 = vpack.c.bf16 %v304_v6, %v300_v5  ;;  %v306_v10 = vld [vmem:[#allocation2 + $0x30] sm:$0xff]  ;;  %v313_v13 = vld [vmem:[#allocation2 + $0x68] sm:$0xff]  ;;  %v311_v14 = vld [vmem:[#allocation2 + $0x58] sm:$0xff] }
 0x148   :  { %3778 = vmatprep.subr.bf16.mxu0 %v3777_v3  ;;  %v4291_v12 = vpack.c.bf16 %v306_v10, %v302_v9  ;;  %v315_v15 = vld [vmem:[#allocation2 + $0x78] sm:$0xff]  ;;  %4290 = vmatprep.subr.bf16.mxu1 %v4289_v7  ;;  %v3781_v16 = vpack.c.bf16 %v313_v13, %v309_v11  ;;  %v308_v18 = vld [vmem:[#allocation2 + $0x40] sm:$0xff]  ;;  %v310_v20 = vld [vmem:[#allocation2 + $0x50] sm:$0xff] }
 0x149   :  { %3780 = vmatpush1.bf16.msra.mxu0 %v3779_v8  ;;  %v4293_v17 = vpack.c.bf16 %v315_v15, %v311_v14  ;;  %v312_v19 = vld [vmem:[#allocation2 + $0x60] sm:$0xff]  ;;  %v314_v22 = vld [vmem:[#allocation2 + $0x70] sm:$0xff]  ;;  %v317_v23 = vld [vmem:[#allocation2 + $0x88] sm:$0xff] }
 0x14a   :  { %4292 = vmatpush1.bf16.msra.mxu1 %v4291_v12  ;;  %v3783_v21 = vpack.c.bf16 %v312_v19, %v308_v18  ;;  %v321_v24 = vld [vmem:[#allocation2 + $0xa8] sm:$0xff]  ;;  %3782 = vmatprep.subr.bf16.mxu0 %v3781_v16  ;;  %v4295_v25 = vpack.c.bf16 %v314_v22, %v310_v20  ;;  %v319_v27 = vld [vmem:[#allocation2 + $0x98] sm:$0xff]  ;;  %v316_v29 = vld [vmem:[#allocation2 + $0x80] sm:$0xff] }
 0x14b   :  { %4294 = vmatprep.subr.bf16.mxu1 %v4293_v17  ;;  %v3785_v26 = vpack.c.bf16 %v321_v24, %v317_v23  ;;  %v323_v28 = vld [vmem:[#allocation2 + $0xb8] sm:$0xff]  ;;  %v320_v31 = vld [vmem:[#allocation2 + $0xa0] sm:$0xff]  ;;  %v318_v32 = vld [vmem:[#allocation2 + $0x90] sm:$0xff] }
 0x14c   :  { %v4297_v30 = vpack.c.bf16 %v323_v28, %v319_v27  ;;  %v322_v33 = vld [vmem:[#allocation2 + $0xb0] sm:$0xff]  ;;  %v3787_v34 = vpack.c.bf16 %v320_v31, %v316_v29  ;;  %v325_v35 = vld [vmem:[#allocation2 + $0xc8] sm:$0xff]  ;;  %v327_v37 = vld [vmem:[#allocation2 + $0xd8] sm:$0xff] }
 0x14d   :  { %3784 = vmatpush1.bf16.msra.mxu0 %v3783_v21  ;;  %v329_v36 = vld [vmem:[#allocation2 + $0xe8] sm:$0xff]  ;;  %v4299_v38 = vpack.c.bf16 %v322_v33, %v318_v32  ;;  %v331_v40 = vld [vmem:[#allocation2 + $0xf8] sm:$0xff]  ;;  %v324_v41 = vld [vmem:[#allocation2 + $0xc0] sm:$0xff] }
 0x14e   :  { %4296 = vmatpush1.bf16.msra.mxu1 %v4295_v25  ;;  %3786 = vmatprep.subr.bf16.mxu0 %v3785_v26  ;;  %v3789_v39 = vpack.c.bf16 %v329_v36, %v325_v35  ;;  %v328_v42 = vld [vmem:[#allocation2 + $0xe0] sm:$0xff]  ;;  %v4301_v43 = vpack.c.bf16 %v331_v40, %v327_v37  ;;  %v326_v44 = vld [vmem:[#allocation2 + $0xd0] sm:$0xff]  ;;  %v333_v46 = vld [vmem:[#allocation2 + $0x108] sm:$0xff] }
 0x14f   :  { %4298 = vmatprep.subr.bf16.mxu1 %v4297_v30  ;;  %v330_v45 = vld [vmem:[#allocation2 + $0xf0] sm:$0xff]  ;;  %v337_v47 = vld [vmem:[#allocation2 + $0x128] sm:$0xff]  ;;  %v335_v48 = vld [vmem:[#allocation2 + $0x118] sm:$0xff]  ;;  %v3791_v50 = vpack.c.bf16 %v328_v42, %v324_v41 }
 0x150   :  { %v339_v49 = vld [vmem:[#allocation2 + $0x138] sm:$0xff]  ;;  %v4303_v51 = vpack.c.bf16 %v330_v45, %v326_v44  ;;  %v3793_v52 = vpack.c.bf16 %v337_v47, %v333_v46  ;;  %v332_v53 = vld [vmem:[#allocation2 + $0x100] sm:$0xff]  ;;  %v334_v55 = vld [vmem:[#allocation2 + $0x110] sm:$0xff] }
 0x151   :  { %3788 = vmatpush1.bf16.msra.mxu0 %v3787_v34  ;;  %v336_v54 = vld [vmem:[#allocation2 + $0x120] sm:$0xff]  ;;  %v4305_v56 = vpack.c.bf16 %v339_v49, %v335_v48  ;;  %v338_v57 = vld [vmem:[#allocation2 + $0x130] sm:$0xff]  ;;  %v341_v58 = vld [vmem:[#allocation2 + $0x148] sm:$0xff] }
 0x152   :  { %4300 = vmatpush1.bf16.msra.mxu1 %v4299_v38  ;;  %3790 = vmatprep.subr.bf16.mxu0 %v3789_v39  ;;  %v345_v59 = vld [vmem:[#allocation2 + $0x168] sm:$0xff]  ;;  %v343_v60 = vld [vmem:[#allocation2 + $0x158] sm:$0xff]  ;;  %v3795_v62 = vpack.c.bf16 %v336_v54, %v332_v53  ;;  %v4307_v63 = vpack.c.bf16 %v338_v57, %v334_v55  ;;  %v340_v1 = vld [vmem:[#allocation2 + $0x140] sm:$0xff] }
 0x153   :  { %4302 = vmatprep.subr.bf16.mxu1 %v4301_v43  ;;  %v347_v61 = vld [vmem:[#allocation2 + $0x178] sm:$0xff]  ;;  %v3797_v0 = vpack.c.bf16 %v345_v59, %v341_v58  ;;  %v344_v2 = vld [vmem:[#allocation2 + $0x160] sm:$0xff]  ;;  %v342_v3 = vld [vmem:[#allocation2 + $0x150] sm:$0xff] }
 0x154   :  { %v4309_v4 = vpack.c.bf16 %v347_v61, %v343_v60  ;;  %v346_v5 = vld [vmem:[#allocation2 + $0x170] sm:$0xff]  ;;  %v349_v6 = vld [vmem:[#allocation2 + $0x188] sm:$0xff]  ;;  %v351_v8 = vld [vmem:[#allocation2 + $0x198] sm:$0xff]  ;;  %v3799_v10 = vpack.c.bf16 %v344_v2, %v340_v1 }
 0x155   :  { %3792 = vmatpush1.bf16.msra.mxu0 %v3791_v50  ;;  %v353_v7 = vld [vmem:[#allocation2 + $0x1a8] sm:$0xff]  ;;  %v355_v9 = vld [vmem:[#allocation2 + $0x1b8] sm:$0xff]  ;;  %v4311_v11 = vpack.c.bf16 %v346_v5, %v342_v3  ;;  %v348_v13 = vld [vmem:[#allocation2 + $0x180] sm:$0xff] }
 0x156   :  { %4304 = vmatpush1.bf16.msra.mxu1 %v4303_v51  ;;  %3794 = vmatprep.subr.bf16.mxu0 %v3793_v52  ;;  %v3801_v12 = vpack.c.bf16 %v353_v7, %v349_v6  ;;  %v352_v14 = vld [vmem:[#allocation2 + $0x1a0] sm:$0xff]  ;;  %v350_v15 = vld [vmem:[#allocation2 + $0x190] sm:$0xff]  ;;  %v4313_v16 = vpack.c.bf16 %v355_v9, %v351_v8  ;;  %v357_v18 = vld [vmem:[#allocation2 + $0x1c8] sm:$0xff] }
 0x157   :  { %4306 = vmatprep.subr.bf16.mxu1 %v4305_v56  ;;  %v354_v17 = vld [vmem:[#allocation2 + $0x1b0] sm:$0xff]  ;;  %v361_v19 = vld [vmem:[#allocation2 + $0x1e8] sm:$0xff]  ;;  %v359_v20 = vld [vmem:[#allocation2 + $0x1d8] sm:$0xff]  ;;  %v3803_v22 = vpack.c.bf16 %v352_v14, %v348_v13 }
 0x158   :  { %v363_v21 = vld [vmem:[#allocation2 + $0x1f8] sm:$0xff]  ;;  %v4315_v23 = vpack.c.bf16 %v354_v17, %v350_v15  ;;  %v3805_v24 = vpack.c.bf16 %v361_v19, %v357_v18  ;;  %v356_v25 = vld [vmem:[#allocation2 + $0x1c0] sm:$0xff]  ;;  %v358_v27 = vld [vmem:[#allocation2 + $0x1d0] sm:$0xff] }
 0x159   :  { %3796 = vmatpush1.bf16.msra.mxu0 %v3795_v62  ;;  %v360_v26 = vld [vmem:[#allocation2 + $0x1e0] sm:$0xff]  ;;  %v4317_v28 = vpack.c.bf16 %v363_v21, %v359_v20  ;;  %v362_v29 = vld [vmem:[#allocation2 + $0x1f0] sm:$0xff]  ;;  %v365_v30 = vld [vmem:[#allocation2 + $0x208] sm:$0xff] }
 0x15a   :  { %4308 = vmatpush1.bf16.msra.mxu1 %v4307_v63  ;;  %3798 = vmatprep.subr.bf16.mxu0 %v3797_v0  ;;  %v369_v31 = vld [vmem:[#allocation2 + $0x228] sm:$0xff]  ;;  %v367_v32 = vld [vmem:[#allocation2 + $0x218] sm:$0xff]  ;;  %v3807_v34 = vpack.c.bf16 %v360_v26, %v356_v25  ;;  %v4319_v35 = vpack.c.bf16 %v362_v29, %v358_v27  ;;  %v364_v37 = vld [vmem:[#allocation2 + $0x200] sm:$0xff] }
 0x15b   :  { %4310 = vmatprep.subr.bf16.mxu1 %v4309_v4  ;;  %v371_v33 = vld [vmem:[#allocation2 + $0x238] sm:$0xff]  ;;  %v3809_v36 = vpack.c.bf16 %v369_v31, %v365_v30  ;;  %v368_v38 = vld [vmem:[#allocation2 + $0x220] sm:$0xff]  ;;  %v366_v39 = vld [vmem:[#allocation2 + $0x210] sm:$0xff] }
 0x15c   :  { %v4321_v40 = vpack.c.bf16 %v371_v33, %v367_v32  ;;  %v370_v41 = vld [vmem:[#allocation2 + $0x230] sm:$0xff]  ;;  %v373_v42 = vld [vmem:[#allocation2 + $0x248] sm:$0xff]  ;;  %v375_v44 = vld [vmem:[#allocation2 + $0x258] sm:$0xff]  ;;  %v3811_v46 = vpack.c.bf16 %v368_v38, %v364_v37 }
 0x15d   :  { %3800 = vmatpush1.bf16.msra.mxu0 %v3799_v10  ;;  %v377_v43 = vld [vmem:[#allocation2 + $0x268] sm:$0xff]  ;;  %v379_v45 = vld [vmem:[#allocation2 + $0x278] sm:$0xff]  ;;  %v4323_v47 = vpack.c.bf16 %v370_v41, %v366_v39  ;;  %v372_v49 = vld [vmem:[#allocation2 + $0x240] sm:$0xff] }
 0x15e   :  { %4312 = vmatpush1.bf16.msra.mxu1 %v4311_v11  ;;  %3802 = vmatprep.subr.bf16.mxu0 %v3801_v12  ;;  %v3813_v48 = vpack.c.bf16 %v377_v43, %v373_v42  ;;  %v376_v50 = vld [vmem:[#allocation2 + $0x260] sm:$0xff]  ;;  %v374_v51 = vld [vmem:[#allocation2 + $0x250] sm:$0xff]  ;;  %v4325_v52 = vpack.c.bf16 %v379_v45, %v375_v44  ;;  %v381_v54 = vld [vmem:[#allocation2 + $0x288] sm:$0xff] }
 0x15f   :  { %4314 = vmatprep.subr.bf16.mxu1 %v4313_v16  ;;  %v378_v53 = vld [vmem:[#allocation2 + $0x270] sm:$0xff]  ;;  %v385_v55 = vld [vmem:[#allocation2 + $0x2a8] sm:$0xff]  ;;  %v383_v56 = vld [vmem:[#allocation2 + $0x298] sm:$0xff]  ;;  %v3815_v58 = vpack.c.bf16 %v376_v50, %v372_v49 }
 0x160   :  { %v387_v57 = vld [vmem:[#allocation2 + $0x2b8] sm:$0xff]  ;;  %v4327_v59 = vpack.c.bf16 %v378_v53, %v374_v51  ;;  %v3817_v60 = vpack.c.bf16 %v385_v55, %v381_v54  ;;  %v380_v61 = vld [vmem:[#allocation2 + $0x280] sm:$0xff]  ;;  %v382_v63 = vld [vmem:[#allocation2 + $0x290] sm:$0xff] }
 0x161   :  { %3804 = vmatpush1.bf16.msra.mxu0 %v3803_v22  ;;  %v384_v62 = vld [vmem:[#allocation2 + $0x2a0] sm:$0xff]  ;;  %v4329_v0 = vpack.c.bf16 %v387_v57, %v383_v56  ;;  %v386_v1 = vld [vmem:[#allocation2 + $0x2b0] sm:$0xff]  ;;  %v389_v2 = vld [vmem:[#allocation2 + $0x2c8] sm:$0xff] }
 0x162   :  { %4316 = vmatpush1.bf16.msra.mxu1 %v4315_v23  ;;  %3806 = vmatprep.subr.bf16.mxu0 %v3805_v24  ;;  %v393_v3 = vld [vmem:[#allocation2 + $0x2e8] sm:$0xff]  ;;  %v391_v4 = vld [vmem:[#allocation2 + $0x2d8] sm:$0xff]  ;;  %v3819_v6 = vpack.c.bf16 %v384_v62, %v380_v61  ;;  %v388_v7 = vld [vmem:[#allocation2 + $0x2c0] sm:$0xff]  ;;  %v4331_v8 = vpack.c.bf16 %v386_v1, %v382_v63 }
 0x163   :  { %4318 = vmatprep.subr.bf16.mxu1 %v4317_v28  ;;  %v395_v5 = vld [vmem:[#allocation2 + $0x2f8] sm:$0xff]  ;;  %v3821_v9 = vpack.c.bf16 %v393_v3, %v389_v2  ;;  %v392_v10 = vld [vmem:[#allocation2 + $0x2e0] sm:$0xff]  ;;  %v390_v11 = vld [vmem:[#allocation2 + $0x2d0] sm:$0xff] }
 0x164   :  { %v394_v12 = vld [vmem:[#allocation2 + $0x2f0] sm:$0xff]  ;;  %v4333_v13 = vpack.c.bf16 %v395_v5, %v391_v4  ;;  %v397_v14 = vld [vmem:[#allocation2 + $0x308] sm:$0xff]  ;;  %v399_v17 = vld [vmem:[#allocation2 + $0x318] sm:$0xff]  ;;  %v3823_v19 = vpack.c.bf16 %v392_v10, %v388_v7 }
 0x165   :  { %3808 = vmatpush1.bf16.msra.mxu0 %v3807_v34  ;;  %v401_v15 = vld [vmem:[#allocation2 + $0x328] sm:$0xff]  ;;  %v403_v18 = vld [vmem:[#allocation2 + $0x338] sm:$0xff]  ;;  %v4335_v20 = vpack.c.bf16 %v394_v12, %v390_v11  ;;  %v396_v22 = vld [vmem:[#allocation2 + $0x300] sm:$0xff] }
 0x166   :  { %4320 = vmatpush1.bf16.msra.mxu1 %v4319_v35  ;;  %3810 = vmatprep.subr.bf16.mxu0 %v3809_v36  ;;  %v285_v16 = vld [vmem:[%s5992_s4 + $0x8] sm:$0xff]  ;;  %v3825_v21 = vpack.c.bf16 %v401_v15, %v397_v14  ;;  %v400_v23 = vld [vmem:[#allocation2 + $0x320] sm:$0xff]  ;;  %v398_v24 = vld [vmem:[#allocation2 + $0x310] sm:$0xff]  ;;  %v4337_v25 = vpack.c.bf16 %v403_v18, %v399_v17 }
 0x167   :  { %4322 = vmatprep.subr.bf16.mxu1 %v4321_v40  ;;  %1410 = vmatprep.mubr.f32.mxu0 %v285_v16  ;;  %v402_v26 = vld [vmem:[#allocation2 + $0x330] sm:$0xff]  ;;  %v405_v27 = vld [vmem:[#allocation2 + $0x348] sm:$0xff]  ;;  %v407_v29 = vld [vmem:[#allocation2 + $0x358] sm:$0xff]  ;;  %v3827_v31 = vpack.c.bf16 %v400_v23, %v396_v22 }
 0x168   :  { %1978 = vmatprep.mubr.f32.mxu1 %v285_v16  ;;  %v409_v28 = vld [vmem:[#allocation2 + $0x368] sm:$0xff]  ;;  %v411_v30 = vld [vmem:[#allocation2 + $0x378] sm:$0xff]  ;;  %v4339_v32 = vpack.c.bf16 %v402_v26, %v398_v24  ;;  %v404_v34 = vld [vmem:[#allocation2 + $0x340] sm:$0xff] }
 0x169   :  { %3812 = vmatpush1.bf16.msra.mxu0 %v3811_v46  ;;  %v3829_v33 = vpack.c.bf16 %v409_v28, %v405_v27  ;;  %v408_v35 = vld [vmem:[#allocation2 + $0x360] sm:$0xff]  ;;  %v406_v36 = vld [vmem:[#allocation2 + $0x350] sm:$0xff]  ;;  %v4341_v37 = vpack.c.bf16 %v411_v30, %v407_v29  ;;  %v413_v39 = vld [vmem:[#allocation2 + $0x388] sm:$0xff] }
 0x16a   :  { %4324 = vmatpush1.bf16.msra.mxu1 %v4323_v47  ;;  %3814 = vmatprep.subr.bf16.mxu0 %v3813_v48  ;;  %v410_v38 = vld [vmem:[#allocation2 + $0x370] sm:$0xff]  ;;  %v417_v40 = vld [vmem:[#allocation2 + $0x3a8] sm:$0xff]  ;;  %v415_v41 = vld [vmem:[#allocation2 + $0x398] sm:$0xff]  ;;  %v3831_v43 = vpack.c.bf16 %v408_v35, %v404_v34 }
 0x16b   :  { %4326 = vmatprep.subr.bf16.mxu1 %v4325_v52  ;;  %v419_v42 = vld [vmem:[#allocation2 + $0x3b8] sm:$0xff]  ;;  %v4343_v44 = vpack.c.bf16 %v410_v38, %v406_v36  ;;  %v3833_v45 = vpack.c.bf16 %v417_v40, %v413_v39  ;;  %v412_v46 = vld [vmem:[#allocation2 + $0x380] sm:$0xff]  ;;  %v414_v48 = vld [vmem:[#allocation2 + $0x390] sm:$0xff] }
 0x16c   :  { %v416_v47 = vld [vmem:[#allocation2 + $0x3a0] sm:$0xff]  ;;  %v4345_v49 = vpack.c.bf16 %v419_v42, %v415_v41  ;;  %v418_v50 = vld [vmem:[#allocation2 + $0x3b0] sm:$0xff]  ;;  %v421_v51 = vld [vmem:[#allocation2 + $0x3c8] sm:$0xff] }
 0x16d   :  { %3816 = vmatpush1.bf16.msra.mxu0 %v3815_v58  ;;  %v425_v52 = vld [vmem:[#allocation2 + $0x3e8] sm:$0xff]  ;;  %v423_v53 = vld [vmem:[#allocation2 + $0x3d8] sm:$0xff]  ;;  %v3835_v55 = vpack.c.bf16 %v416_v47, %v412_v46  ;;  %v4347_v56 = vpack.c.bf16 %v418_v50, %v414_v48  ;;  %v420_v58 = vld [vmem:[#allocation2 + $0x3c0] sm:$0xff] }
 0x16e   :  { %4328 = vmatpush1.bf16.msra.mxu1 %v4327_v59  ;;  %3818 = vmatprep.subr.bf16.mxu0 %v3817_v60  ;;  %v427_v54 = vld [vmem:[#allocation2 + $0x3f8] sm:$0xff]  ;;  %v3837_v57 = vpack.c.bf16 %v425_v52, %v421_v51  ;;  %v424_v59 = vld [vmem:[#allocation2 + $0x3e0] sm:$0xff]  ;;  %v422_v60 = vld [vmem:[#allocation2 + $0x3d0] sm:$0xff] }
 0x16f   :  { %4330 = vmatprep.subr.bf16.mxu1 %v4329_v0  ;;  %v4349_v61 = vpack.c.bf16 %v427_v54, %v423_v53  ;;  %v426_v62 = vld [vmem:[#allocation2 + $0x3f0] sm:$0xff]  ;;  %v429_v63 = vld [vmem:[#allocation2 + $0x408] sm:$0xff]  ;;  %v431_v1 = vld [vmem:[#allocation2 + $0x418] sm:$0xff]  ;;  %v3839_v3 = vpack.c.bf16 %v424_v59, %v420_v58 }
 0x170   :  { %v433_v0 = vld [vmem:[#allocation2 + $0x428] sm:$0xff]  ;;  %v435_v2 = vld [vmem:[#allocation2 + $0x438] sm:$0xff]  ;;  %v4351_v4 = vpack.c.bf16 %v426_v62, %v422_v60  ;;  %v432_v7 = vld [vmem:[#allocation2 + $0x420] sm:$0xff] }
 0x171   :  { %3820 = vmatpush1.bf16.msra.mxu0 %v3819_v6  ;;  %v3841_v5 = vpack.c.bf16 %v433_v0, %v429_v63  ;;  %v428_v6 = vld [vmem:[#allocation2 + $0x400] sm:$0xff]  ;;  %v434_v10 = vld [vmem:[#allocation2 + $0x430] sm:$0xff]  ;;  %v437_v11 = vld [vmem:[#allocation2 + $0x448] sm:$0xff] }
 0x172   :  { %4332 = vmatpush1.bf16.msra.mxu1 %v4331_v8  ;;  %3822 = vmatprep.subr.bf16.mxu0 %v3821_v9  ;;  %v430_v8 = vld [vmem:[#allocation2 + $0x410] sm:$0xff]  ;;  %v4353_v9 = vpack.c.bf16 %v435_v2, %v431_v1  ;;  %v441_v12 = vld [vmem:[#allocation2 + $0x468] sm:$0xff]  ;;  %v443_v14 = vld [vmem:[#allocation2 + $0x478] sm:$0xff]  ;;  %v3843_v16 = vpack.c.bf16 %v432_v7, %v428_v6 }
 0x173   :  { %4334 = vmatprep.subr.bf16.mxu1 %v4333_v13  ;;  %v439_v13 = vld [vmem:[#allocation2 + $0x458] sm:$0xff]  ;;  %v284_v15 = vld [vmem:[%s5992_s4] sm:$0xff]  ;;  %v4355_v17 = vpack.c.bf16 %v434_v10, %v430_v8  ;;  %v3845_v18 = vpack.c.bf16 %v441_v12, %v437_v11  ;;  %v442_v23 = vld [vmem:[#allocation2 + $0x470] sm:$0xff] }
 0x174   :  { %v4357_v22 = vpack.c.bf16 %v443_v14, %v439_v13  ;;  %v445_v24 = vld [vmem:[#allocation2 + $0x488] sm:$0xff]  ;;  %v447_v26 = vld [vmem:[#allocation2 + $0x498] sm:$0xff]  ;;  %v450_v35 = vld [vmem:[#allocation2 + $0x4b0] sm:$0xff] }
 0x175   :  { %3824 = vmatpush1.bf16.msra.mxu0 %v3823_v19  ;;  %v436_v19 = vld [vmem:[#allocation2 + $0x440] sm:$0xff]  ;;  %v451_v27 = vld [vmem:[#allocation2 + $0x4b8] sm:$0xff]  ;;  %v453_v36 = vld [vmem:[#allocation2 + $0x4c8] sm:$0xff] }
 0x176   :  { %4336 = vmatpush1.bf16.msra.mxu1 %v4335_v20  ;;  %3826 = vmatprep.subr.bf16.mxu0 %v3825_v21  ;;  %v440_v20 = vld [vmem:[#allocation2 + $0x460] sm:$0xff]  ;;  %v438_v21 = vld [vmem:[#allocation2 + $0x450] sm:$0xff]  ;;  %v4361_v34 = vpack.c.bf16 %v451_v27, %v447_v26  ;;  %v455_v38 = vld [vmem:[#allocation2 + $0x4d8] sm:$0xff] }
 0x177   :  { %4338 = vmatprep.subr.bf16.mxu1 %v4337_v25  ;;  %v449_v25 = vld [vmem:[#allocation2 + $0x4a8] sm:$0xff]  ;;  %v3847_v28 = vpack.c.bf16 %v440_v20, %v436_v19  ;;  %v4359_v29 = vpack.c.bf16 %v442_v23, %v438_v21  ;;  %v459_v39 = vld [vmem:[#allocation2 + $0x4f8] sm:$0xff]  ;;  %v458_v47 = vld [vmem:[#allocation2 + $0x4f0] sm:$0xff] }
 0x178   :  { %v3849_v30 = vpack.c.bf16 %v449_v25, %v445_v24  ;;  %v4365_v46 = vpack.c.bf16 %v459_v39, %v455_v38  ;;  %v461_v48 = vld [vmem:[#allocation2 + $0x508] sm:$0xff]  ;;  %v463_v50 = vld [vmem:[#allocation2 + $0x518] sm:$0xff]  ;;  %v466_v59 = vld [vmem:[#allocation2 + $0x530] sm:$0xff] }
 0x179   :  { %3828 = vmatpush1.bf16.msra.mxu0 %v3827_v31  ;;  %v444_v31 = vld [vmem:[#allocation2 + $0x480] sm:$0xff]  ;;  %v467_v51 = vld [vmem:[#allocation2 + $0x538] sm:$0xff]  ;;  %v469_v60 = vld [vmem:[#allocation2 + $0x548] sm:$0xff] }
 0x17a   :  { %4340 = vmatpush1.bf16.msra.mxu1 %v4339_v32  ;;  %3830 = vmatprep.subr.bf16.mxu0 %v3829_v33  ;;  %v448_v32 = vld [vmem:[#allocation2 + $0x4a0] sm:$0xff]  ;;  %v446_v33 = vld [vmem:[#allocation2 + $0x490] sm:$0xff]  ;;  %v4369_v58 = vpack.c.bf16 %v467_v51, %v463_v50  ;;  %v471_v62 = vld [vmem:[#allocation2 + $0x558] sm:$0xff] }
 0x17b   :  { %4342 = vmatprep.subr.bf16.mxu1 %v4341_v37  ;;  %v457_v37 = vld [vmem:[#allocation2 + $0x4e8] sm:$0xff]  ;;  %v3851_v40 = vpack.c.bf16 %v448_v32, %v444_v31  ;;  %v4363_v41 = vpack.c.bf16 %v450_v35, %v446_v33  ;;  %v475_v63 = vld [vmem:[#allocation2 + $0x578] sm:$0xff]  ;;  %v474_v7 = vld [vmem:[#allocation2 + $0x570] sm:$0xff] }
 0x17c   :  { %v3853_v42 = vpack.c.bf16 %v457_v37, %v453_v36  ;;  %v4373_v6 = vpack.c.bf16 %v475_v63, %v471_v62  ;;  %v477_v8 = vld [vmem:[#allocation2 + $0x588] sm:$0xff]  ;;  %v479_v10 = vld [vmem:[#allocation2 + $0x598] sm:$0xff]  ;;  %v476_v13 = vld [vmem:[#allocation2 + $0x580] sm:$0xff] }
 0x17d   :  { %3832 = vmatpush1.bf16.msra.mxu0 %v3831_v43  ;;  %v452_v43 = vld [vmem:[#allocation2 + $0x4c0] sm:$0xff]  ;;  %v483_v11 = vld [vmem:[#allocation2 + $0x5b8] sm:$0xff]  ;;  %v485_v20 = vld [vmem:[#allocation2 + $0x5c8] sm:$0xff] }
 0x17e   :  { %4344 = vmatpush1.bf16.msra.mxu1 %v4343_v44  ;;  %3834 = vmatprep.subr.bf16.mxu0 %v3833_v45  ;;  %v456_v44 = vld [vmem:[#allocation2 + $0x4e0] sm:$0xff]  ;;  %v454_v45 = vld [vmem:[#allocation2 + $0x4d0] sm:$0xff]  ;;  %v4377_v19 = vpack.c.bf16 %v483_v11, %v479_v10  ;;  %v489_v21 = vld [vmem:[#allocation2 + $0x5e8] sm:$0xff] }
 0x17f   :  { %4346 = vmatprep.subr.bf16.mxu1 %v4345_v49  ;;  %v465_v49 = vld [vmem:[#allocation2 + $0x528] sm:$0xff]  ;;  %v3855_v52 = vpack.c.bf16 %v456_v44, %v452_v43  ;;  %v4367_v53 = vpack.c.bf16 %v458_v47, %v454_v45  ;;  %v487_v23 = vld [vmem:[#allocation2 + $0x5d8] sm:$0xff]  ;;  %v3869_v27 = vpack.c.bf16 %v489_v21, %v485_v20  ;;  %v490_v32 = vld [vmem:[#allocation2 + $0x5f0] sm:$0xff] }
 0x180   :  { %v3857_v54 = vpack.c.bf16 %v465_v49, %v461_v48  ;;  %v491_v24 = vld [vmem:[#allocation2 + $0x5f8] sm:$0xff]  ;;  %v493_v33 = vld [vmem:[#allocation2 + $0x608] sm:$0xff]  ;;  %v498_v44 = vld [vmem:[#allocation2 + $0x630] sm:$0xff] }
 0x181   :  { %3836 = vmatpush1.bf16.msra.mxu0 %v3835_v55  ;;  %v460_v55 = vld [vmem:[#allocation2 + $0x500] sm:$0xff]  ;;  %v4381_v31 = vpack.c.bf16 %v491_v24, %v487_v23  ;;  %v495_v35 = vld [vmem:[#allocation2 + $0x618] sm:$0xff]  ;;  %v501_v45 = vld [vmem:[#allocation2 + $0x648] sm:$0xff] }
 0x182   :  { %4348 = vmatpush1.bf16.msra.mxu1 %v4347_v56  ;;  %3838 = vmatprep.subr.bf16.mxu0 %v3837_v57  ;;  %v464_v56 = vld [vmem:[#allocation2 + $0x520] sm:$0xff]  ;;  %v462_v57 = vld [vmem:[#allocation2 + $0x510] sm:$0xff]  ;;  %v499_v36 = vld [vmem:[#allocation2 + $0x638] sm:$0xff] }
 0x183   :  { %4350 = vmatprep.subr.bf16.mxu1 %v4349_v61  ;;  %v473_v61 = vld [vmem:[#allocation2 + $0x568] sm:$0xff]  ;;  %v3859_v0 = vpack.c.bf16 %v464_v56, %v460_v55  ;;  %v4371_v1 = vpack.c.bf16 %v466_v59, %v462_v57  ;;  %v4385_v43 = vpack.c.bf16 %v499_v36, %v495_v35  ;;  %v503_v47 = vld [vmem:[#allocation2 + $0x658] sm:$0xff]  ;;  %v506_v56 = vld [vmem:[#allocation2 + $0x670] sm:$0xff] }
 0x184   :  { %v3861_v2 = vpack.c.bf16 %v473_v61, %v469_v60  ;;  %v507_v48 = vld [vmem:[#allocation2 + $0x678] sm:$0xff]  ;;  %v509_v57 = vld [vmem:[#allocation2 + $0x688] sm:$0xff]  ;;  %v524_v24 = vld [vmem:[#allocation2 + $0x700] sm:$0xff] }
 0x185   :  { %3840 = vmatpush1.bf16.msra.mxu0 %v3839_v3  ;;  %v468_v3 = vld [vmem:[#allocation2 + $0x540] sm:$0xff]  ;;  %v4389_v55 = vpack.c.bf16 %v507_v48, %v503_v47  ;;  %v511_v59 = vld [vmem:[#allocation2 + $0x698] sm:$0xff] }
 0x186   :  { %4352 = vmatpush1.bf16.msra.mxu1 %v4351_v4  ;;  %3842 = vmatprep.subr.bf16.mxu0 %v3841_v5  ;;  %v472_v4 = vld [vmem:[#allocation2 + $0x560] sm:$0xff]  ;;  %v470_v5 = vld [vmem:[#allocation2 + $0x550] sm:$0xff]  ;;  %v515_v60 = vld [vmem:[#allocation2 + $0x6b8] sm:$0xff] }
 0x187   :  { %4354 = vmatprep.subr.bf16.mxu1 %v4353_v9  ;;  %v481_v9 = vld [vmem:[#allocation2 + $0x5a8] sm:$0xff]  ;;  %v3863_v12 = vpack.c.bf16 %v472_v4, %v468_v3  ;;  %v4375_v14 = vpack.c.bf16 %v474_v7, %v470_v5  ;;  %v4393_v3 = vpack.c.bf16 %v515_v60, %v511_v59  ;;  %v514_v4 = vld [vmem:[#allocation2 + $0x6b0] sm:$0xff]  ;;  %v519_v7 = vld [vmem:[#allocation2 + $0x6d8] sm:$0xff] }
 0x188   :  { %1411 = vmatmul.mubr.f32.vlgmr.msra.gmra.mrb[0].mxu0 %v284_v15  ;;  %v517_v5 = vld [vmem:[#allocation2 + $0x6c8] sm:$0xff]  ;;  %v531_v20 = vld [vmem:[#allocation2 + $0x738] sm:$0xff]  ;;  %v532_v36 = vld [vmem:[#allocation2 + $0x740] sm:$0xff] }
 0x189   :  { %3844 = vmatpush1.bf16.msra.mxu0 %v3843_v16  ;;  %1979 = vmatmul.mubr.f32.vlgmr.msra.gmra.mrb[0].mxu1 %v284_v15  ;;  %v3865_v15 = vpack.c.bf16 %v481_v9, %v477_v8  ;;  %v480_v16 = vld [vmem:[#allocation2 + $0x5a0] sm:$0xff]  ;;  %v523_v8 = vld [vmem:[#allocation2 + $0x6f8] sm:$0xff] }
 0x18a   :  { %4356 = vmatpush1.bf16.msra.mxu1 %v4355_v17  ;;  %3846 = vmatprep.subr.bf16.mxu0 %v3845_v18  ;;  %v478_v17 = vld [vmem:[#allocation2 + $0x590] sm:$0xff]  ;;  %v3867_v25 = vpack.c.bf16 %v480_v16, %v476_v13  ;;  %v520_v13 = vld [vmem:[#allocation2 + $0x6e0] sm:$0xff] }
 0x18b   :  { %4358 = vmatprep.subr.bf16.mxu1 %v4357_v22  ;;  %v482_v18 = vld [vmem:[#allocation2 + $0x5b0] sm:$0xff]  ;;  %v287_v22 = vld [vmem:[%s5992_s4 + $0x18] sm:$0xff]  ;;  %v540_v48 = vld [vmem:[#allocation2 + $0x780] sm:$0xff] }
 0x18c   :  { %1481 = vmatprep.mubr.f32.mxu0 %v287_v22  ;;  %2049 = vmatprep.mubr.f32.mxu1 %v287_v22  ;;  %v4379_v26 = vpack.c.bf16 %v482_v18, %v478_v17  ;;  %v522_v16 = vld [vmem:[#allocation2 + $0x6f0] sm:$0xff]  ;;  %v525_v17 = vld [vmem:[#allocation2 + $0x708] sm:$0xff]  ;;  %v548_v60 = vld [vmem:[#allocation2 + $0x7c0] sm:$0xff] }
 0x18d   :  { %3848 = vmatpush1.bf16.msra.mxu0 %v3847_v28  ;;  %v484_v28 = vld [vmem:[#allocation2 + $0x5c0] sm:$0xff]  ;;  %v529_v18 = vld [vmem:[#allocation2 + $0x728] sm:$0xff] }
 0x18e   :  { %4360 = vmatpush1.bf16.msra.mxu1 %v4359_v29  ;;  %3850 = vmatprep.subr.bf16.mxu0 %v3849_v30  ;;  %v488_v29 = vld [vmem:[#allocation2 + $0x5e0] sm:$0xff]  ;;  %v486_v30 = vld [vmem:[#allocation2 + $0x5d0] sm:$0xff]  ;;  %v3889_v23 = vpack.c.bf16 %v529_v18, %v525_v17 }
 0x18f   :  { %4362 = vmatprep.subr.bf16.mxu1 %v4361_v34  ;;  %v497_v34 = vld [vmem:[#allocation2 + $0x628] sm:$0xff]  ;;  %v3871_v37 = vpack.c.bf16 %v488_v29, %v484_v28  ;;  %v4383_v38 = vpack.c.bf16 %v490_v32, %v486_v30  ;;  %v530_v28 = vld [vmem:[#allocation2 + $0x730] sm:$0xff]  ;;  %v539_v32 = vld [vmem:[#allocation2 + $0x778] sm:$0xff] }
 0x190   :  { %v3873_v39 = vpack.c.bf16 %v497_v34, %v493_v33  ;;  %v533_v29 = vld [vmem:[#allocation2 + $0x748] sm:$0xff]  ;;  %v286_v17 = vld [vmem:[%s5992_s4 + $0x10] sm:$0xff] }
 0x191   :  { %3852 = vmatpush1.bf16.msra.mxu0 %v3851_v40  ;;  %v492_v40 = vld [vmem:[#allocation2 + $0x600] sm:$0xff]  ;;  %v537_v30 = vld [vmem:[#allocation2 + $0x768] sm:$0xff] }
 0x192   :  { %4364 = vmatpush1.bf16.msra.mxu1 %v4363_v41  ;;  %3854 = vmatprep.subr.bf16.mxu0 %v3853_v42  ;;  %v496_v41 = vld [vmem:[#allocation2 + $0x620] sm:$0xff]  ;;  %v494_v42 = vld [vmem:[#allocation2 + $0x610] sm:$0xff]  ;;  %v3893_v35 = vpack.c.bf16 %v537_v30, %v533_v29  ;;  %v579_v29 = vld [vmem:[#allocation2 + $0x8b8] sm:$0xff] }
 0x193   :  { %4366 = vmatprep.subr.bf16.mxu1 %v4365_v46  ;;  %v505_v46 = vld [vmem:[#allocation2 + $0x668] sm:$0xff]  ;;  %v3875_v49 = vpack.c.bf16 %v496_v41, %v492_v40  ;;  %v4387_v50 = vpack.c.bf16 %v498_v44, %v494_v42  ;;  %v538_v40 = vld [vmem:[#allocation2 + $0x770] sm:$0xff]  ;;  %v547_v44 = vld [vmem:[#allocation2 + $0x7b8] sm:$0xff] }
 0x194   :  { %v3877_v51 = vpack.c.bf16 %v505_v46, %v501_v45  ;;  %v541_v41 = vld [vmem:[#allocation2 + $0x788] sm:$0xff] }
 0x195   :  { %3856 = vmatpush1.bf16.msra.mxu0 %v3855_v52  ;;  %v500_v52 = vld [vmem:[#allocation2 + $0x640] sm:$0xff]  ;;  %v545_v42 = vld [vmem:[#allocation2 + $0x7a8] sm:$0xff] }
 0x196   :  { %4368 = vmatpush1.bf16.msra.mxu1 %v4367_v53  ;;  %3858 = vmatprep.subr.bf16.mxu0 %v3857_v54  ;;  %v504_v53 = vld [vmem:[#allocation2 + $0x660] sm:$0xff]  ;;  %v502_v54 = vld [vmem:[#allocation2 + $0x650] sm:$0xff]  ;;  %v3897_v47 = vpack.c.bf16 %v545_v42, %v541_v41  ;;  %v289_v30 = vld [vmem:[%s5992_s4 + $0x28] sm:$0xff] }
 0x197   :  { %4370 = vmatprep.subr.bf16.mxu1 %v4369_v58  ;;  %v513_v58 = vld [vmem:[#allocation2 + $0x6a8] sm:$0xff]  ;;  %v3879_v61 = vpack.c.bf16 %v504_v53, %v500_v52  ;;  %v4391_v62 = vpack.c.bf16 %v506_v56, %v502_v54  ;;  %v546_v52 = vld [vmem:[#allocation2 + $0x7b0] sm:$0xff]  ;;  %v555_v56 = vld [vmem:[#allocation2 + $0x7f8] sm:$0xff] }
 0x198   :  { %v3881_v63 = vpack.c.bf16 %v513_v58, %v509_v57  ;;  %v549_v53 = vld [vmem:[#allocation2 + $0x7c8] sm:$0xff]  ;;  %v583_v41 = vld [vmem:[#allocation2 + $0x8d8] sm:$0xff] }
 0x199   :  { %3860 = vmatpush1.bf16.msra.mxu0 %v3859_v0  ;;  %v508_v0 = vld [vmem:[#allocation2 + $0x680] sm:$0xff]  ;;  %v553_v54 = vld [vmem:[#allocation2 + $0x7e8] sm:$0xff]  ;;  %v587_v42 = vld [vmem:[#allocation2 + $0x8f8] sm:$0xff] }
 0x19a   :  { %4372 = vmatpush1.bf16.msra.mxu1 %v4371_v1  ;;  %3862 = vmatprep.subr.bf16.mxu0 %v3861_v2  ;;  %v512_v1 = vld [vmem:[#allocation2 + $0x6a0] sm:$0xff]  ;;  %v510_v2 = vld [vmem:[#allocation2 + $0x690] sm:$0xff]  ;;  %v3901_v59 = vpack.c.bf16 %v553_v54, %v549_v53  ;;  %v591_v53 = vld [vmem:[#allocation2 + $0x918] sm:$0xff] }
 0x19b   :  { %4374 = vmatprep.subr.bf16.mxu1 %v4373_v6  ;;  %v521_v6 = vld [vmem:[#allocation2 + $0x6e8] sm:$0xff]  ;;  %v3883_v9 = vpack.c.bf16 %v512_v1, %v508_v0  ;;  %v4395_v10 = vpack.c.bf16 %v514_v4, %v510_v2  ;;  %v554_v0 = vld [vmem:[#allocation2 + $0x7f0] sm:$0xff]  ;;  %v563_v4 = vld [vmem:[#allocation2 + $0x838] sm:$0xff] }
 0x19c   :  { %v3885_v11 = vpack.c.bf16 %v521_v6, %v517_v5  ;;  %v557_v1 = vld [vmem:[#allocation2 + $0x808] sm:$0xff]  ;;  %v595_v54 = vld [vmem:[#allocation2 + $0x938] sm:$0xff] }
 0x19d   :  { %3864 = vmatpush1.bf16.msra.mxu0 %v3863_v12  ;;  %v516_v12 = vld [vmem:[#allocation2 + $0x6c0] sm:$0xff]  ;;  %v561_v2 = vld [vmem:[#allocation2 + $0x828] sm:$0xff] }
 0x19e   :  { %4376 = vmatpush1.bf16.msra.mxu1 %v4375_v14  ;;  %3866 = vmatprep.subr.bf16.mxu0 %v3865_v15  ;;  %v518_v14 = vld [vmem:[#allocation2 + $0x6d0] sm:$0xff]  ;;  %v4397_v15 = vpack.c.bf16 %v523_v8, %v519_v7  ;;  %v3887_v21 = vpack.c.bf16 %v520_v13, %v516_v12  ;;  %v3905_v7 = vpack.c.bf16 %v561_v2, %v557_v1  ;;  %v556_v8 = vld [vmem:[#allocation2 + $0x800] sm:$0xff]  ;;  %v565_v13 = vld [vmem:[#allocation2 + $0x848] sm:$0xff] }
 0x19f   :  { %4378 = vmatprep.subr.bf16.mxu1 %v4377_v19  ;;  %v527_v19 = vld [vmem:[#allocation2 + $0x718] sm:$0xff]  ;;  %v4399_v22 = vpack.c.bf16 %v522_v16, %v518_v14  ;;  %v562_v12 = vld [vmem:[#allocation2 + $0x830] sm:$0xff]  ;;  %v569_v14 = vld [vmem:[#allocation2 + $0x868] sm:$0xff] }
 0x1a0   :  { %v571_v16 = vld [vmem:[#allocation2 + $0x878] sm:$0xff] }
 0x1a1   :  { %3868 = vmatpush1.bf16.msra.mxu0 %v3867_v25  ;;  %v528_v25 = vld [vmem:[#allocation2 + $0x720] sm:$0xff]  ;;  %v599_v1 = vld [vmem:[#allocation2 + $0x958] sm:$0xff] }
 0x1a2   :  { %4380 = vmatpush1.bf16.msra.mxu1 %v4379_v26  ;;  %3870 = vmatprep.subr.bf16.mxu0 %v3869_v27  ;;  %v526_v26 = vld [vmem:[#allocation2 + $0x710] sm:$0xff]  ;;  %v4401_v27 = vpack.c.bf16 %v531_v20, %v527_v19  ;;  %v3891_v33 = vpack.c.bf16 %v528_v25, %v524_v24  ;;  %v3909_v20 = vpack.c.bf16 %v569_v14, %v565_v13  ;;  %v603_v2 = vld [vmem:[#allocation2 + $0x978] sm:$0xff] }
 0x1a3   :  { %4382 = vmatprep.subr.bf16.mxu1 %v4381_v31  ;;  %v535_v31 = vld [vmem:[#allocation2 + $0x758] sm:$0xff]  ;;  %v4403_v34 = vpack.c.bf16 %v530_v28, %v526_v26  ;;  %v570_v25 = vld [vmem:[#allocation2 + $0x870] sm:$0xff]  ;;  %v573_v26 = vld [vmem:[#allocation2 + $0x888] sm:$0xff] }
 0x1a4   :  { %v575_v28 = vld [vmem:[#allocation2 + $0x898] sm:$0xff] }
 0x1a5   :  { %3872 = vmatpush1.bf16.msra.mxu0 %v3871_v37  ;;  %v536_v37 = vld [vmem:[#allocation2 + $0x760] sm:$0xff]  ;;  %v607_v13 = vld [vmem:[#allocation2 + $0x998] sm:$0xff] }
 0x1a6   :  { %4384 = vmatpush1.bf16.msra.mxu1 %v4383_v38  ;;  %3874 = vmatprep.subr.bf16.mxu0 %v3873_v39  ;;  %v534_v38 = vld [vmem:[#allocation2 + $0x750] sm:$0xff]  ;;  %v4405_v39 = vpack.c.bf16 %v539_v32, %v535_v31  ;;  %v3895_v45 = vpack.c.bf16 %v536_v37, %v532_v36  ;;  %v4425_v37 = vpack.c.bf16 %v579_v29, %v575_v28  ;;  %v611_v14 = vld [vmem:[#allocation2 + $0x9b8] sm:$0xff] }
 0x1a7   :  { %4386 = vmatprep.subr.bf16.mxu1 %v4385_v43  ;;  %v543_v43 = vld [vmem:[#allocation2 + $0x798] sm:$0xff]  ;;  %v4407_v46 = vpack.c.bf16 %v538_v40, %v534_v38  ;;  %v574_v36 = vld [vmem:[#allocation2 + $0x890] sm:$0xff]  ;;  %v585_v40 = vld [vmem:[#allocation2 + $0x8e8] sm:$0xff] }
 0x1a8   :  { %v578_v38 = vld [vmem:[#allocation2 + $0x8b0] sm:$0xff] }
 0x1a9   :  { %3876 = vmatpush1.bf16.msra.mxu0 %v3875_v49  ;;  %v544_v49 = vld [vmem:[#allocation2 + $0x7a0] sm:$0xff] }
 0x1aa   :  { %4388 = vmatpush1.bf16.msra.mxu1 %v4387_v50  ;;  %3878 = vmatprep.subr.bf16.mxu0 %v3877_v51  ;;  %v542_v50 = vld [vmem:[#allocation2 + $0x790] sm:$0xff]  ;;  %v4409_v51 = vpack.c.bf16 %v547_v44, %v543_v43  ;;  %v3899_v57 = vpack.c.bf16 %v544_v49, %v540_v48  ;;  %v4427_v44 = vpack.c.bf16 %v578_v38, %v574_v36  ;;  %v625_v36 = vld [vmem:[#allocation2 + $0xa28] sm:$0xff]  ;;  %v627_v38 = vld [vmem:[#allocation2 + $0xa38] sm:$0xff] }
 0x1ab   :  { %4390 = vmatprep.subr.bf16.mxu1 %v4389_v55  ;;  %v551_v55 = vld [vmem:[#allocation2 + $0x7d8] sm:$0xff]  ;;  %v4411_v58 = vpack.c.bf16 %v546_v52, %v542_v50  ;;  %v582_v48 = vld [vmem:[#allocation2 + $0x8d0] sm:$0xff]  ;;  %v4429_v49 = vpack.c.bf16 %v587_v42, %v583_v41  ;;  %v593_v52 = vld [vmem:[#allocation2 + $0x928] sm:$0xff] }
 0x1ac   :  { %v586_v50 = vld [vmem:[#allocation2 + $0x8f0] sm:$0xff]  ;;  %v620_v42 = vld [vmem:[#allocation2 + $0xa00] sm:$0xff] }
 0x1ad   :  { %3880 = vmatpush1.bf16.msra.mxu0 %v3879_v61  ;;  %v552_v61 = vld [vmem:[#allocation2 + $0x7e0] sm:$0xff] }
 0x1ae   :  { %4392 = vmatpush1.bf16.msra.mxu1 %v4391_v62  ;;  %3882 = vmatprep.subr.bf16.mxu0 %v3881_v63  ;;  %v550_v62 = vld [vmem:[#allocation2 + $0x7d0] sm:$0xff]  ;;  %v4413_v63 = vpack.c.bf16 %v555_v56, %v551_v55  ;;  %v3903_v5 = vpack.c.bf16 %v552_v61, %v548_v60  ;;  %v4431_v56 = vpack.c.bf16 %v586_v50, %v582_v48  ;;  %v633_v48 = vld [vmem:[#allocation2 + $0xa68] sm:$0xff]  ;;  %v635_v50 = vld [vmem:[#allocation2 + $0xa78] sm:$0xff] }
 0x1af   :  { %4394 = vmatprep.subr.bf16.mxu1 %v4393_v3  ;;  %v559_v3 = vld [vmem:[#allocation2 + $0x818] sm:$0xff]  ;;  %v4415_v6 = vpack.c.bf16 %v554_v0, %v550_v62  ;;  %v590_v60 = vld [vmem:[#allocation2 + $0x910] sm:$0xff]  ;;  %v4433_v61 = vpack.c.bf16 %v595_v54, %v591_v53  ;;  %v601_v0 = vld [vmem:[#allocation2 + $0x968] sm:$0xff] }
 0x1b0   :  { %v594_v62 = vld [vmem:[#allocation2 + $0x930] sm:$0xff]  ;;  %v628_v54 = vld [vmem:[#allocation2 + $0xa40] sm:$0xff] }
 0x1b1   :  { %3884 = vmatpush1.bf16.msra.mxu0 %v3883_v9  ;;  %v560_v9 = vld [vmem:[#allocation2 + $0x820] sm:$0xff] }
 0x1b2   :  { %4396 = vmatpush1.bf16.msra.mxu1 %v4395_v10  ;;  %3886 = vmatprep.subr.bf16.mxu0 %v3885_v11  ;;  %v558_v10 = vld [vmem:[#allocation2 + $0x810] sm:$0xff]  ;;  %v4417_v11 = vpack.c.bf16 %v563_v4, %v559_v3  ;;  %v3907_v18 = vpack.c.bf16 %v560_v9, %v556_v8  ;;  %v4435_v4 = vpack.c.bf16 %v594_v62, %v590_v60  ;;  %v641_v60 = vld [vmem:[#allocation2 + $0xaa8] sm:$0xff]  ;;  %v643_v62 = vld [vmem:[#allocation2 + $0xab8] sm:$0xff] }
 0x1b3   :  { %4398 = vmatprep.subr.bf16.mxu1 %v4397_v15  ;;  %v567_v15 = vld [vmem:[#allocation2 + $0x858] sm:$0xff]  ;;  %v4419_v19 = vpack.c.bf16 %v562_v12, %v558_v10  ;;  %v598_v8 = vld [vmem:[#allocation2 + $0x950] sm:$0xff]  ;;  %v4437_v9 = vpack.c.bf16 %v603_v2, %v599_v1  ;;  %v609_v12 = vld [vmem:[#allocation2 + $0x9a8] sm:$0xff] }
 0x1b4   :  { %v4421_v24 = vpack.c.bf16 %v571_v16, %v567_v15  ;;  %v602_v10 = vld [vmem:[#allocation2 + $0x970] sm:$0xff]  ;;  %v636_v2 = vld [vmem:[#allocation2 + $0xa80] sm:$0xff] }
 0x1b5   :  { %3888 = vmatpush1.bf16.msra.mxu0 %v3887_v21  ;;  %v564_v21 = vld [vmem:[#allocation2 + $0x840] sm:$0xff]  ;;  %v4439_v16 = vpack.c.bf16 %v602_v10, %v598_v8  ;;  %v649_v8 = vld [vmem:[#allocation2 + $0xae8] sm:$0xff]  ;;  %v651_v10 = vld [vmem:[#allocation2 + $0xaf8] sm:$0xff] }
 0x1b6   :  { %4400 = vmatpush1.bf16.msra.mxu1 %v4399_v22  ;;  %3890 = vmatprep.subr.bf16.mxu0 %v3889_v23  ;;  %v568_v22 = vld [vmem:[#allocation2 + $0x860] sm:$0xff]  ;;  %v566_v23 = vld [vmem:[#allocation2 + $0x850] sm:$0xff] }
 0x1b7   :  { %4402 = vmatprep.subr.bf16.mxu1 %v4401_v27  ;;  %v577_v27 = vld [vmem:[#allocation2 + $0x8a8] sm:$0xff]  ;;  %v3911_v31 = vpack.c.bf16 %v568_v22, %v564_v21  ;;  %v4423_v32 = vpack.c.bf16 %v570_v25, %v566_v23  ;;  %v4441_v21 = vpack.c.bf16 %v611_v14, %v607_v13  ;;  %v610_v22 = vld [vmem:[#allocation2 + $0x9b0] sm:$0xff]  ;;  %v615_v25 = vld [vmem:[#allocation2 + $0x9d8] sm:$0xff] }
 0x1b8   :  { %v613_v23 = vld [vmem:[#allocation2 + $0x9c8] sm:$0xff]  ;;  %v644_v14 = vld [vmem:[#allocation2 + $0xac0] sm:$0xff] }
 0x1b9   :  { %3892 = vmatpush1.bf16.msra.mxu0 %v3891_v33  ;;  %v3913_v33 = vpack.c.bf16 %v577_v27, %v573_v26  ;;  %v619_v26 = vld [vmem:[#allocation2 + $0x9f8] sm:$0xff] }
 0x1ba   :  { %4404 = vmatpush1.bf16.msra.mxu1 %v4403_v34  ;;  %3894 = vmatprep.subr.bf16.mxu0 %v3893_v35  ;;  %v572_v34 = vld [vmem:[#allocation2 + $0x880] sm:$0xff] }
 0x1bb   :  { %4406 = vmatprep.subr.bf16.mxu1 %v4405_v39  ;;  %v576_v35 = vld [vmem:[#allocation2 + $0x8a0] sm:$0xff]  ;;  %v581_v39 = vld [vmem:[#allocation2 + $0x8c8] sm:$0xff] }
 0x1bc   :  { %v3915_v43 = vpack.c.bf16 %v576_v35, %v572_v34  ;;  %v618_v34 = vld [vmem:[#allocation2 + $0x9f0] sm:$0xff]  ;;  %v621_v35 = vld [vmem:[#allocation2 + $0xa08] sm:$0xff] }
 0x1bd   :  { %3896 = vmatpush1.bf16.msra.mxu0 %v3895_v45  ;;  %v3917_v45 = vpack.c.bf16 %v585_v40, %v581_v39  ;;  %v3937_v41 = vpack.c.bf16 %v625_v36, %v621_v35 }
 0x1be   :  { %4408 = vmatpush1.bf16.msra.mxu1 %v4407_v46  ;;  %3898 = vmatprep.subr.bf16.mxu0 %v3897_v47  ;;  %v580_v46 = vld [vmem:[#allocation2 + $0x8c0] sm:$0xff] }
 0x1bf   :  { %4410 = vmatprep.subr.bf16.mxu1 %v4409_v51  ;;  %v584_v47 = vld [vmem:[#allocation2 + $0x8e0] sm:$0xff]  ;;  %v589_v51 = vld [vmem:[#allocation2 + $0x908] sm:$0xff] }
 0x1c0   :  { %v3919_v55 = vpack.c.bf16 %v584_v47, %v580_v46  ;;  %v626_v46 = vld [vmem:[#allocation2 + $0xa30] sm:$0xff]  ;;  %v629_v47 = vld [vmem:[#allocation2 + $0xa48] sm:$0xff] }
 0x1c1   :  { %3900 = vmatpush1.bf16.msra.mxu0 %v3899_v57  ;;  %v3921_v57 = vpack.c.bf16 %v593_v52, %v589_v51  ;;  %v3941_v53 = vpack.c.bf16 %v633_v48, %v629_v47 }
 0x1c2   :  { %4412 = vmatpush1.bf16.msra.mxu1 %v4411_v58  ;;  %3902 = vmatprep.subr.bf16.mxu0 %v3901_v59  ;;  %v588_v58 = vld [vmem:[#allocation2 + $0x900] sm:$0xff] }
 0x1c3   :  { %4414 = vmatprep.subr.bf16.mxu1 %v4413_v63  ;;  %v592_v59 = vld [vmem:[#allocation2 + $0x920] sm:$0xff]  ;;  %v597_v63 = vld [vmem:[#allocation2 + $0x948] sm:$0xff] }
 0x1c4   :  { %v3923_v3 = vpack.c.bf16 %v592_v59, %v588_v58  ;;  %v634_v58 = vld [vmem:[#allocation2 + $0xa70] sm:$0xff]  ;;  %v637_v59 = vld [vmem:[#allocation2 + $0xa88] sm:$0xff] }
 0x1c5   :  { %3904 = vmatpush1.bf16.msra.mxu0 %v3903_v5  ;;  %v3925_v5 = vpack.c.bf16 %v601_v0, %v597_v63  ;;  %v3945_v1 = vpack.c.bf16 %v641_v60, %v637_v59 }
 0x1c6   :  { %4416 = vmatpush1.bf16.msra.mxu1 %v4415_v6  ;;  %3906 = vmatprep.subr.bf16.mxu0 %v3905_v7  ;;  %v596_v6 = vld [vmem:[#allocation2 + $0x940] sm:$0xff] }
 0x1c7   :  { %4418 = vmatprep.subr.bf16.mxu1 %v4417_v11  ;;  %v600_v7 = vld [vmem:[#allocation2 + $0x960] sm:$0xff]  ;;  %v605_v11 = vld [vmem:[#allocation2 + $0x988] sm:$0xff] }
 0x1c8   :  { %1482 = vmatmul.mubr.f32.vlgmr.msra.gmra.mrb[0].mxu0 %v286_v17  ;;  %v3927_v15 = vpack.c.bf16 %v600_v7, %v596_v6  ;;  %v642_v6 = vld [vmem:[#allocation2 + $0xab0] sm:$0xff]  ;;  %v645_v7 = vld [vmem:[#allocation2 + $0xac8] sm:$0xff] }
 0x1c9   :  { %3908 = vmatpush1.bf16.msra.mxu0 %v3907_v18  ;;  %2050 = vmatmul.mubr.f32.vlgmr.msra.gmra.mrb[0].mxu1 %v286_v17  ;;  %v3929_v17 = vpack.c.bf16 %v609_v12, %v605_v11  ;;  %v604_v18 = vld [vmem:[#allocation2 + $0x980] sm:$0xff]  ;;  %v3949_v13 = vpack.c.bf16 %v649_v8, %v645_v7 }
 0x1ca   :  { %4420 = vmatpush1.bf16.msra.mxu1 %v4419_v19  ;;  %3910 = vmatprep.subr.bf16.mxu0 %v3909_v20  ;;  %v608_v19 = vld [vmem:[#allocation2 + $0x9a0] sm:$0xff]  ;;  %v606_v20 = vld [vmem:[#allocation2 + $0x990] sm:$0xff] }
 0x1cb   :  { %4422 = vmatprep.subr.bf16.mxu1 %v4421_v24  ;;  %1552 = vmatprep.mubr.f32.mxu0 %v289_v30  ;;  %v617_v24 = vld [vmem:[#allocation2 + $0x9e8] sm:$0xff]  ;;  %v3931_v27 = vpack.c.bf16 %v608_v19, %v604_v18  ;;  %v4443_v28 = vpack.c.bf16 %v610_v22, %v606_v20  ;;  %v650_v18 = vld [vmem:[#allocation2 + $0xaf0] sm:$0xff]  ;;  %v659_v22 = vld [vmem:[#allocation2 + $0xb38] sm:$0xff] }
 0x1cc   :  { %2120 = vmatprep.mubr.f32.mxu1 %v289_v30  ;;  %v3933_v29 = vpack.c.bf16 %v617_v24, %v613_v23  ;;  %v612_v30 = vld [vmem:[#allocation2 + $0x9c0] sm:$0xff]  ;;  %v653_v19 = vld [vmem:[#allocation2 + $0xb08] sm:$0xff] }
 0x1cd   :  { %3912 = vmatpush1.bf16.msra.mxu0 %v3911_v31  ;;  %v616_v31 = vld [vmem:[#allocation2 + $0x9e0] sm:$0xff]  ;;  %v657_v20 = vld [vmem:[#allocation2 + $0xb28] sm:$0xff] }
 0x1ce   :  { %4424 = vmatpush1.bf16.msra.mxu1 %v4423_v32  ;;  %3914 = vmatprep.subr.bf16.mxu0 %v3913_v33  ;;  %v614_v32 = vld [vmem:[#allocation2 + $0x9d0] sm:$0xff]  ;;  %v4445_v33 = vpack.c.bf16 %v619_v26, %v615_v25  ;;  %v3935_v39 = vpack.c.bf16 %v616_v31, %v612_v30  ;;  %v3953_v25 = vpack.c.bf16 %v657_v20, %v653_v19  ;;  %v652_v26 = vld [vmem:[#allocation2 + $0xb00] sm:$0xff]  ;;  %v661_v31 = vld [vmem:[#allocation2 + $0xb48] sm:$0xff] }
 0x1cf   :  { %4426 = vmatprep.subr.bf16.mxu1 %v4425_v37  ;;  %v623_v37 = vld [vmem:[#allocation2 + $0xa18] sm:$0xff]  ;;  %v4447_v40 = vpack.c.bf16 %v618_v34, %v614_v32  ;;  %v658_v30 = vld [vmem:[#allocation2 + $0xb30] sm:$0xff]  ;;  %v665_v32 = vld [vmem:[#allocation2 + $0xb68] sm:$0xff] }
 0x1d0   :  { %v667_v34 = vld [vmem:[#allocation2 + $0xb78] sm:$0xff]  ;;  %v288_v19 = vld [vmem:[%s5992_s4 + $0x20] sm:$0xff] }
 0x1d1   :  { %3916 = vmatpush1.bf16.msra.mxu0 %v3915_v43  ;;  %v624_v43 = vld [vmem:[#allocation2 + $0xa20] sm:$0xff] }
 0x1d2   :  { %4428 = vmatpush1.bf16.msra.mxu1 %v4427_v44  ;;  %3918 = vmatprep.subr.bf16.mxu0 %v3917_v45  ;;  %v622_v44 = vld [vmem:[#allocation2 + $0xa10] sm:$0xff]  ;;  %v4449_v45 = vpack.c.bf16 %v627_v38, %v623_v37  ;;  %v3939_v51 = vpack.c.bf16 %v624_v43, %v620_v42  ;;  %v3957_v37 = vpack.c.bf16 %v665_v32, %v661_v31  ;;  %v660_v38 = vld [vmem:[#allocation2 + $0xb40] sm:$0xff]  ;;  %v669_v43 = vld [vmem:[#allocation2 + $0xb88] sm:$0xff] }
 0x1d3   :  { %4430 = vmatprep.subr.bf16.mxu1 %v4429_v49  ;;  %v631_v49 = vld [vmem:[#allocation2 + $0xa58] sm:$0xff]  ;;  %v4451_v52 = vpack.c.bf16 %v626_v46, %v622_v44  ;;  %v666_v42 = vld [vmem:[#allocation2 + $0xb70] sm:$0xff]  ;;  %v673_v44 = vld [vmem:[#allocation2 + $0xba8] sm:$0xff] }
 0x1d4   :  { %v675_v46 = vld [vmem:[#allocation2 + $0xbb8] sm:$0xff] }
 0x1d5   :  { %3920 = vmatpush1.bf16.msra.mxu0 %v3919_v55  ;;  %v632_v55 = vld [vmem:[#allocation2 + $0xa60] sm:$0xff]  ;;  %v707_v31 = vld [vmem:[#allocation2 + $0xcb8] sm:$0xff] }
 0x1d6   :  { %4432 = vmatpush1.bf16.msra.mxu1 %v4431_v56  ;;  %3922 = vmatprep.subr.bf16.mxu0 %v3921_v57  ;;  %v630_v56 = vld [vmem:[#allocation2 + $0xa50] sm:$0xff]  ;;  %v4453_v57 = vpack.c.bf16 %v635_v50, %v631_v49  ;;  %v3943_v63 = vpack.c.bf16 %v632_v55, %v628_v54  ;;  %v3961_v49 = vpack.c.bf16 %v673_v44, %v669_v43  ;;  %v668_v50 = vld [vmem:[#allocation2 + $0xb80] sm:$0xff]  ;;  %v677_v55 = vld [vmem:[#allocation2 + $0xbc8] sm:$0xff] }
 0x1d7   :  { %4434 = vmatprep.subr.bf16.mxu1 %v4433_v61  ;;  %v639_v61 = vld [vmem:[#allocation2 + $0xa98] sm:$0xff]  ;;  %v4455_v0 = vpack.c.bf16 %v634_v58, %v630_v56  ;;  %v674_v54 = vld [vmem:[#allocation2 + $0xbb0] sm:$0xff]  ;;  %v681_v56 = vld [vmem:[#allocation2 + $0xbe8] sm:$0xff] }
 0x1d8   :  { %v683_v58 = vld [vmem:[#allocation2 + $0xbf8] sm:$0xff] }
 0x1d9   :  { %3924 = vmatpush1.bf16.msra.mxu0 %v3923_v3  ;;  %v640_v3 = vld [vmem:[#allocation2 + $0xaa0] sm:$0xff]  ;;  %v291_v32 = vld [vmem:[%s5992_s4 + $0x38] sm:$0xff] }
 0x1da   :  { %4436 = vmatpush1.bf16.msra.mxu1 %v4435_v4  ;;  %3926 = vmatprep.subr.bf16.mxu0 %v3925_v5  ;;  %v638_v4 = vld [vmem:[#allocation2 + $0xa90] sm:$0xff]  ;;  %v4457_v5 = vpack.c.bf16 %v643_v62, %v639_v61  ;;  %v3947_v11 = vpack.c.bf16 %v640_v3, %v636_v2  ;;  %v3965_v61 = vpack.c.bf16 %v681_v56, %v677_v55  ;;  %v676_v62 = vld [vmem:[#allocation2 + $0xbc0] sm:$0xff]  ;;  %v685_v3 = vld [vmem:[#allocation2 + $0xc08] sm:$0xff] }
 0x1db   :  { %4438 = vmatprep.subr.bf16.mxu1 %v4437_v9  ;;  %v647_v9 = vld [vmem:[#allocation2 + $0xad8] sm:$0xff]  ;;  %v4459_v12 = vpack.c.bf16 %v642_v6, %v638_v4  ;;  %v682_v2 = vld [vmem:[#allocation2 + $0xbf0] sm:$0xff]  ;;  %v689_v4 = vld [vmem:[#allocation2 + $0xc28] sm:$0xff] }
 0x1dc   :  { %v691_v6 = vld [vmem:[#allocation2 + $0xc38] sm:$0xff] }
 0x1dd   :  { %3928 = vmatpush1.bf16.msra.mxu0 %v3927_v15  ;;  %v648_v15 = vld [vmem:[#allocation2 + $0xae0] sm:$0xff]  ;;  %v711_v43 = vld [vmem:[#allocation2 + $0xcd8] sm:$0xff] }
 0x1de   :  { %4440 = vmatpush1.bf16.msra.mxu1 %v4439_v16  ;;  %3930 = vmatprep.subr.bf16.mxu0 %v3929_v17  ;;  %v646_v16 = vld [vmem:[#allocation2 + $0xad0] sm:$0xff]  ;;  %v4461_v17 = vpack.c.bf16 %v651_v10, %v647_v9  ;;  %v3951_v23 = vpack.c.bf16 %v648_v15, %v644_v14  ;;  %v3969_v9 = vpack.c.bf16 %v689_v4, %v685_v3  ;;  %v684_v10 = vld [vmem:[#allocation2 + $0xc00] sm:$0xff]  ;;  %v693_v15 = vld [vmem:[#allocation2 + $0xc48] sm:$0xff] }
 0x1df   :  { %4442 = vmatprep.subr.bf16.mxu1 %v4441_v21  ;;  %v655_v21 = vld [vmem:[#allocation2 + $0xb18] sm:$0xff]  ;;  %v4463_v24 = vpack.c.bf16 %v650_v18, %v646_v16  ;;  %v690_v14 = vld [vmem:[#allocation2 + $0xc30] sm:$0xff]  ;;  %v697_v16 = vld [vmem:[#allocation2 + $0xc68] sm:$0xff] }
 0x1e0   :  { %v699_v18 = vld [vmem:[#allocation2 + $0xc78] sm:$0xff] }
 0x1e1   :  { %3932 = vmatpush1.bf16.msra.mxu0 %v3931_v27  ;;  %v656_v27 = vld [vmem:[#allocation2 + $0xb20] sm:$0xff]  ;;  %v715_v44 = vld [vmem:[#allocation2 + $0xcf8] sm:$0xff] }
 0x1e2   :  { %4444 = vmatpush1.bf16.msra.mxu1 %v4443_v28  ;;  %3934 = vmatprep.subr.bf16.mxu0 %v3933_v29  ;;  %v654_v28 = vld [vmem:[#allocation2 + $0xb10] sm:$0xff]  ;;  %v4465_v29 = vpack.c.bf16 %v659_v22, %v655_v21  ;;  %v3955_v35 = vpack.c.bf16 %v656_v27, %v652_v26  ;;  %v3973_v22 = vpack.c.bf16 %v697_v16, %v693_v15  ;;  %v719_v55 = vld [vmem:[#allocation2 + $0xd18] sm:$0xff] }
 0x1e3   :  { %4446 = vmatprep.subr.bf16.mxu1 %v4445_v33  ;;  %v663_v33 = vld [vmem:[#allocation2 + $0xb58] sm:$0xff]  ;;  %v4467_v36 = vpack.c.bf16 %v658_v30, %v654_v28  ;;  %v698_v27 = vld [vmem:[#allocation2 + $0xc70] sm:$0xff]  ;;  %v701_v28 = vld [vmem:[#allocation2 + $0xc88] sm:$0xff] }
 0x1e4   :  { %v703_v30 = vld [vmem:[#allocation2 + $0xc98] sm:$0xff] }
 0x1e5   :  { %3936 = vmatpush1.bf16.msra.mxu0 %v3935_v39  ;;  %v664_v39 = vld [vmem:[#allocation2 + $0xb60] sm:$0xff]  ;;  %v723_v56 = vld [vmem:[#allocation2 + $0xd38] sm:$0xff] }
 0x1e6   :  { %4448 = vmatpush1.bf16.msra.mxu1 %v4447_v40  ;;  %3938 = vmatprep.subr.bf16.mxu0 %v3937_v41  ;;  %v662_v40 = vld [vmem:[#allocation2 + $0xb50] sm:$0xff]  ;;  %v4469_v41 = vpack.c.bf16 %v667_v34, %v663_v33  ;;  %v3959_v47 = vpack.c.bf16 %v664_v39, %v660_v38  ;;  %v4489_v39 = vpack.c.bf16 %v707_v31, %v703_v30  ;;  %v727_v3 = vld [vmem:[#allocation2 + $0xd58] sm:$0xff] }
 0x1e7   :  { %4450 = vmatprep.subr.bf16.mxu1 %v4449_v45  ;;  %v671_v45 = vld [vmem:[#allocation2 + $0xb98] sm:$0xff]  ;;  %v4471_v48 = vpack.c.bf16 %v666_v42, %v662_v40  ;;  %v702_v38 = vld [vmem:[#allocation2 + $0xc90] sm:$0xff]  ;;  %v713_v42 = vld [vmem:[#allocation2 + $0xce8] sm:$0xff] }
 0x1e8   :  { %v706_v40 = vld [vmem:[#allocation2 + $0xcb0] sm:$0xff]  ;;  %v731_v4 = vld [vmem:[#allocation2 + $0xd78] sm:$0xff] }
 0x1e9   :  { %3940 = vmatpush1.bf16.msra.mxu0 %v3939_v51  ;;  %v672_v51 = vld [vmem:[#allocation2 + $0xba0] sm:$0xff]  ;;  %v735_v15 = vld [vmem:[#allocation2 + $0xd98] sm:$0xff] }
 0x1ea   :  { %4452 = vmatpush1.bf16.msra.mxu1 %v4451_v52  ;;  %3942 = vmatprep.subr.bf16.mxu0 %v3941_v53  ;;  %v670_v52 = vld [vmem:[#allocation2 + $0xb90] sm:$0xff]  ;;  %v4473_v53 = vpack.c.bf16 %v675_v46, %v671_v45  ;;  %v3963_v59 = vpack.c.bf16 %v672_v51, %v668_v50  ;;  %v4491_v46 = vpack.c.bf16 %v706_v40, %v702_v38  ;;  %v739_v16 = vld [vmem:[#allocation2 + $0xdb8] sm:$0xff]  ;;  %v753_v38 = vld [vmem:[#allocation2 + $0xe28] sm:$0xff] }
 0x1eb   :  { %4454 = vmatprep.subr.bf16.mxu1 %v4453_v57  ;;  %v679_v57 = vld [vmem:[#allocation2 + $0xbd8] sm:$0xff]  ;;  %v4475_v60 = vpack.c.bf16 %v674_v54, %v670_v52  ;;  %v710_v50 = vld [vmem:[#allocation2 + $0xcd0] sm:$0xff]  ;;  %v4493_v51 = vpack.c.bf16 %v715_v44, %v711_v43  ;;  %v721_v54 = vld [vmem:[#allocation2 + $0xd28] sm:$0xff] }
 0x1ec   :  { %v714_v52 = vld [vmem:[#allocation2 + $0xcf0] sm:$0xff]  ;;  %v755_v40 = vld [vmem:[#allocation2 + $0xe38] sm:$0xff]  ;;  %v748_v44 = vld [vmem:[#allocation2 + $0xe00] sm:$0xff] }
 0x1ed   :  { %3944 = vmatpush1.bf16.msra.mxu0 %v3943_v63  ;;  %v680_v63 = vld [vmem:[#allocation2 + $0xbe0] sm:$0xff] }
 0x1ee   :  { %4456 = vmatpush1.bf16.msra.mxu1 %v4455_v0  ;;  %3946 = vmatprep.subr.bf16.mxu0 %v3945_v1  ;;  %v678_v0 = vld [vmem:[#allocation2 + $0xbd0] sm:$0xff]  ;;  %v4477_v1 = vpack.c.bf16 %v683_v58, %v679_v57  ;;  %v3967_v7 = vpack.c.bf16 %v680_v63, %v676_v62  ;;  %v4495_v58 = vpack.c.bf16 %v714_v52, %v710_v50  ;;  %v761_v50 = vld [vmem:[#allocation2 + $0xe68] sm:$0xff]  ;;  %v763_v52 = vld [vmem:[#allocation2 + $0xe78] sm:$0xff] }
 0x1ef   :  { %4458 = vmatprep.subr.bf16.mxu1 %v4457_v5  ;;  %v687_v5 = vld [vmem:[#allocation2 + $0xc18] sm:$0xff]  ;;  %v4479_v8 = vpack.c.bf16 %v682_v2, %v678_v0  ;;  %v718_v62 = vld [vmem:[#allocation2 + $0xd10] sm:$0xff]  ;;  %v4497_v63 = vpack.c.bf16 %v723_v56, %v719_v55  ;;  %v729_v2 = vld [vmem:[#allocation2 + $0xd68] sm:$0xff] }
 0x1f0   :  { %v722_v0 = vld [vmem:[#allocation2 + $0xd30] sm:$0xff]  ;;  %v756_v56 = vld [vmem:[#allocation2 + $0xe40] sm:$0xff] }
 0x1f1   :  { %3948 = vmatpush1.bf16.msra.mxu0 %v3947_v11  ;;  %v688_v11 = vld [vmem:[#allocation2 + $0xc20] sm:$0xff] }
 0x1f2   :  { %4460 = vmatpush1.bf16.msra.mxu1 %v4459_v12  ;;  %3950 = vmatprep.subr.bf16.mxu0 %v3949_v13  ;;  %v686_v12 = vld [vmem:[#allocation2 + $0xc10] sm:$0xff]  ;;  %v4481_v13 = vpack.c.bf16 %v691_v6, %v687_v5  ;;  %v3971_v20 = vpack.c.bf16 %v688_v11, %v684_v10  ;;  %v4499_v6 = vpack.c.bf16 %v722_v0, %v718_v62  ;;  %v769_v62 = vld [vmem:[#allocation2 + $0xea8] sm:$0xff]  ;;  %v771_v0 = vld [vmem:[#allocation2 + $0xeb8] sm:$0xff] }
 0x1f3   :  { %4462 = vmatprep.subr.bf16.mxu1 %v4461_v17  ;;  %v695_v17 = vld [vmem:[#allocation2 + $0xc58] sm:$0xff]  ;;  %v4483_v21 = vpack.c.bf16 %v690_v14, %v686_v12  ;;  %v726_v10 = vld [vmem:[#allocation2 + $0xd50] sm:$0xff]  ;;  %v4501_v11 = vpack.c.bf16 %v731_v4, %v727_v3  ;;  %v737_v14 = vld [vmem:[#allocation2 + $0xda8] sm:$0xff] }
 0x1f4   :  { %v4485_v26 = vpack.c.bf16 %v699_v18, %v695_v17  ;;  %v730_v12 = vld [vmem:[#allocation2 + $0xd70] sm:$0xff]  ;;  %v764_v4 = vld [vmem:[#allocation2 + $0xe80] sm:$0xff] }
 0x1f5   :  { %3952 = vmatpush1.bf16.msra.mxu0 %v3951_v23  ;;  %v692_v23 = vld [vmem:[#allocation2 + $0xc40] sm:$0xff]  ;;  %v4503_v18 = vpack.c.bf16 %v730_v12, %v726_v10  ;;  %v777_v10 = vld [vmem:[#allocation2 + $0xee8] sm:$0xff]  ;;  %v779_v12 = vld [vmem:[#allocation2 + $0xef8] sm:$0xff] }
 0x1f6   :  { %4464 = vmatpush1.bf16.msra.mxu1 %v4463_v24  ;;  %3954 = vmatprep.subr.bf16.mxu0 %v3953_v25  ;;  %v696_v24 = vld [vmem:[#allocation2 + $0xc60] sm:$0xff]  ;;  %v694_v25 = vld [vmem:[#allocation2 + $0xc50] sm:$0xff] }
 0x1f7   :  { %4466 = vmatprep.subr.bf16.mxu1 %v4465_v29  ;;  %v705_v29 = vld [vmem:[#allocation2 + $0xca8] sm:$0xff]  ;;  %v3975_v33 = vpack.c.bf16 %v696_v24, %v692_v23  ;;  %v4487_v34 = vpack.c.bf16 %v698_v27, %v694_v25  ;;  %v4505_v23 = vpack.c.bf16 %v739_v16, %v735_v15  ;;  %v738_v24 = vld [vmem:[#allocation2 + $0xdb0] sm:$0xff]  ;;  %v743_v27 = vld [vmem:[#allocation2 + $0xdd8] sm:$0xff] }
 0x1f8   :  { %v741_v25 = vld [vmem:[#allocation2 + $0xdc8] sm:$0xff]  ;;  %v772_v16 = vld [vmem:[#allocation2 + $0xec0] sm:$0xff] }
 0x1f9   :  { %3956 = vmatpush1.bf16.msra.mxu0 %v3955_v35  ;;  %v3977_v35 = vpack.c.bf16 %v705_v29, %v701_v28  ;;  %v747_v28 = vld [vmem:[#allocation2 + $0xdf8] sm:$0xff] }
 0x1fa   :  { %4468 = vmatpush1.bf16.msra.mxu1 %v4467_v36  ;;  %3958 = vmatprep.subr.bf16.mxu0 %v3957_v37  ;;  %v700_v36 = vld [vmem:[#allocation2 + $0xc80] sm:$0xff] }
 0x1fb   :  { %4470 = vmatprep.subr.bf16.mxu1 %v4469_v41  ;;  %v704_v37 = vld [vmem:[#allocation2 + $0xca0] sm:$0xff]  ;;  %v709_v41 = vld [vmem:[#allocation2 + $0xcc8] sm:$0xff] }
 0x1fc   :  { %v3979_v45 = vpack.c.bf16 %v704_v37, %v700_v36  ;;  %v746_v36 = vld [vmem:[#allocation2 + $0xdf0] sm:$0xff]  ;;  %v749_v37 = vld [vmem:[#allocation2 + $0xe08] sm:$0xff] }
 0x1fd   :  { %3960 = vmatpush1.bf16.msra.mxu0 %v3959_v47  ;;  %v3981_v47 = vpack.c.bf16 %v713_v42, %v709_v41  ;;  %v4001_v43 = vpack.c.bf16 %v753_v38, %v749_v37 }
 0x1fe   :  { %4472 = vmatpush1.bf16.msra.mxu1 %v4471_v48  ;;  %3962 = vmatprep.subr.bf16.mxu0 %v3961_v49  ;;  %v708_v48 = vld [vmem:[#allocation2 + $0xcc0] sm:$0xff] }
 0x1ff   :  { %4474 = vmatprep.subr.bf16.mxu1 %v4473_v53  ;;  %v712_v49 = vld [vmem:[#allocation2 + $0xce0] sm:$0xff]  ;;  %v717_v53 = vld [vmem:[#allocation2 + $0xd08] sm:$0xff] }
 0x200   :  { %v3983_v57 = vpack.c.bf16 %v712_v49, %v708_v48  ;;  %v754_v48 = vld [vmem:[#allocation2 + $0xe30] sm:$0xff]  ;;  %v757_v49 = vld [vmem:[#allocation2 + $0xe48] sm:$0xff] }
 0x201   :  { %3964 = vmatpush1.bf16.msra.mxu0 %v3963_v59  ;;  %v3985_v59 = vpack.c.bf16 %v721_v54, %v717_v53  ;;  %v4005_v55 = vpack.c.bf16 %v761_v50, %v757_v49 }
 0x202   :  { %4476 = vmatpush1.bf16.msra.mxu1 %v4475_v60  ;;  %3966 = vmatprep.subr.bf16.mxu0 %v3965_v61  ;;  %v716_v60 = vld [vmem:[#allocation2 + $0xd00] sm:$0xff] }
 0x203   :  { %4478 = vmatprep.subr.bf16.mxu1 %v4477_v1  ;;  %v720_v61 = vld [vmem:[#allocation2 + $0xd20] sm:$0xff]  ;;  %v725_v1 = vld [vmem:[#allocation2 + $0xd48] sm:$0xff] }
 0x204   :  { %v3987_v5 = vpack.c.bf16 %v720_v61, %v716_v60  ;;  %v762_v60 = vld [vmem:[#allocation2 + $0xe70] sm:$0xff]  ;;  %v765_v61 = vld [vmem:[#allocation2 + $0xe88] sm:$0xff] }
 0x205   :  { %3968 = vmatpush1.bf16.msra.mxu0 %v3967_v7  ;;  %v3989_v7 = vpack.c.bf16 %v729_v2, %v725_v1  ;;  %v4009_v3 = vpack.c.bf16 %v769_v62, %v765_v61 }
 0x206   :  { %4480 = vmatpush1.bf16.msra.mxu1 %v4479_v8  ;;  %3970 = vmatprep.subr.bf16.mxu0 %v3969_v9  ;;  %v724_v8 = vld [vmem:[#allocation2 + $0xd40] sm:$0xff] }
 0x207   :  { %4482 = vmatprep.subr.bf16.mxu1 %v4481_v13  ;;  %v728_v9 = vld [vmem:[#allocation2 + $0xd60] sm:$0xff]  ;;  %v733_v13 = vld [vmem:[#allocation2 + $0xd88] sm:$0xff] }
 0x208   :  { %1553 = vmatmul.mubr.f32.vlgmr.msra.gmra.mrb[0].mxu0 %v288_v19  ;;  %v3991_v17 = vpack.c.bf16 %v728_v9, %v724_v8  ;;  %v770_v8 = vld [vmem:[#allocation2 + $0xeb0] sm:$0xff]  ;;  %v773_v9 = vld [vmem:[#allocation2 + $0xec8] sm:$0xff] }
 0x209   :  { %3972 = vmatpush1.bf16.msra.mxu0 %v3971_v20  ;;  %2121 = vmatmul.mubr.f32.vlgmr.msra.gmra.mrb[0].mxu1 %v288_v19  ;;  %v3993_v19 = vpack.c.bf16 %v737_v14, %v733_v13  ;;  %v732_v20 = vld [vmem:[#allocation2 + $0xd80] sm:$0xff]  ;;  %v4013_v15 = vpack.c.bf16 %v777_v10, %v773_v9 }
 0x20a   :  { %4484 = vmatpush1.bf16.msra.mxu1 %v4483_v21  ;;  %3974 = vmatprep.subr.bf16.mxu0 %v3973_v22  ;;  %v736_v21 = vld [vmem:[#allocation2 + $0xda0] sm:$0xff]  ;;  %v734_v22 = vld [vmem:[#allocation2 + $0xd90] sm:$0xff] }
 0x20b   :  { %4486 = vmatprep.subr.bf16.mxu1 %v4485_v26  ;;  %1623 = vmatprep.mubr.f32.mxu0 %v291_v32  ;;  %v745_v26 = vld [vmem:[#allocation2 + $0xde8] sm:$0xff]  ;;  %v3995_v29 = vpack.c.bf16 %v736_v21, %v732_v20  ;;  %v4507_v30 = vpack.c.bf16 %v738_v24, %v734_v22  ;;  %v778_v20 = vld [vmem:[#allocation2 + $0xef0] sm:$0xff]  ;;  %v787_v24 = vld [vmem:[#allocation2 + $0xf38] sm:$0xff] }
 0x20c   :  { %2191 = vmatprep.mubr.f32.mxu1 %v291_v32  ;;  %v3997_v31 = vpack.c.bf16 %v745_v26, %v741_v25  ;;  %v740_v32 = vld [vmem:[#allocation2 + $0xdc0] sm:$0xff]  ;;  %v781_v21 = vld [vmem:[#allocation2 + $0xf08] sm:$0xff] }
 0x20d   :  { %3976 = vmatpush1.bf16.msra.mxu0 %v3975_v33  ;;  %v744_v33 = vld [vmem:[#allocation2 + $0xde0] sm:$0xff]  ;;  %v785_v22 = vld [vmem:[#allocation2 + $0xf28] sm:$0xff] }
 0x20e   :  { %4488 = vmatpush1.bf16.msra.mxu1 %v4487_v34  ;;  %3978 = vmatprep.subr.bf16.mxu0 %v3977_v35  ;;  %v742_v34 = vld [vmem:[#allocation2 + $0xdd0] sm:$0xff]  ;;  %v4509_v35 = vpack.c.bf16 %v747_v28, %v743_v27  ;;  %v3999_v41 = vpack.c.bf16 %v744_v33, %v740_v32  ;;  %v4017_v27 = vpack.c.bf16 %v785_v22, %v781_v21  ;;  %v780_v28 = vld [vmem:[#allocation2 + $0xf00] sm:$0xff]  ;;  %v789_v33 = vld [vmem:[#allocation2 + $0xf48] sm:$0xff] }
 0x20f   :  { %4490 = vmatprep.subr.bf16.mxu1 %v4489_v39  ;;  %v751_v39 = vld [vmem:[#allocation2 + $0xe18] sm:$0xff]  ;;  %v4511_v42 = vpack.c.bf16 %v746_v36, %v742_v34  ;;  %v786_v32 = vld [vmem:[#allocation2 + $0xf30] sm:$0xff]  ;;  %v793_v34 = vld [vmem:[#allocation2 + $0xf68] sm:$0xff] }
 0x210   :  { %v795_v36 = vld [vmem:[#allocation2 + $0xf78] sm:$0xff]  ;;  %v290_v21 = vld [vmem:[%s5992_s4 + $0x30] sm:$0xff] }
 0x211   :  { %3980 = vmatpush1.bf16.msra.mxu0 %v3979_v45  ;;  %v752_v45 = vld [vmem:[#allocation2 + $0xe20] sm:$0xff] }
 0x212   :  { %4492 = vmatpush1.bf16.msra.mxu1 %v4491_v46  ;;  %3982 = vmatprep.subr.bf16.mxu0 %v3981_v47  ;;  %v750_v46 = vld [vmem:[#allocation2 + $0xe10] sm:$0xff]  ;;  %v4513_v47 = vpack.c.bf16 %v755_v40, %v751_v39  ;;  %v4003_v53 = vpack.c.bf16 %v752_v45, %v748_v44  ;;  %v4021_v39 = vpack.c.bf16 %v793_v34, %v789_v33  ;;  %v788_v40 = vld [vmem:[#allocation2 + $0xf40] sm:$0xff]  ;;  %v797_v45 = vld [vmem:[#allocation2 + $0xf88] sm:$0xff] }
 0x213   :  { %4494 = vmatprep.subr.bf16.mxu1 %v4493_v51  ;;  %v759_v51 = vld [vmem:[#allocation2 + $0xe58] sm:$0xff]  ;;  %v4515_v54 = vpack.c.bf16 %v754_v48, %v750_v46  ;;  %v794_v44 = vld [vmem:[#allocation2 + $0xf70] sm:$0xff]  ;;  %v801_v46 = vld [vmem:[#allocation2 + $0xfa8] sm:$0xff] }
 0x214   :  { %v803_v48 = vld [vmem:[#allocation2 + $0xfb8] sm:$0xff]  ;;  %v293_v34 = vld [vmem:[%s5992_s4 + $0x48] sm:$0xff] }
 0x215   :  { %3984 = vmatpush1.bf16.msra.mxu0 %v3983_v57  ;;  %v760_v57 = vld [vmem:[#allocation2 + $0xe60] sm:$0xff]  ;;  %v835_v33 = vld [vmem:[#allocation2 + $0x10b8] sm:$0xff] }
 0x216   :  { %4496 = vmatpush1.bf16.msra.mxu1 %v4495_v58  ;;  %3986 = vmatprep.subr.bf16.mxu0 %v3985_v59  ;;  %v758_v58 = vld [vmem:[#allocation2 + $0xe50] sm:$0xff]  ;;  %v4517_v59 = vpack.c.bf16 %v763_v52, %v759_v51  ;;  %v4007_v1 = vpack.c.bf16 %v760_v57, %v756_v56  ;;  %v4025_v51 = vpack.c.bf16 %v801_v46, %v797_v45  ;;  %v796_v52 = vld [vmem:[#allocation2 + $0xf80] sm:$0xff]  ;;  %v805_v57 = vld [vmem:[#allocation2 + $0xfc8] sm:$0xff] }
 0x217   :  { %4498 = vmatprep.subr.bf16.mxu1 %v4497_v63  ;;  %v767_v63 = vld [vmem:[#allocation2 + $0xe98] sm:$0xff]  ;;  %v4519_v2 = vpack.c.bf16 %v762_v60, %v758_v58  ;;  %v802_v56 = vld [vmem:[#allocation2 + $0xfb0] sm:$0xff]  ;;  %v809_v58 = vld [vmem:[#allocation2 + $0xfe8] sm:$0xff] }
 0x218   :  { %v811_v60 = vld [vmem:[#allocation2 + $0xff8] sm:$0xff] }
 0x219   :  { %3988 = vmatpush1.bf16.msra.mxu0 %v3987_v5  ;;  %v768_v5 = vld [vmem:[#allocation2 + $0xea0] sm:$0xff]  ;;  %v839_v45 = vld [vmem:[#allocation2 + $0x10d8] sm:$0xff] }
 0x21a   :  { %4500 = vmatpush1.bf16.msra.mxu1 %v4499_v6  ;;  %3990 = vmatprep.subr.bf16.mxu0 %v3989_v7  ;;  %v766_v6 = vld [vmem:[#allocation2 + $0xe90] sm:$0xff]  ;;  %v4521_v7 = vpack.c.bf16 %v771_v0, %v767_v63  ;;  %v4011_v13 = vpack.c.bf16 %v768_v5, %v764_v4  ;;  %v4029_v63 = vpack.c.bf16 %v809_v58, %v805_v57  ;;  %v804_v0 = vld [vmem:[#allocation2 + $0xfc0] sm:$0xff]  ;;  %v813_v5 = vld [vmem:[#allocation2 + $0x1008] sm:$0xff] }
 0x21b   :  { %4502 = vmatprep.subr.bf16.mxu1 %v4501_v11  ;;  %v775_v11 = vld [vmem:[#allocation2 + $0xed8] sm:$0xff]  ;;  %v4523_v14 = vpack.c.bf16 %v770_v8, %v766_v6  ;;  %v810_v4 = vld [vmem:[#allocation2 + $0xff0] sm:$0xff]  ;;  %v817_v6 = vld [vmem:[#allocation2 + $0x1028] sm:$0xff] }
 0x21c   :  { %v819_v8 = vld [vmem:[#allocation2 + $0x1038] sm:$0xff] }
 0x21d   :  { %3992 = vmatpush1.bf16.msra.mxu0 %v3991_v17  ;;  %v776_v17 = vld [vmem:[#allocation2 + $0xee0] sm:$0xff]  ;;  %v843_v46 = vld [vmem:[#allocation2 + $0x10f8] sm:$0xff] }
 0x21e   :  { %4504 = vmatpush1.bf16.msra.mxu1 %v4503_v18  ;;  %3994 = vmatprep.subr.bf16.mxu0 %v3993_v19  ;;  %v774_v18 = vld [vmem:[#allocation2 + $0xed0] sm:$0xff]  ;;  %v4525_v19 = vpack.c.bf16 %v779_v12, %v775_v11  ;;  %v4015_v25 = vpack.c.bf16 %v776_v17, %v772_v16  ;;  %v4033_v11 = vpack.c.bf16 %v817_v6, %v813_v5  ;;  %v812_v12 = vld [vmem:[#allocation2 + $0x1000] sm:$0xff]  ;;  %v821_v17 = vld [vmem:[#allocation2 + $0x1048] sm:$0xff] }
 0x21f   :  { %4506 = vmatprep.subr.bf16.mxu1 %v4505_v23  ;;  %v783_v23 = vld [vmem:[#allocation2 + $0xf18] sm:$0xff]  ;;  %v4527_v26 = vpack.c.bf16 %v778_v20, %v774_v18  ;;  %v818_v16 = vld [vmem:[#allocation2 + $0x1030] sm:$0xff]  ;;  %v825_v18 = vld [vmem:[#allocation2 + $0x1068] sm:$0xff] }
 0x220   :  { %v827_v20 = vld [vmem:[#allocation2 + $0x1078] sm:$0xff] }
 0x221   :  { %3996 = vmatpush1.bf16.msra.mxu0 %v3995_v29  ;;  %v784_v29 = vld [vmem:[#allocation2 + $0xf20] sm:$0xff]  ;;  %v847_v57 = vld [vmem:[#allocation2 + $0x1118] sm:$0xff] }
 0x222   :  { %4508 = vmatpush1.bf16.msra.mxu1 %v4507_v30  ;;  %3998 = vmatprep.subr.bf16.mxu0 %v3997_v31  ;;  %v782_v30 = vld [vmem:[#allocation2 + $0xf10] sm:$0xff]  ;;  %v4529_v31 = vpack.c.bf16 %v787_v24, %v783_v23  ;;  %v4019_v37 = vpack.c.bf16 %v784_v29, %v780_v28  ;;  %v4037_v24 = vpack.c.bf16 %v825_v18, %v821_v17  ;;  %v851_v58 = vld [vmem:[#allocation2 + $0x1138] sm:$0xff] }
 0x223   :  { %4510 = vmatprep.subr.bf16.mxu1 %v4509_v35  ;;  %v791_v35 = vld [vmem:[#allocation2 + $0xf58] sm:$0xff]  ;;  %v4531_v38 = vpack.c.bf16 %v786_v32, %v782_v30  ;;  %v826_v29 = vld [vmem:[#allocation2 + $0x1070] sm:$0xff]  ;;  %v829_v30 = vld [vmem:[#allocation2 + $0x1088] sm:$0xff] }
 0x224   :  { %v831_v32 = vld [vmem:[#allocation2 + $0x1098] sm:$0xff] }
 0x225   :  { %4000 = vmatpush1.bf16.msra.mxu0 %v3999_v41  ;;  %v792_v41 = vld [vmem:[#allocation2 + $0xf60] sm:$0xff]  ;;  %v855_v5 = vld [vmem:[#allocation2 + $0x1158] sm:$0xff] }
 0x226   :  { %4512 = vmatpush1.bf16.msra.mxu1 %v4511_v42  ;;  %4002 = vmatprep.subr.bf16.mxu0 %v4001_v43  ;;  %v790_v42 = vld [vmem:[#allocation2 + $0xf50] sm:$0xff]  ;;  %v4533_v43 = vpack.c.bf16 %v795_v36, %v791_v35  ;;  %v4023_v49 = vpack.c.bf16 %v792_v41, %v788_v40  ;;  %v4553_v41 = vpack.c.bf16 %v835_v33, %v831_v32  ;;  %v859_v6 = vld [vmem:[#allocation2 + $0x1178] sm:$0xff] }
 0x227   :  { %4514 = vmatprep.subr.bf16.mxu1 %v4513_v47  ;;  %v799_v47 = vld [vmem:[#allocation2 + $0xf98] sm:$0xff]  ;;  %v4535_v50 = vpack.c.bf16 %v794_v44, %v790_v42  ;;  %v830_v40 = vld [vmem:[#allocation2 + $0x1090] sm:$0xff]  ;;  %v841_v44 = vld [vmem:[#allocation2 + $0x10e8] sm:$0xff] }
 0x228   :  { %v834_v42 = vld [vmem:[#allocation2 + $0x10b0] sm:$0xff]  ;;  %v863_v17 = vld [vmem:[#allocation2 + $0x1198] sm:$0xff] }
 0x229   :  { %4004 = vmatpush1.bf16.msra.mxu0 %v4003_v53  ;;  %v800_v53 = vld [vmem:[#allocation2 + $0xfa0] sm:$0xff]  ;;  %v867_v18 = vld [vmem:[#allocation2 + $0x11b8] sm:$0xff] }
 0x22a   :  { %4516 = vmatpush1.bf16.msra.mxu1 %v4515_v54  ;;  %4006 = vmatprep.subr.bf16.mxu0 %v4005_v55  ;;  %v798_v54 = vld [vmem:[#allocation2 + $0xf90] sm:$0xff]  ;;  %v4537_v55 = vpack.c.bf16 %v803_v48, %v799_v47  ;;  %v4027_v61 = vpack.c.bf16 %v800_v53, %v796_v52  ;;  %v4555_v48 = vpack.c.bf16 %v834_v42, %v830_v40  ;;  %v881_v40 = vld [vmem:[#allocation2 + $0x1228] sm:$0xff]  ;;  %v883_v42 = vld [vmem:[#allocation2 + $0x1238] sm:$0xff] }
 0x22b   :  { %4518 = vmatprep.subr.bf16.mxu1 %v4517_v59  ;;  %v807_v59 = vld [vmem:[#allocation2 + $0xfd8] sm:$0xff]  ;;  %v4539_v62 = vpack.c.bf16 %v802_v56, %v798_v54  ;;  %v838_v52 = vld [vmem:[#allocation2 + $0x10d0] sm:$0xff]  ;;  %v4557_v53 = vpack.c.bf16 %v843_v46, %v839_v45  ;;  %v849_v56 = vld [vmem:[#allocation2 + $0x1128] sm:$0xff] }
 0x22c   :  { %v842_v54 = vld [vmem:[#allocation2 + $0x10f0] sm:$0xff]  ;;  %v876_v46 = vld [vmem:[#allocation2 + $0x1200] sm:$0xff] }
 0x22d   :  { %4008 = vmatpush1.bf16.msra.mxu0 %v4007_v1  ;;  %v808_v1 = vld [vmem:[#allocation2 + $0xfe0] sm:$0xff] }
 0x22e   :  { %4520 = vmatpush1.bf16.msra.mxu1 %v4519_v2  ;;  %4010 = vmatprep.subr.bf16.mxu0 %v4009_v3  ;;  %v806_v2 = vld [vmem:[#allocation2 + $0xfd0] sm:$0xff]  ;;  %v4541_v3 = vpack.c.bf16 %v811_v60, %v807_v59  ;;  %v4031_v9 = vpack.c.bf16 %v808_v1, %v804_v0  ;;  %v4559_v60 = vpack.c.bf16 %v842_v54, %v838_v52  ;;  %v889_v52 = vld [vmem:[#allocation2 + $0x1268] sm:$0xff]  ;;  %v891_v54 = vld [vmem:[#allocation2 + $0x1278] sm:$0xff] }
 0x22f   :  { %4522 = vmatprep.subr.bf16.mxu1 %v4521_v7  ;;  %v815_v7 = vld [vmem:[#allocation2 + $0x1018] sm:$0xff]  ;;  %v4543_v10 = vpack.c.bf16 %v810_v4, %v806_v2  ;;  %v846_v0 = vld [vmem:[#allocation2 + $0x1110] sm:$0xff]  ;;  %v4561_v1 = vpack.c.bf16 %v851_v58, %v847_v57  ;;  %v857_v4 = vld [vmem:[#allocation2 + $0x1168] sm:$0xff] }
 0x230   :  { %v850_v2 = vld [vmem:[#allocation2 + $0x1130] sm:$0xff]  ;;  %v884_v58 = vld [vmem:[#allocation2 + $0x1240] sm:$0xff] }
 0x231   :  { %4012 = vmatpush1.bf16.msra.mxu0 %v4011_v13  ;;  %v816_v13 = vld [vmem:[#allocation2 + $0x1020] sm:$0xff] }
 0x232   :  { %4524 = vmatpush1.bf16.msra.mxu1 %v4523_v14  ;;  %4014 = vmatprep.subr.bf16.mxu0 %v4013_v15  ;;  %v814_v14 = vld [vmem:[#allocation2 + $0x1010] sm:$0xff]  ;;  %v4545_v15 = vpack.c.bf16 %v819_v8, %v815_v7  ;;  %v4035_v22 = vpack.c.bf16 %v816_v13, %v812_v12  ;;  %v4563_v8 = vpack.c.bf16 %v850_v2, %v846_v0  ;;  %v897_v0 = vld [vmem:[#allocation2 + $0x12a8] sm:$0xff]  ;;  %v899_v2 = vld [vmem:[#allocation2 + $0x12b8] sm:$0xff] }
 0x233   :  { %4526 = vmatprep.subr.bf16.mxu1 %v4525_v19  ;;  %v823_v19 = vld [vmem:[#allocation2 + $0x1058] sm:$0xff]  ;;  %v4547_v23 = vpack.c.bf16 %v818_v16, %v814_v14  ;;  %v854_v12 = vld [vmem:[#allocation2 + $0x1150] sm:$0xff]  ;;  %v4565_v13 = vpack.c.bf16 %v859_v6, %v855_v5  ;;  %v865_v16 = vld [vmem:[#allocation2 + $0x11a8] sm:$0xff] }
 0x234   :  { %v4549_v28 = vpack.c.bf16 %v827_v20, %v823_v19  ;;  %v858_v14 = vld [vmem:[#allocation2 + $0x1170] sm:$0xff]  ;;  %v892_v6 = vld [vmem:[#allocation2 + $0x1280] sm:$0xff] }
 0x235   :  { %4016 = vmatpush1.bf16.msra.mxu0 %v4015_v25  ;;  %v820_v25 = vld [vmem:[#allocation2 + $0x1040] sm:$0xff]  ;;  %v4567_v20 = vpack.c.bf16 %v858_v14, %v854_v12  ;;  %v905_v12 = vld [vmem:[#allocation2 + $0x12e8] sm:$0xff]  ;;  %v907_v14 = vld [vmem:[#allocation2 + $0x12f8] sm:$0xff] }
 0x236   :  { %4528 = vmatpush1.bf16.msra.mxu1 %v4527_v26  ;;  %4018 = vmatprep.subr.bf16.mxu0 %v4017_v27  ;;  %v824_v26 = vld [vmem:[#allocation2 + $0x1060] sm:$0xff]  ;;  %v822_v27 = vld [vmem:[#allocation2 + $0x1050] sm:$0xff] }
 0x237   :  { %4530 = vmatprep.subr.bf16.mxu1 %v4529_v31  ;;  %v833_v31 = vld [vmem:[#allocation2 + $0x10a8] sm:$0xff]  ;;  %v4039_v35 = vpack.c.bf16 %v824_v26, %v820_v25  ;;  %v4551_v36 = vpack.c.bf16 %v826_v29, %v822_v27  ;;  %v4569_v25 = vpack.c.bf16 %v867_v18, %v863_v17  ;;  %v866_v26 = vld [vmem:[#allocation2 + $0x11b0] sm:$0xff]  ;;  %v871_v29 = vld [vmem:[#allocation2 + $0x11d8] sm:$0xff] }
 0x238   :  { %v869_v27 = vld [vmem:[#allocation2 + $0x11c8] sm:$0xff]  ;;  %v900_v18 = vld [vmem:[#allocation2 + $0x12c0] sm:$0xff] }
 0x239   :  { %4020 = vmatpush1.bf16.msra.mxu0 %v4019_v37  ;;  %v4041_v37 = vpack.c.bf16 %v833_v31, %v829_v30  ;;  %v875_v30 = vld [vmem:[#allocation2 + $0x11f8] sm:$0xff] }
 0x23a   :  { %4532 = vmatpush1.bf16.msra.mxu1 %v4531_v38  ;;  %4022 = vmatprep.subr.bf16.mxu0 %v4021_v39  ;;  %v828_v38 = vld [vmem:[#allocation2 + $0x1080] sm:$0xff] }
 0x23b   :  { %4534 = vmatprep.subr.bf16.mxu1 %v4533_v43  ;;  %v832_v39 = vld [vmem:[#allocation2 + $0x10a0] sm:$0xff]  ;;  %v837_v43 = vld [vmem:[#allocation2 + $0x10c8] sm:$0xff] }
 0x23c   :  { %v4043_v47 = vpack.c.bf16 %v832_v39, %v828_v38  ;;  %v874_v38 = vld [vmem:[#allocation2 + $0x11f0] sm:$0xff]  ;;  %v877_v39 = vld [vmem:[#allocation2 + $0x1208] sm:$0xff] }
 0x23d   :  { %4024 = vmatpush1.bf16.msra.mxu0 %v4023_v49  ;;  %v4045_v49 = vpack.c.bf16 %v841_v44, %v837_v43  ;;  %v4065_v45 = vpack.c.bf16 %v881_v40, %v877_v39 }
 0x23e   :  { %4536 = vmatpush1.bf16.msra.mxu1 %v4535_v50  ;;  %4026 = vmatprep.subr.bf16.mxu0 %v4025_v51  ;;  %v836_v50 = vld [vmem:[#allocation2 + $0x10c0] sm:$0xff] }
 0x23f   :  { %4538 = vmatprep.subr.bf16.mxu1 %v4537_v55  ;;  %v840_v51 = vld [vmem:[#allocation2 + $0x10e0] sm:$0xff]  ;;  %v845_v55 = vld [vmem:[#allocation2 + $0x1108] sm:$0xff] }
 0x240   :  { %v4047_v59 = vpack.c.bf16 %v840_v51, %v836_v50  ;;  %v882_v50 = vld [vmem:[#allocation2 + $0x1230] sm:$0xff]  ;;  %v885_v51 = vld [vmem:[#allocation2 + $0x1248] sm:$0xff] }
 0x241   :  { %4028 = vmatpush1.bf16.msra.mxu0 %v4027_v61  ;;  %v4049_v61 = vpack.c.bf16 %v849_v56, %v845_v55  ;;  %v4069_v57 = vpack.c.bf16 %v889_v52, %v885_v51 }
 0x242   :  { %4540 = vmatpush1.bf16.msra.mxu1 %v4539_v62  ;;  %4030 = vmatprep.subr.bf16.mxu0 %v4029_v63  ;;  %v844_v62 = vld [vmem:[#allocation2 + $0x1100] sm:$0xff] }
 0x243   :  { %4542 = vmatprep.subr.bf16.mxu1 %v4541_v3  ;;  %v848_v63 = vld [vmem:[#allocation2 + $0x1120] sm:$0xff]  ;;  %v853_v3 = vld [vmem:[#allocation2 + $0x1148] sm:$0xff] }
 0x244   :  { %v4051_v7 = vpack.c.bf16 %v848_v63, %v844_v62  ;;  %v890_v62 = vld [vmem:[#allocation2 + $0x1270] sm:$0xff]  ;;  %v893_v63 = vld [vmem:[#allocation2 + $0x1288] sm:$0xff] }
 0x245   :  { %4032 = vmatpush1.bf16.msra.mxu0 %v4031_v9  ;;  %v4053_v9 = vpack.c.bf16 %v857_v4, %v853_v3  ;;  %v4073_v5 = vpack.c.bf16 %v897_v0, %v893_v63 }
 0x246   :  { %4544 = vmatpush1.bf16.msra.mxu1 %v4543_v10  ;;  %4034 = vmatprep.subr.bf16.mxu0 %v4033_v11  ;;  %v852_v10 = vld [vmem:[#allocation2 + $0x1140] sm:$0xff] }
 0x247   :  { %4546 = vmatprep.subr.bf16.mxu1 %v4545_v15  ;;  %v856_v11 = vld [vmem:[#allocation2 + $0x1160] sm:$0xff]  ;;  %v861_v15 = vld [vmem:[#allocation2 + $0x1188] sm:$0xff] }
 0x248   :  { %1624 = vmatmul.mubr.f32.vlgmr.msra.gmra.mrb[0].mxu0 %v290_v21  ;;  %v4055_v19 = vpack.c.bf16 %v856_v11, %v852_v10  ;;  %v898_v10 = vld [vmem:[#allocation2 + $0x12b0] sm:$0xff]  ;;  %v901_v11 = vld [vmem:[#allocation2 + $0x12c8] sm:$0xff] }
 0x249   :  { %4036 = vmatpush1.bf16.msra.mxu0 %v4035_v22  ;;  %2192 = vmatmul.mubr.f32.vlgmr.msra.gmra.mrb[0].mxu1 %v290_v21  ;;  %v4057_v21 = vpack.c.bf16 %v865_v16, %v861_v15  ;;  %v860_v22 = vld [vmem:[#allocation2 + $0x1180] sm:$0xff]  ;;  %v4077_v17 = vpack.c.bf16 %v905_v12, %v901_v11 }
 0x24a   :  { %4548 = vmatpush1.bf16.msra.mxu1 %v4547_v23  ;;  %4038 = vmatprep.subr.bf16.mxu0 %v4037_v24  ;;  %v864_v23 = vld [vmem:[#allocation2 + $0x11a0] sm:$0xff]  ;;  %v862_v24 = vld [vmem:[#allocation2 + $0x1190] sm:$0xff] }
 0x24b   :  { %4550 = vmatprep.subr.bf16.mxu1 %v4549_v28  ;;  %1694 = vmatprep.mubr.f32.mxu0 %v293_v34  ;;  %v873_v28 = vld [vmem:[#allocation2 + $0x11e8] sm:$0xff]  ;;  %v4059_v31 = vpack.c.bf16 %v864_v23, %v860_v22  ;;  %v4571_v32 = vpack.c.bf16 %v866_v26, %v862_v24  ;;  %v906_v22 = vld [vmem:[#allocation2 + $0x12f0] sm:$0xff]  ;;  %v915_v26 = vld [vmem:[#allocation2 + $0x1338] sm:$0xff] }
 0x24c   :  { %2262 = vmatprep.mubr.f32.mxu1 %v293_v34  ;;  %v4061_v33 = vpack.c.bf16 %v873_v28, %v869_v27  ;;  %v868_v34 = vld [vmem:[#allocation2 + $0x11c0] sm:$0xff]  ;;  %v909_v23 = vld [vmem:[#allocation2 + $0x1308] sm:$0xff] }
 0x24d   :  { %4040 = vmatpush1.bf16.msra.mxu0 %v4039_v35  ;;  %v872_v35 = vld [vmem:[#allocation2 + $0x11e0] sm:$0xff]  ;;  %v913_v24 = vld [vmem:[#allocation2 + $0x1328] sm:$0xff] }
 0x24e   :  { %4552 = vmatpush1.bf16.msra.mxu1 %v4551_v36  ;;  %4042 = vmatprep.subr.bf16.mxu0 %v4041_v37  ;;  %v870_v36 = vld [vmem:[#allocation2 + $0x11d0] sm:$0xff]  ;;  %v4573_v37 = vpack.c.bf16 %v875_v30, %v871_v29  ;;  %v4063_v43 = vpack.c.bf16 %v872_v35, %v868_v34  ;;  %v4081_v29 = vpack.c.bf16 %v913_v24, %v909_v23  ;;  %v908_v30 = vld [vmem:[#allocation2 + $0x1300] sm:$0xff]  ;;  %v917_v35 = vld [vmem:[#allocation2 + $0x1348] sm:$0xff] }
 0x24f   :  { %4554 = vmatprep.subr.bf16.mxu1 %v4553_v41  ;;  %v879_v41 = vld [vmem:[#allocation2 + $0x1218] sm:$0xff]  ;;  %v4575_v44 = vpack.c.bf16 %v874_v38, %v870_v36  ;;  %v914_v34 = vld [vmem:[#allocation2 + $0x1330] sm:$0xff]  ;;  %v921_v36 = vld [vmem:[#allocation2 + $0x1368] sm:$0xff] }
 0x250   :  { %v923_v38 = vld [vmem:[#allocation2 + $0x1378] sm:$0xff]  ;;  %v292_v23 = vld [vmem:[%s5992_s4 + $0x40] sm:$0xff] }
 0x251   :  { %4044 = vmatpush1.bf16.msra.mxu0 %v4043_v47  ;;  %v880_v47 = vld [vmem:[#allocation2 + $0x1220] sm:$0xff] }
 0x252   :  { %4556 = vmatpush1.bf16.msra.mxu1 %v4555_v48  ;;  %4046 = vmatprep.subr.bf16.mxu0 %v4045_v49  ;;  %v878_v48 = vld [vmem:[#allocation2 + $0x1210] sm:$0xff]  ;;  %v4577_v49 = vpack.c.bf16 %v883_v42, %v879_v41  ;;  %v4067_v55 = vpack.c.bf16 %v880_v47, %v876_v46  ;;  %v4085_v41 = vpack.c.bf16 %v921_v36, %v917_v35  ;;  %v916_v42 = vld [vmem:[#allocation2 + $0x1340] sm:$0xff]  ;;  %v925_v47 = vld [vmem:[#allocation2 + $0x1388] sm:$0xff] }
 0x253   :  { %4558 = vmatprep.subr.bf16.mxu1 %v4557_v53  ;;  %v887_v53 = vld [vmem:[#allocation2 + $0x1258] sm:$0xff]  ;;  %v4579_v56 = vpack.c.bf16 %v882_v50, %v878_v48  ;;  %v922_v46 = vld [vmem:[#allocation2 + $0x1370] sm:$0xff]  ;;  %v929_v48 = vld [vmem:[#allocation2 + $0x13a8] sm:$0xff] }
 0x254   :  { %v931_v50 = vld [vmem:[#allocation2 + $0x13b8] sm:$0xff] }
 0x255   :  { %4048 = vmatpush1.bf16.msra.mxu0 %v4047_v59  ;;  %v888_v59 = vld [vmem:[#allocation2 + $0x1260] sm:$0xff]  ;;  %v963_v35 = vld [vmem:[#allocation2 + $0x14b8] sm:$0xff] }
 0x256   :  { %4560 = vmatpush1.bf16.msra.mxu1 %v4559_v60  ;;  %4050 = vmatprep.subr.bf16.mxu0 %v4049_v61  ;;  %v886_v60 = vld [vmem:[#allocation2 + $0x1250] sm:$0xff]  ;;  %v4581_v61 = vpack.c.bf16 %v891_v54, %v887_v53  ;;  %v4071_v3 = vpack.c.bf16 %v888_v59, %v884_v58  ;;  %v4089_v53 = vpack.c.bf16 %v929_v48, %v925_v47  ;;  %v924_v54 = vld [vmem:[#allocation2 + $0x1380] sm:$0xff]  ;;  %v933_v59 = vld [vmem:[#allocation2 + $0x13c8] sm:$0xff] }
 0x257   :  { %4562 = vmatprep.subr.bf16.mxu1 %v4561_v1  ;;  %v895_v1 = vld [vmem:[#allocation2 + $0x1298] sm:$0xff]  ;;  %v4583_v4 = vpack.c.bf16 %v890_v62, %v886_v60  ;;  %v930_v58 = vld [vmem:[#allocation2 + $0x13b0] sm:$0xff]  ;;  %v937_v60 = vld [vmem:[#allocation2 + $0x13e8] sm:$0xff] }
 0x258   :  { %v939_v62 = vld [vmem:[#allocation2 + $0x13f8] sm:$0xff] }
 0x259   :  { %4052 = vmatpush1.bf16.msra.mxu0 %v4051_v7  ;;  %v896_v7 = vld [vmem:[#allocation2 + $0x12a0] sm:$0xff]  ;;  %v295_v36 = vld [vmem:[%s5992_s4 + $0x58] sm:$0xff] }
 0x25a   :  { %4564 = vmatpush1.bf16.msra.mxu1 %v4563_v8  ;;  %4054 = vmatprep.subr.bf16.mxu0 %v4053_v9  ;;  %v894_v8 = vld [vmem:[#allocation2 + $0x1290] sm:$0xff]  ;;  %v4585_v9 = vpack.c.bf16 %v899_v2, %v895_v1  ;;  %v4075_v15 = vpack.c.bf16 %v896_v7, %v892_v6  ;;  %v4093_v1 = vpack.c.bf16 %v937_v60, %v933_v59  ;;  %v932_v2 = vld [vmem:[#allocation2 + $0x13c0] sm:$0xff]  ;;  %v941_v7 = vld [vmem:[#allocation2 + $0x1408] sm:$0xff] }
 0x25b   :  { %4566 = vmatprep.subr.bf16.mxu1 %v4565_v13  ;;  %v903_v13 = vld [vmem:[#allocation2 + $0x12d8] sm:$0xff]  ;;  %v4587_v16 = vpack.c.bf16 %v898_v10, %v894_v8  ;;  %v938_v6 = vld [vmem:[#allocation2 + $0x13f0] sm:$0xff]  ;;  %v945_v8 = vld [vmem:[#allocation2 + $0x1428] sm:$0xff] }
 0x25c   :  { %v947_v10 = vld [vmem:[#allocation2 + $0x1438] sm:$0xff] }
 0x25d   :  { %4056 = vmatpush1.bf16.msra.mxu0 %v4055_v19  ;;  %v904_v19 = vld [vmem:[#allocation2 + $0x12e0] sm:$0xff]  ;;  %v967_v47 = vld [vmem:[#allocation2 + $0x14d8] sm:$0xff] }
 0x25e   :  { %4568 = vmatpush1.bf16.msra.mxu1 %v4567_v20  ;;  %4058 = vmatprep.subr.bf16.mxu0 %v4057_v21  ;;  %v902_v20 = vld [vmem:[#allocation2 + $0x12d0] sm:$0xff]  ;;  %v4589_v21 = vpack.c.bf16 %v907_v14, %v903_v13  ;;  %v4079_v27 = vpack.c.bf16 %v904_v19, %v900_v18  ;;  %v4097_v13 = vpack.c.bf16 %v945_v8, %v941_v7  ;;  %v940_v14 = vld [vmem:[#allocation2 + $0x1400] sm:$0xff]  ;;  %v949_v19 = vld [vmem:[#allocation2 + $0x1448] sm:$0xff] }
 0x25f   :  { %4570 = vmatprep.subr.bf16.mxu1 %v4569_v25  ;;  %v911_v25 = vld [vmem:[#allocation2 + $0x1318] sm:$0xff]  ;;  %v4591_v28 = vpack.c.bf16 %v906_v22, %v902_v20  ;;  %v946_v18 = vld [vmem:[#allocation2 + $0x1430] sm:$0xff]  ;;  %v953_v20 = vld [vmem:[#allocation2 + $0x1468] sm:$0xff] }
 0x260   :  { %v955_v22 = vld [vmem:[#allocation2 + $0x1478] sm:$0xff] }
 0x261   :  { %4060 = vmatpush1.bf16.msra.mxu0 %v4059_v31  ;;  %v912_v31 = vld [vmem:[#allocation2 + $0x1320] sm:$0xff]  ;;  %v971_v48 = vld [vmem:[#allocation2 + $0x14f8] sm:$0xff] }
 0x262   :  { %4572 = vmatpush1.bf16.msra.mxu1 %v4571_v32  ;;  %4062 = vmatprep.subr.bf16.mxu0 %v4061_v33  ;;  %v910_v32 = vld [vmem:[#allocation2 + $0x1310] sm:$0xff]  ;;  %v4593_v33 = vpack.c.bf16 %v915_v26, %v911_v25  ;;  %v4083_v39 = vpack.c.bf16 %v912_v31, %v908_v30  ;;  %v4101_v26 = vpack.c.bf16 %v953_v20, %v949_v19  ;;  %v975_v59 = vld [vmem:[#allocation2 + $0x1518] sm:$0xff] }
 0x263   :  { %4574 = vmatprep.subr.bf16.mxu1 %v4573_v37  ;;  %v919_v37 = vld [vmem:[#allocation2 + $0x1358] sm:$0xff]  ;;  %v4595_v40 = vpack.c.bf16 %v914_v34, %v910_v32  ;;  %v954_v31 = vld [vmem:[#allocation2 + $0x1470] sm:$0xff]  ;;  %v957_v32 = vld [vmem:[#allocation2 + $0x1488] sm:$0xff] }
 0x264   :  { %v959_v34 = vld [vmem:[#allocation2 + $0x1498] sm:$0xff] }
 0x265   :  { %4064 = vmatpush1.bf16.msra.mxu0 %v4063_v43  ;;  %v920_v43 = vld [vmem:[#allocation2 + $0x1360] sm:$0xff]  ;;  %v979_v60 = vld [vmem:[#allocation2 + $0x1538] sm:$0xff] }
 0x266   :  { %4576 = vmatpush1.bf16.msra.mxu1 %v4575_v44  ;;  %4066 = vmatprep.subr.bf16.mxu0 %v4065_v45  ;;  %v918_v44 = vld [vmem:[#allocation2 + $0x1350] sm:$0xff]  ;;  %v4597_v45 = vpack.c.bf16 %v923_v38, %v919_v37  ;;  %v4087_v51 = vpack.c.bf16 %v920_v43, %v916_v42  ;;  %v4617_v43 = vpack.c.bf16 %v963_v35, %v959_v34  ;;  %v983_v7 = vld [vmem:[#allocation2 + $0x1558] sm:$0xff] }
 0x267   :  { %4578 = vmatprep.subr.bf16.mxu1 %v4577_v49  ;;  %v927_v49 = vld [vmem:[#allocation2 + $0x1398] sm:$0xff]  ;;  %v4599_v52 = vpack.c.bf16 %v922_v46, %v918_v44  ;;  %v958_v42 = vld [vmem:[#allocation2 + $0x1490] sm:$0xff]  ;;  %v969_v46 = vld [vmem:[#allocation2 + $0x14e8] sm:$0xff] }
 0x268   :  { %v962_v44 = vld [vmem:[#allocation2 + $0x14b0] sm:$0xff]  ;;  %v987_v8 = vld [vmem:[#allocation2 + $0x1578] sm:$0xff] }
 0x269   :  { %4068 = vmatpush1.bf16.msra.mxu0 %v4067_v55  ;;  %v928_v55 = vld [vmem:[#allocation2 + $0x13a0] sm:$0xff]  ;;  %v991_v19 = vld [vmem:[#allocation2 + $0x1598] sm:$0xff] }
 0x26a   :  { %4580 = vmatpush1.bf16.msra.mxu1 %v4579_v56  ;;  %4070 = vmatprep.subr.bf16.mxu0 %v4069_v57  ;;  %v926_v56 = vld [vmem:[#allocation2 + $0x1390] sm:$0xff]  ;;  %v4601_v57 = vpack.c.bf16 %v931_v50, %v927_v49  ;;  %v4091_v63 = vpack.c.bf16 %v928_v55, %v924_v54  ;;  %v4619_v50 = vpack.c.bf16 %v962_v44, %v958_v42  ;;  %v995_v20 = vld [vmem:[#allocation2 + $0x15b8] sm:$0xff]  ;;  %v1009_v42 = vld [vmem:[#allocation2 + $0x1628] sm:$0xff] }
 0x26b   :  { %4582 = vmatprep.subr.bf16.mxu1 %v4581_v61  ;;  %v935_v61 = vld [vmem:[#allocation2 + $0x13d8] sm:$0xff]  ;;  %v4603_v0 = vpack.c.bf16 %v930_v58, %v926_v56  ;;  %v966_v54 = vld [vmem:[#allocation2 + $0x14d0] sm:$0xff]  ;;  %v4621_v55 = vpack.c.bf16 %v971_v48, %v967_v47  ;;  %v977_v58 = vld [vmem:[#allocation2 + $0x1528] sm:$0xff] }
 0x26c   :  { %v970_v56 = vld [vmem:[#allocation2 + $0x14f0] sm:$0xff]  ;;  %v1011_v44 = vld [vmem:[#allocation2 + $0x1638] sm:$0xff]  ;;  %v1004_v48 = vld [vmem:[#allocation2 + $0x1600] sm:$0xff] }
 0x26d   :  { %4072 = vmatpush1.bf16.msra.mxu0 %v4071_v3  ;;  %v936_v3 = vld [vmem:[#allocation2 + $0x13e0] sm:$0xff] }
 0x26e   :  { %4584 = vmatpush1.bf16.msra.mxu1 %v4583_v4  ;;  %4074 = vmatprep.subr.bf16.mxu0 %v4073_v5  ;;  %v934_v4 = vld [vmem:[#allocation2 + $0x13d0] sm:$0xff]  ;;  %v4605_v5 = vpack.c.bf16 %v939_v62, %v935_v61  ;;  %v4095_v11 = vpack.c.bf16 %v936_v3, %v932_v2  ;;  %v4623_v62 = vpack.c.bf16 %v970_v56, %v966_v54  ;;  %v1017_v54 = vld [vmem:[#allocation2 + $0x1668] sm:$0xff]  ;;  %v1019_v56 = vld [vmem:[#allocation2 + $0x1678] sm:$0xff] }
 0x26f   :  { %4586 = vmatprep.subr.bf16.mxu1 %v4585_v9  ;;  %v943_v9 = vld [vmem:[#allocation2 + $0x1418] sm:$0xff]  ;;  %v4607_v12 = vpack.c.bf16 %v938_v6, %v934_v4  ;;  %v974_v2 = vld [vmem:[#allocation2 + $0x1510] sm:$0xff]  ;;  %v4625_v3 = vpack.c.bf16 %v979_v60, %v975_v59  ;;  %v985_v6 = vld [vmem:[#allocation2 + $0x1568] sm:$0xff] }
 0x270   :  { %v978_v4 = vld [vmem:[#allocation2 + $0x1530] sm:$0xff]  ;;  %v1012_v60 = vld [vmem:[#allocation2 + $0x1640] sm:$0xff] }
 0x271   :  { %4076 = vmatpush1.bf16.msra.mxu0 %v4075_v15  ;;  %v944_v15 = vld [vmem:[#allocation2 + $0x1420] sm:$0xff] }
 0x272   :  { %4588 = vmatpush1.bf16.msra.mxu1 %v4587_v16  ;;  %4078 = vmatprep.subr.bf16.mxu0 %v4077_v17  ;;  %v942_v16 = vld [vmem:[#allocation2 + $0x1410] sm:$0xff]  ;;  %v4609_v17 = vpack.c.bf16 %v947_v10, %v943_v9  ;;  %v4099_v24 = vpack.c.bf16 %v944_v15, %v940_v14  ;;  %v4627_v10 = vpack.c.bf16 %v978_v4, %v974_v2  ;;  %v1025_v2 = vld [vmem:[#allocation2 + $0x16a8] sm:$0xff]  ;;  %v1027_v4 = vld [vmem:[#allocation2 + $0x16b8] sm:$0xff] }
 0x273   :  { %4590 = vmatprep.subr.bf16.mxu1 %v4589_v21  ;;  %v951_v21 = vld [vmem:[#allocation2 + $0x1458] sm:$0xff]  ;;  %v4611_v25 = vpack.c.bf16 %v946_v18, %v942_v16  ;;  %v982_v14 = vld [vmem:[#allocation2 + $0x1550] sm:$0xff]  ;;  %v4629_v15 = vpack.c.bf16 %v987_v8, %v983_v7  ;;  %v993_v18 = vld [vmem:[#allocation2 + $0x15a8] sm:$0xff] }
 0x274   :  { %v4613_v30 = vpack.c.bf16 %v955_v22, %v951_v21  ;;  %v986_v16 = vld [vmem:[#allocation2 + $0x1570] sm:$0xff]  ;;  %v1020_v8 = vld [vmem:[#allocation2 + $0x1680] sm:$0xff] }
 0x275   :  { %4080 = vmatpush1.bf16.msra.mxu0 %v4079_v27  ;;  %v948_v27 = vld [vmem:[#allocation2 + $0x1440] sm:$0xff]  ;;  %v4631_v22 = vpack.c.bf16 %v986_v16, %v982_v14  ;;  %v1033_v14 = vld [vmem:[#allocation2 + $0x16e8] sm:$0xff]  ;;  %v1035_v16 = vld [vmem:[#allocation2 + $0x16f8] sm:$0xff] }
 0x276   :  { %4592 = vmatpush1.bf16.msra.mxu1 %v4591_v28  ;;  %4082 = vmatprep.subr.bf16.mxu0 %v4081_v29  ;;  %v952_v28 = vld [vmem:[#allocation2 + $0x1460] sm:$0xff]  ;;  %v950_v29 = vld [vmem:[#allocation2 + $0x1450] sm:$0xff] }
 0x277   :  { %4594 = vmatprep.subr.bf16.mxu1 %v4593_v33  ;;  %v961_v33 = vld [vmem:[#allocation2 + $0x14a8] sm:$0xff]  ;;  %v4103_v37 = vpack.c.bf16 %v952_v28, %v948_v27  ;;  %v4615_v38 = vpack.c.bf16 %v954_v31, %v950_v29  ;;  %v4633_v27 = vpack.c.bf16 %v995_v20, %v991_v19  ;;  %v994_v28 = vld [vmem:[#allocation2 + $0x15b0] sm:$0xff]  ;;  %v999_v31 = vld [vmem:[#allocation2 + $0x15d8] sm:$0xff] }
 0x278   :  { %v997_v29 = vld [vmem:[#allocation2 + $0x15c8] sm:$0xff]  ;;  %v1028_v20 = vld [vmem:[#allocation2 + $0x16c0] sm:$0xff] }
 0x279   :  { %4084 = vmatpush1.bf16.msra.mxu0 %v4083_v39  ;;  %v4105_v39 = vpack.c.bf16 %v961_v33, %v957_v32  ;;  %v1003_v32 = vld [vmem:[#allocation2 + $0x15f8] sm:$0xff] }
 0x27a   :  { %4596 = vmatpush1.bf16.msra.mxu1 %v4595_v40  ;;  %4086 = vmatprep.subr.bf16.mxu0 %v4085_v41  ;;  %v956_v40 = vld [vmem:[#allocation2 + $0x1480] sm:$0xff] }
 0x27b   :  { %4598 = vmatprep.subr.bf16.mxu1 %v4597_v45  ;;  %v960_v41 = vld [vmem:[#allocation2 + $0x14a0] sm:$0xff]  ;;  %v965_v45 = vld [vmem:[#allocation2 + $0x14c8] sm:$0xff] }
 0x27c   :  { %v4107_v49 = vpack.c.bf16 %v960_v41, %v956_v40  ;;  %v1002_v40 = vld [vmem:[#allocation2 + $0x15f0] sm:$0xff]  ;;  %v1005_v41 = vld [vmem:[#allocation2 + $0x1608] sm:$0xff] }
 0x27d   :  { %4088 = vmatpush1.bf16.msra.mxu0 %v4087_v51  ;;  %v4109_v51 = vpack.c.bf16 %v969_v46, %v965_v45  ;;  %v4129_v47 = vpack.c.bf16 %v1009_v42, %v1005_v41 }
 0x27e   :  { %4600 = vmatpush1.bf16.msra.mxu1 %v4599_v52  ;;  %4090 = vmatprep.subr.bf16.mxu0 %v4089_v53  ;;  %v964_v52 = vld [vmem:[#allocation2 + $0x14c0] sm:$0xff] }
 0x27f   :  { %4602 = vmatprep.subr.bf16.mxu1 %v4601_v57  ;;  %v968_v53 = vld [vmem:[#allocation2 + $0x14e0] sm:$0xff]  ;;  %v973_v57 = vld [vmem:[#allocation2 + $0x1508] sm:$0xff] }
 0x280   :  { %v4111_v61 = vpack.c.bf16 %v968_v53, %v964_v52  ;;  %v1010_v52 = vld [vmem:[#allocation2 + $0x1630] sm:$0xff]  ;;  %v1013_v53 = vld [vmem:[#allocation2 + $0x1648] sm:$0xff] }
 0x281   :  { %4092 = vmatpush1.bf16.msra.mxu0 %v4091_v63  ;;  %v4113_v63 = vpack.c.bf16 %v977_v58, %v973_v57  ;;  %v4133_v59 = vpack.c.bf16 %v1017_v54, %v1013_v53 }
 0x282   :  { %4604 = vmatpush1.bf16.msra.mxu1 %v4603_v0  ;;  %4094 = vmatprep.subr.bf16.mxu0 %v4093_v1  ;;  %v972_v0 = vld [vmem:[#allocation2 + $0x1500] sm:$0xff] }
 0x283   :  { %4606 = vmatprep.subr.bf16.mxu1 %v4605_v5  ;;  %v976_v1 = vld [vmem:[#allocation2 + $0x1520] sm:$0xff]  ;;  %v981_v5 = vld [vmem:[#allocation2 + $0x1548] sm:$0xff] }
 0x284   :  { %v4115_v9 = vpack.c.bf16 %v976_v1, %v972_v0  ;;  %v1018_v0 = vld [vmem:[#allocation2 + $0x1670] sm:$0xff]  ;;  %v1021_v1 = vld [vmem:[#allocation2 + $0x1688] sm:$0xff] }
 0x285   :  { %4096 = vmatpush1.bf16.msra.mxu0 %v4095_v11  ;;  %v4117_v11 = vpack.c.bf16 %v985_v6, %v981_v5  ;;  %v4137_v7 = vpack.c.bf16 %v1025_v2, %v1021_v1 }
 0x286   :  { %4608 = vmatpush1.bf16.msra.mxu1 %v4607_v12  ;;  %4098 = vmatprep.subr.bf16.mxu0 %v4097_v13  ;;  %v980_v12 = vld [vmem:[#allocation2 + $0x1540] sm:$0xff] }
 0x287   :  { %4610 = vmatprep.subr.bf16.mxu1 %v4609_v17  ;;  %v984_v13 = vld [vmem:[#allocation2 + $0x1560] sm:$0xff]  ;;  %v989_v17 = vld [vmem:[#allocation2 + $0x1588] sm:$0xff] }
 0x288   :  { %1695 = vmatmul.mubr.f32.vlgmr.msra.gmra.mrb[0].mxu0 %v292_v23  ;;  %v4119_v21 = vpack.c.bf16 %v984_v13, %v980_v12  ;;  %v1026_v12 = vld [vmem:[#allocation2 + $0x16b0] sm:$0xff]  ;;  %v1029_v13 = vld [vmem:[#allocation2 + $0x16c8] sm:$0xff] }
 0x289   :  { %4100 = vmatpush1.bf16.msra.mxu0 %v4099_v24  ;;  %2263 = vmatmul.mubr.f32.vlgmr.msra.gmra.mrb[0].mxu1 %v292_v23  ;;  %v4121_v23 = vpack.c.bf16 %v993_v18, %v989_v17  ;;  %v988_v24 = vld [vmem:[#allocation2 + $0x1580] sm:$0xff]  ;;  %v4141_v19 = vpack.c.bf16 %v1033_v14, %v1029_v13 }
 0x28a   :  { %4612 = vmatpush1.bf16.msra.mxu1 %v4611_v25  ;;  %4102 = vmatprep.subr.bf16.mxu0 %v4101_v26  ;;  %v992_v25 = vld [vmem:[#allocation2 + $0x15a0] sm:$0xff]  ;;  %v990_v26 = vld [vmem:[#allocation2 + $0x1590] sm:$0xff] }
 0x28b   :  { %4614 = vmatprep.subr.bf16.mxu1 %v4613_v30  ;;  %1765 = vmatprep.mubr.f32.mxu0 %v295_v36  ;;  %v1001_v30 = vld [vmem:[#allocation2 + $0x15e8] sm:$0xff]  ;;  %v4123_v33 = vpack.c.bf16 %v992_v25, %v988_v24  ;;  %v4635_v34 = vpack.c.bf16 %v994_v28, %v990_v26  ;;  %v1034_v24 = vld [vmem:[#allocation2 + $0x16f0] sm:$0xff]  ;;  %v1043_v28 = vld [vmem:[#allocation2 + $0x1738] sm:$0xff] }
 0x28c   :  { %2333 = vmatprep.mubr.f32.mxu1 %v295_v36  ;;  %v4125_v35 = vpack.c.bf16 %v1001_v30, %v997_v29  ;;  %v996_v36 = vld [vmem:[#allocation2 + $0x15c0] sm:$0xff]  ;;  %v1037_v25 = vld [vmem:[#allocation2 + $0x1708] sm:$0xff] }
 0x28d   :  { %4104 = vmatpush1.bf16.msra.mxu0 %v4103_v37  ;;  %v1000_v37 = vld [vmem:[#allocation2 + $0x15e0] sm:$0xff]  ;;  %v1041_v26 = vld [vmem:[#allocation2 + $0x1728] sm:$0xff] }
 0x28e   :  { %4616 = vmatpush1.bf16.msra.mxu1 %v4615_v38  ;;  %4106 = vmatprep.subr.bf16.mxu0 %v4105_v39  ;;  %v998_v38 = vld [vmem:[#allocation2 + $0x15d0] sm:$0xff]  ;;  %v4637_v39 = vpack.c.bf16 %v1003_v32, %v999_v31  ;;  %v4127_v45 = vpack.c.bf16 %v1000_v37, %v996_v36  ;;  %v4145_v31 = vpack.c.bf16 %v1041_v26, %v1037_v25  ;;  %v1036_v32 = vld [vmem:[#allocation2 + $0x1700] sm:$0xff]  ;;  %v1045_v37 = vld [vmem:[#allocation2 + $0x1748] sm:$0xff] }
 0x28f   :  { %4618 = vmatprep.subr.bf16.mxu1 %v4617_v43  ;;  %v1007_v43 = vld [vmem:[#allocation2 + $0x1618] sm:$0xff]  ;;  %v4639_v46 = vpack.c.bf16 %v1002_v40, %v998_v38  ;;  %v1042_v36 = vld [vmem:[#allocation2 + $0x1730] sm:$0xff]  ;;  %v1049_v38 = vld [vmem:[#allocation2 + $0x1768] sm:$0xff] }
 0x290   :  { %v1051_v40 = vld [vmem:[#allocation2 + $0x1778] sm:$0xff]  ;;  %v294_v25 = vld [vmem:[%s5992_s4 + $0x50] sm:$0xff] }
 0x291   :  { %4108 = vmatpush1.bf16.msra.mxu0 %v4107_v49  ;;  %v1008_v49 = vld [vmem:[#allocation2 + $0x1620] sm:$0xff] }
 0x292   :  { %4620 = vmatpush1.bf16.msra.mxu1 %v4619_v50  ;;  %4110 = vmatprep.subr.bf16.mxu0 %v4109_v51  ;;  %v1006_v50 = vld [vmem:[#allocation2 + $0x1610] sm:$0xff]  ;;  %v4641_v51 = vpack.c.bf16 %v1011_v44, %v1007_v43  ;;  %v4131_v57 = vpack.c.bf16 %v1008_v49, %v1004_v48  ;;  %v4149_v43 = vpack.c.bf16 %v1049_v38, %v1045_v37  ;;  %v1044_v44 = vld [vmem:[#allocation2 + $0x1740] sm:$0xff]  ;;  %v1053_v49 = vld [vmem:[#allocation2 + $0x1788] sm:$0xff] }
 0x293   :  { %4622 = vmatprep.subr.bf16.mxu1 %v4621_v55  ;;  %v1015_v55 = vld [vmem:[#allocation2 + $0x1658] sm:$0xff]  ;;  %v4643_v58 = vpack.c.bf16 %v1010_v52, %v1006_v50  ;;  %v1050_v48 = vld [vmem:[#allocation2 + $0x1770] sm:$0xff]  ;;  %v1057_v50 = vld [vmem:[#allocation2 + $0x17a8] sm:$0xff] }
 0x294   :  { %v1059_v52 = vld [vmem:[#allocation2 + $0x17b8] sm:$0xff]  ;;  %v297_v38 = vld [vmem:[%s5992_s4 + $0x68] sm:$0xff] }
 0x295   :  { %4112 = vmatpush1.bf16.msra.mxu0 %v4111_v61  ;;  %v1016_v61 = vld [vmem:[#allocation2 + $0x1660] sm:$0xff]  ;;  %v1091_v37 = vld [vmem:[#allocation2 + $0x18b8] sm:$0xff] }
 0x296   :  { %4624 = vmatpush1.bf16.msra.mxu1 %v4623_v62  ;;  %4114 = vmatprep.subr.bf16.mxu0 %v4113_v63  ;;  %v1014_v62 = vld [vmem:[#allocation2 + $0x1650] sm:$0xff]  ;;  %v4645_v63 = vpack.c.bf16 %v1019_v56, %v1015_v55  ;;  %v4135_v5 = vpack.c.bf16 %v1016_v61, %v1012_v60  ;;  %v4153_v55 = vpack.c.bf16 %v1057_v50, %v1053_v49  ;;  %v1052_v56 = vld [vmem:[#allocation2 + $0x1780] sm:$0xff]  ;;  %v1061_v61 = vld [vmem:[#allocation2 + $0x17c8] sm:$0xff] }
 0x297   :  { %4626 = vmatprep.subr.bf16.mxu1 %v4625_v3  ;;  %v1023_v3 = vld [vmem:[#allocation2 + $0x1698] sm:$0xff]  ;;  %v4647_v6 = vpack.c.bf16 %v1018_v0, %v1014_v62  ;;  %v1058_v60 = vld [vmem:[#allocation2 + $0x17b0] sm:$0xff]  ;;  %v1065_v62 = vld [vmem:[#allocation2 + $0x17e8] sm:$0xff] }
 0x298   :  { %v1067_v0 = vld [vmem:[#allocation2 + $0x17f8] sm:$0xff] }
 0x299   :  { %4116 = vmatpush1.bf16.msra.mxu0 %v4115_v9  ;;  %v1024_v9 = vld [vmem:[#allocation2 + $0x16a0] sm:$0xff]  ;;  %v1095_v49 = vld [vmem:[#allocation2 + $0x18d8] sm:$0xff] }
 0x29a   :  { %4628 = vmatpush1.bf16.msra.mxu1 %v4627_v10  ;;  %4118 = vmatprep.subr.bf16.mxu0 %v4117_v11  ;;  %v1022_v10 = vld [vmem:[#allocation2 + $0x1690] sm:$0xff]  ;;  %v4649_v11 = vpack.c.bf16 %v1027_v4, %v1023_v3  ;;  %v4139_v17 = vpack.c.bf16 %v1024_v9, %v1020_v8  ;;  %v4157_v3 = vpack.c.bf16 %v1065_v62, %v1061_v61  ;;  %v1060_v4 = vld [vmem:[#allocation2 + $0x17c0] sm:$0xff]  ;;  %v1069_v9 = vld [vmem:[#allocation2 + $0x1808] sm:$0xff] }
 0x29b   :  { %4630 = vmatprep.subr.bf16.mxu1 %v4629_v15  ;;  %v1031_v15 = vld [vmem:[#allocation2 + $0x16d8] sm:$0xff]  ;;  %v4651_v18 = vpack.c.bf16 %v1026_v12, %v1022_v10  ;;  %v1066_v8 = vld [vmem:[#allocation2 + $0x17f0] sm:$0xff]  ;;  %v1073_v10 = vld [vmem:[#allocation2 + $0x1828] sm:$0xff] }
 0x29c   :  { %v1075_v12 = vld [vmem:[#allocation2 + $0x1838] sm:$0xff] }
 0x29d   :  { %4120 = vmatpush1.bf16.msra.mxu0 %v4119_v21  ;;  %v1032_v21 = vld [vmem:[#allocation2 + $0x16e0] sm:$0xff]  ;;  %v1099_v50 = vld [vmem:[#allocation2 + $0x18f8] sm:$0xff] }
 0x29e   :  { %4632 = vmatpush1.bf16.msra.mxu1 %v4631_v22  ;;  %4122 = vmatprep.subr.bf16.mxu0 %v4121_v23  ;;  %v1030_v22 = vld [vmem:[#allocation2 + $0x16d0] sm:$0xff]  ;;  %v4653_v23 = vpack.c.bf16 %v1035_v16, %v1031_v15  ;;  %v4143_v29 = vpack.c.bf16 %v1032_v21, %v1028_v20  ;;  %v4161_v15 = vpack.c.bf16 %v1073_v10, %v1069_v9  ;;  %v1068_v16 = vld [vmem:[#allocation2 + $0x1800] sm:$0xff]  ;;  %v1077_v21 = vld [vmem:[#allocation2 + $0x1848] sm:$0xff] }
 0x29f   :  { %4634 = vmatprep.subr.bf16.mxu1 %v4633_v27  ;;  %v1039_v27 = vld [vmem:[#allocation2 + $0x1718] sm:$0xff]  ;;  %v4655_v30 = vpack.c.bf16 %v1034_v24, %v1030_v22  ;;  %v1074_v20 = vld [vmem:[#allocation2 + $0x1830] sm:$0xff]  ;;  %v1081_v22 = vld [vmem:[#allocation2 + $0x1868] sm:$0xff] }
 0x2a0   :  { %v1083_v24 = vld [vmem:[#allocation2 + $0x1878] sm:$0xff] }
 0x2a1   :  { %4124 = vmatpush1.bf16.msra.mxu0 %v4123_v33  ;;  %v1040_v33 = vld [vmem:[#allocation2 + $0x1720] sm:$0xff]  ;;  %v1103_v61 = vld [vmem:[#allocation2 + $0x1918] sm:$0xff] }
 0x2a2   :  { %4636 = vmatpush1.bf16.msra.mxu1 %v4635_v34  ;;  %4126 = vmatprep.subr.bf16.mxu0 %v4125_v35  ;;  %v1038_v34 = vld [vmem:[#allocation2 + $0x1710] sm:$0xff]  ;;  %v4657_v35 = vpack.c.bf16 %v1043_v28, %v1039_v27  ;;  %v4147_v41 = vpack.c.bf16 %v1040_v33, %v1036_v32  ;;  %v4165_v28 = vpack.c.bf16 %v1081_v22, %v1077_v21  ;;  %v1107_v62 = vld [vmem:[#allocation2 + $0x1938] sm:$0xff] }
 0x2a3   :  { %4638 = vmatprep.subr.bf16.mxu1 %v4637_v39  ;;  %v1047_v39 = vld [vmem:[#allocation2 + $0x1758] sm:$0xff]  ;;  %v4659_v42 = vpack.c.bf16 %v1042_v36, %v1038_v34  ;;  %v1082_v33 = vld [vmem:[#allocation2 + $0x1870] sm:$0xff]  ;;  %v1085_v34 = vld [vmem:[#allocation2 + $0x1888] sm:$0xff] }
 0x2a4   :  { %v1087_v36 = vld [vmem:[#allocation2 + $0x1898] sm:$0xff] }
 0x2a5   :  { %4128 = vmatpush1.bf16.msra.mxu0 %v4127_v45  ;;  %v1048_v45 = vld [vmem:[#allocation2 + $0x1760] sm:$0xff]  ;;  %v1111_v9 = vld [vmem:[#allocation2 + $0x1958] sm:$0xff] }
 0x2a6   :  { %4640 = vmatpush1.bf16.msra.mxu1 %v4639_v46  ;;  %4130 = vmatprep.subr.bf16.mxu0 %v4129_v47  ;;  %v1046_v46 = vld [vmem:[#allocation2 + $0x1750] sm:$0xff]  ;;  %v4661_v47 = vpack.c.bf16 %v1051_v40, %v1047_v39  ;;  %v4151_v53 = vpack.c.bf16 %v1048_v45, %v1044_v44  ;;  %v4681_v45 = vpack.c.bf16 %v1091_v37, %v1087_v36  ;;  %v1115_v10 = vld [vmem:[#allocation2 + $0x1978] sm:$0xff] }
 0x2a7   :  { %4642 = vmatprep.subr.bf16.mxu1 %v4641_v51  ;;  %v1055_v51 = vld [vmem:[#allocation2 + $0x1798] sm:$0xff]  ;;  %v4663_v54 = vpack.c.bf16 %v1050_v48, %v1046_v46  ;;  %v1086_v44 = vld [vmem:[#allocation2 + $0x1890] sm:$0xff]  ;;  %v1097_v48 = vld [vmem:[#allocation2 + $0x18e8] sm:$0xff] }
 0x2a8   :  { %v1090_v46 = vld [vmem:[#allocation2 + $0x18b0] sm:$0xff]  ;;  %v1119_v21 = vld [vmem:[#allocation2 + $0x1998] sm:$0xff] }
 0x2a9   :  { %4132 = vmatpush1.bf16.msra.mxu0 %v4131_v57  ;;  %v1056_v57 = vld [vmem:[#allocation2 + $0x17a0] sm:$0xff]  ;;  %v1123_v22 = vld [vmem:[#allocation2 + $0x19b8] sm:$0xff] }
 0x2aa   :  { %4644 = vmatpush1.bf16.msra.mxu1 %v4643_v58  ;;  %4134 = vmatprep.subr.bf16.mxu0 %v4133_v59  ;;  %v1054_v58 = vld [vmem:[#allocation2 + $0x1790] sm:$0xff]  ;;  %v4665_v59 = vpack.c.bf16 %v1059_v52, %v1055_v51  ;;  %v4155_v1 = vpack.c.bf16 %v1056_v57, %v1052_v56  ;;  %v4683_v52 = vpack.c.bf16 %v1090_v46, %v1086_v44  ;;  %v1137_v44 = vld [vmem:[#allocation2 + $0x1a28] sm:$0xff]  ;;  %v1139_v46 = vld [vmem:[#allocation2 + $0x1a38] sm:$0xff] }
 0x2ab   :  { %4646 = vmatprep.subr.bf16.mxu1 %v4645_v63  ;;  %v1063_v63 = vld [vmem:[#allocation2 + $0x17d8] sm:$0xff]  ;;  %v4667_v2 = vpack.c.bf16 %v1058_v60, %v1054_v58  ;;  %v1094_v56 = vld [vmem:[#allocation2 + $0x18d0] sm:$0xff]  ;;  %v4685_v57 = vpack.c.bf16 %v1099_v50, %v1095_v49  ;;  %v1105_v60 = vld [vmem:[#allocation2 + $0x1928] sm:$0xff] }
 0x2ac   :  { %v1098_v58 = vld [vmem:[#allocation2 + $0x18f0] sm:$0xff]  ;;  %v1132_v50 = vld [vmem:[#allocation2 + $0x1a00] sm:$0xff] }
 0x2ad   :  { %4136 = vmatpush1.bf16.msra.mxu0 %v4135_v5  ;;  %v1064_v5 = vld [vmem:[#allocation2 + $0x17e0] sm:$0xff] }
 0x2ae   :  { %4648 = vmatpush1.bf16.msra.mxu1 %v4647_v6  ;;  %4138 = vmatprep.subr.bf16.mxu0 %v4137_v7  ;;  %v1062_v6 = vld [vmem:[#allocation2 + $0x17d0] sm:$0xff]  ;;  %v4669_v7 = vpack.c.bf16 %v1067_v0, %v1063_v63  ;;  %v4159_v13 = vpack.c.bf16 %v1064_v5, %v1060_v4  ;;  %v4687_v0 = vpack.c.bf16 %v1098_v58, %v1094_v56  ;;  %v1145_v56 = vld [vmem:[#allocation2 + $0x1a68] sm:$0xff]  ;;  %v1147_v58 = vld [vmem:[#allocation2 + $0x1a78] sm:$0xff] }
 0x2af   :  { %4650 = vmatprep.subr.bf16.mxu1 %v4649_v11  ;;  %v1071_v11 = vld [vmem:[#allocation2 + $0x1818] sm:$0xff]  ;;  %v4671_v14 = vpack.c.bf16 %v1066_v8, %v1062_v6  ;;  %v1102_v4 = vld [vmem:[#allocation2 + $0x1910] sm:$0xff]  ;;  %v4689_v5 = vpack.c.bf16 %v1107_v62, %v1103_v61  ;;  %v1113_v8 = vld [vmem:[#allocation2 + $0x1968] sm:$0xff] }
 0x2b0   :  { %v1106_v6 = vld [vmem:[#allocation2 + $0x1930] sm:$0xff]  ;;  %v1140_v62 = vld [vmem:[#allocation2 + $0x1a40] sm:$0xff] }
 0x2b1   :  { %4140 = vmatpush1.bf16.msra.mxu0 %v4139_v17  ;;  %v1072_v17 = vld [vmem:[#allocation2 + $0x1820] sm:$0xff] }
 0x2b2   :  { %4652 = vmatpush1.bf16.msra.mxu1 %v4651_v18  ;;  %4142 = vmatprep.subr.bf16.mxu0 %v4141_v19  ;;  %v1070_v18 = vld [vmem:[#allocation2 + $0x1810] sm:$0xff]  ;;  %v4673_v19 = vpack.c.bf16 %v1075_v12, %v1071_v11  ;;  %v4163_v26 = vpack.c.bf16 %v1072_v17, %v1068_v16  ;;  %v4691_v12 = vpack.c.bf16 %v1106_v6, %v1102_v4  ;;  %v1153_v4 = vld [vmem:[#allocation2 + $0x1aa8] sm:$0xff]  ;;  %v1155_v6 = vld [vmem:[#allocation2 + $0x1ab8] sm:$0xff] }
 0x2b3   :  { %4654 = vmatprep.subr.bf16.mxu1 %v4653_v23  ;;  %v1079_v23 = vld [vmem:[#allocation2 + $0x1858] sm:$0xff]  ;;  %v4675_v27 = vpack.c.bf16 %v1074_v20, %v1070_v18  ;;  %v1110_v16 = vld [vmem:[#allocation2 + $0x1950] sm:$0xff]  ;;  %v4693_v17 = vpack.c.bf16 %v1115_v10, %v1111_v9  ;;  %v1121_v20 = vld [vmem:[#allocation2 + $0x19a8] sm:$0xff] }
 0x2b4   :  { %v4677_v32 = vpack.c.bf16 %v1083_v24, %v1079_v23  ;;  %v1114_v18 = vld [vmem:[#allocation2 + $0x1970] sm:$0xff]  ;;  %v1148_v10 = vld [vmem:[#allocation2 + $0x1a80] sm:$0xff] }
 0x2b5   :  { %4144 = vmatpush1.bf16.msra.mxu0 %v4143_v29  ;;  %v1076_v29 = vld [vmem:[#allocation2 + $0x1840] sm:$0xff]  ;;  %v4695_v24 = vpack.c.bf16 %v1114_v18, %v1110_v16  ;;  %v1161_v16 = vld [vmem:[#allocation2 + $0x1ae8] sm:$0xff]  ;;  %v1163_v18 = vld [vmem:[#allocation2 + $0x1af8] sm:$0xff] }
 0x2b6   :  { %4656 = vmatpush1.bf16.msra.mxu1 %v4655_v30  ;;  %4146 = vmatprep.subr.bf16.mxu0 %v4145_v31  ;;  %v1080_v30 = vld [vmem:[#allocation2 + $0x1860] sm:$0xff]  ;;  %v1078_v31 = vld [vmem:[#allocation2 + $0x1850] sm:$0xff] }
 0x2b7   :  { %4658 = vmatprep.subr.bf16.mxu1 %v4657_v35  ;;  %v1089_v35 = vld [vmem:[#allocation2 + $0x18a8] sm:$0xff]  ;;  %v4167_v39 = vpack.c.bf16 %v1080_v30, %v1076_v29  ;;  %v4679_v40 = vpack.c.bf16 %v1082_v33, %v1078_v31  ;;  %v4697_v29 = vpack.c.bf16 %v1123_v22, %v1119_v21  ;;  %v1122_v30 = vld [vmem:[#allocation2 + $0x19b0] sm:$0xff]  ;;  %v1127_v33 = vld [vmem:[#allocation2 + $0x19d8] sm:$0xff] }
 0x2b8   :  { %v1125_v31 = vld [vmem:[#allocation2 + $0x19c8] sm:$0xff]  ;;  %v1156_v22 = vld [vmem:[#allocation2 + $0x1ac0] sm:$0xff] }
 0x2b9   :  { %4148 = vmatpush1.bf16.msra.mxu0 %v4147_v41  ;;  %v4169_v41 = vpack.c.bf16 %v1089_v35, %v1085_v34  ;;  %v1131_v34 = vld [vmem:[#allocation2 + $0x19f8] sm:$0xff] }
 0x2ba   :  { %4660 = vmatpush1.bf16.msra.mxu1 %v4659_v42  ;;  %4150 = vmatprep.subr.bf16.mxu0 %v4149_v43  ;;  %v1084_v42 = vld [vmem:[#allocation2 + $0x1880] sm:$0xff] }
 0x2bb   :  { %4662 = vmatprep.subr.bf16.mxu1 %v4661_v47  ;;  %v1088_v43 = vld [vmem:[#allocation2 + $0x18a0] sm:$0xff]  ;;  %v1093_v47 = vld [vmem:[#allocation2 + $0x18c8] sm:$0xff] }
 0x2bc   :  { %v4171_v51 = vpack.c.bf16 %v1088_v43, %v1084_v42  ;;  %v1130_v42 = vld [vmem:[#allocation2 + $0x19f0] sm:$0xff]  ;;  %v1133_v43 = vld [vmem:[#allocation2 + $0x1a08] sm:$0xff] }
 0x2bd   :  { %4152 = vmatpush1.bf16.msra.mxu0 %v4151_v53  ;;  %v4173_v53 = vpack.c.bf16 %v1097_v48, %v1093_v47  ;;  %v4193_v49 = vpack.c.bf16 %v1137_v44, %v1133_v43 }
 0x2be   :  { %4664 = vmatpush1.bf16.msra.mxu1 %v4663_v54  ;;  %4154 = vmatprep.subr.bf16.mxu0 %v4153_v55  ;;  %v1092_v54 = vld [vmem:[#allocation2 + $0x18c0] sm:$0xff] }
 0x2bf   :  { %4666 = vmatprep.subr.bf16.mxu1 %v4665_v59  ;;  %v1096_v55 = vld [vmem:[#allocation2 + $0x18e0] sm:$0xff]  ;;  %v1101_v59 = vld [vmem:[#allocation2 + $0x1908] sm:$0xff] }
 0x2c0   :  { %v4175_v63 = vpack.c.bf16 %v1096_v55, %v1092_v54  ;;  %v1138_v54 = vld [vmem:[#allocation2 + $0x1a30] sm:$0xff]  ;;  %v1141_v55 = vld [vmem:[#allocation2 + $0x1a48] sm:$0xff] }
 0x2c1   :  { %4156 = vmatpush1.bf16.msra.mxu0 %v4155_v1  ;;  %v4177_v1 = vpack.c.bf16 %v1105_v60, %v1101_v59  ;;  %v4197_v61 = vpack.c.bf16 %v1145_v56, %v1141_v55 }
 0x2c2   :  { %4668 = vmatpush1.bf16.msra.mxu1 %v4667_v2  ;;  %4158 = vmatprep.subr.bf16.mxu0 %v4157_v3  ;;  %v1100_v2 = vld [vmem:[#allocation2 + $0x1900] sm:$0xff] }
 0x2c3   :  { %4670 = vmatprep.subr.bf16.mxu1 %v4669_v7  ;;  %v1104_v3 = vld [vmem:[#allocation2 + $0x1920] sm:$0xff]  ;;  %v1109_v7 = vld [vmem:[#allocation2 + $0x1948] sm:$0xff] }
 0x2c4   :  { %v4179_v11 = vpack.c.bf16 %v1104_v3, %v1100_v2  ;;  %v1146_v2 = vld [vmem:[#allocation2 + $0x1a70] sm:$0xff]  ;;  %v1149_v3 = vld [vmem:[#allocation2 + $0x1a88] sm:$0xff] }
 0x2c5   :  { %4160 = vmatpush1.bf16.msra.mxu0 %v4159_v13  ;;  %v4181_v13 = vpack.c.bf16 %v1113_v8, %v1109_v7  ;;  %v4201_v9 = vpack.c.bf16 %v1153_v4, %v1149_v3 }
 0x2c6   :  { %4672 = vmatpush1.bf16.msra.mxu1 %v4671_v14  ;;  %4162 = vmatprep.subr.bf16.mxu0 %v4161_v15  ;;  %v1108_v14 = vld [vmem:[#allocation2 + $0x1940] sm:$0xff] }
 0x2c7   :  { %4674 = vmatprep.subr.bf16.mxu1 %v4673_v19  ;;  %v1112_v15 = vld [vmem:[#allocation2 + $0x1960] sm:$0xff]  ;;  %v1117_v19 = vld [vmem:[#allocation2 + $0x1988] sm:$0xff] }
 0x2c8   :  { %1766 = vmatmul.mubr.f32.vlgmr.msra.gmra.mrb[0].mxu0 %v294_v25  ;;  %v4183_v23 = vpack.c.bf16 %v1112_v15, %v1108_v14  ;;  %v1154_v14 = vld [vmem:[#allocation2 + $0x1ab0] sm:$0xff]  ;;  %v1157_v15 = vld [vmem:[#allocation2 + $0x1ac8] sm:$0xff] }
 0x2c9   :  { %4164 = vmatpush1.bf16.msra.mxu0 %v4163_v26  ;;  %2334 = vmatmul.mubr.f32.vlgmr.msra.gmra.mrb[0].mxu1 %v294_v25  ;;  %v4185_v25 = vpack.c.bf16 %v1121_v20, %v1117_v19  ;;  %v1116_v26 = vld [vmem:[#allocation2 + $0x1980] sm:$0xff]  ;;  %v4205_v21 = vpack.c.bf16 %v1161_v16, %v1157_v15 }
 0x2ca   :  { %4676 = vmatpush1.bf16.msra.mxu1 %v4675_v27  ;;  %4166 = vmatprep.subr.bf16.mxu0 %v4165_v28  ;;  %v1120_v27 = vld [vmem:[#allocation2 + $0x19a0] sm:$0xff]  ;;  %v1118_v28 = vld [vmem:[#allocation2 + $0x1990] sm:$0xff] }
 0x2cb   :  { %4678 = vmatprep.subr.bf16.mxu1 %v4677_v32  ;;  %1836 = vmatprep.mubr.f32.mxu0 %v297_v38  ;;  %v1129_v32 = vld [vmem:[#allocation2 + $0x19e8] sm:$0xff]  ;;  %v4187_v35 = vpack.c.bf16 %v1120_v27, %v1116_v26  ;;  %v4699_v36 = vpack.c.bf16 %v1122_v30, %v1118_v28  ;;  %v1162_v26 = vld [vmem:[#allocation2 + $0x1af0] sm:$0xff]  ;;  %v1171_v30 = vld [vmem:[#allocation2 + $0x1b38] sm:$0xff] }
 0x2cc   :  { %2404 = vmatprep.mubr.f32.mxu1 %v297_v38  ;;  %v4189_v37 = vpack.c.bf16 %v1129_v32, %v1125_v31  ;;  %v1124_v38 = vld [vmem:[#allocation2 + $0x19c0] sm:$0xff]  ;;  %v1165_v27 = vld [vmem:[#allocation2 + $0x1b08] sm:$0xff] }
 0x2cd   :  { %4168 = vmatpush1.bf16.msra.mxu0 %v4167_v39  ;;  %v1128_v39 = vld [vmem:[#allocation2 + $0x19e0] sm:$0xff]  ;;  %v1169_v28 = vld [vmem:[#allocation2 + $0x1b28] sm:$0xff] }
 0x2ce   :  { %4680 = vmatpush1.bf16.msra.mxu1 %v4679_v40  ;;  %4170 = vmatprep.subr.bf16.mxu0 %v4169_v41  ;;  %v1126_v40 = vld [vmem:[#allocation2 + $0x19d0] sm:$0xff]  ;;  %v4701_v41 = vpack.c.bf16 %v1131_v34, %v1127_v33  ;;  %v4191_v47 = vpack.c.bf16 %v1128_v39, %v1124_v38  ;;  %v4209_v33 = vpack.c.bf16 %v1169_v28, %v1165_v27  ;;  %v1164_v34 = vld [vmem:[#allocation2 + $0x1b00] sm:$0xff]  ;;  %v1173_v39 = vld [vmem:[#allocation2 + $0x1b48] sm:$0xff] }
 0x2cf   :  { %4682 = vmatprep.subr.bf16.mxu1 %v4681_v45  ;;  %v1135_v45 = vld [vmem:[#allocation2 + $0x1a18] sm:$0xff]  ;;  %v4703_v48 = vpack.c.bf16 %v1130_v42, %v1126_v40  ;;  %v1170_v38 = vld [vmem:[#allocation2 + $0x1b30] sm:$0xff]  ;;  %v1177_v40 = vld [vmem:[#allocation2 + $0x1b68] sm:$0xff] }
 0x2d0   :  { %v1179_v42 = vld [vmem:[#allocation2 + $0x1b78] sm:$0xff]  ;;  %v296_v27 = vld [vmem:[%s5992_s4 + $0x60] sm:$0xff] }
 0x2d1   :  { %4172 = vmatpush1.bf16.msra.mxu0 %v4171_v51  ;;  %v1136_v51 = vld [vmem:[#allocation2 + $0x1a20] sm:$0xff] }
 0x2d2   :  { %4684 = vmatpush1.bf16.msra.mxu1 %v4683_v52  ;;  %4174 = vmatprep.subr.bf16.mxu0 %v4173_v53  ;;  %v1134_v52 = vld [vmem:[#allocation2 + $0x1a10] sm:$0xff]  ;;  %v4705_v53 = vpack.c.bf16 %v1139_v46, %v1135_v45  ;;  %v4195_v59 = vpack.c.bf16 %v1136_v51, %v1132_v50  ;;  %v4213_v45 = vpack.c.bf16 %v1177_v40, %v1173_v39  ;;  %v1172_v46 = vld [vmem:[#allocation2 + $0x1b40] sm:$0xff]  ;;  %v1181_v51 = vld [vmem:[#allocation2 + $0x1b88] sm:$0xff] }
 0x2d3   :  { %4686 = vmatprep.subr.bf16.mxu1 %v4685_v57  ;;  %v1143_v57 = vld [vmem:[#allocation2 + $0x1a58] sm:$0xff]  ;;  %v4707_v60 = vpack.c.bf16 %v1138_v54, %v1134_v52  ;;  %v1178_v50 = vld [vmem:[#allocation2 + $0x1b70] sm:$0xff]  ;;  %v1185_v52 = vld [vmem:[#allocation2 + $0x1ba8] sm:$0xff] }
 0x2d4   :  { %v1187_v54 = vld [vmem:[#allocation2 + $0x1bb8] sm:$0xff] }
 0x2d5   :  { %4176 = vmatpush1.bf16.msra.mxu0 %v4175_v63  ;;  %v1144_v63 = vld [vmem:[#allocation2 + $0x1a60] sm:$0xff]  ;;  %v1219_v39 = vld [vmem:[#allocation2 + $0x1cb8] sm:$0xff] }
 0x2d6   :  { %4688 = vmatpush1.bf16.msra.mxu1 %v4687_v0  ;;  %4178 = vmatprep.subr.bf16.mxu0 %v4177_v1  ;;  %v1142_v0 = vld [vmem:[#allocation2 + $0x1a50] sm:$0xff]  ;;  %v4709_v1 = vpack.c.bf16 %v1147_v58, %v1143_v57  ;;  %v4199_v7 = vpack.c.bf16 %v1144_v63, %v1140_v62  ;;  %v4217_v57 = vpack.c.bf16 %v1185_v52, %v1181_v51  ;;  %v1180_v58 = vld [vmem:[#allocation2 + $0x1b80] sm:$0xff]  ;;  %v1189_v63 = vld [vmem:[#allocation2 + $0x1bc8] sm:$0xff] }
 0x2d7   :  { %4690 = vmatprep.subr.bf16.mxu1 %v4689_v5  ;;  %v1151_v5 = vld [vmem:[#allocation2 + $0x1a98] sm:$0xff]  ;;  %v4711_v8 = vpack.c.bf16 %v1146_v2, %v1142_v0  ;;  %v1186_v62 = vld [vmem:[#allocation2 + $0x1bb0] sm:$0xff]  ;;  %v1193_v0 = vld [vmem:[#allocation2 + $0x1be8] sm:$0xff] }
 0x2d8   :  { %v1195_v2 = vld [vmem:[#allocation2 + $0x1bf8] sm:$0xff] }
 0x2d9   :  { %4180 = vmatpush1.bf16.msra.mxu0 %v4179_v11  ;;  %v1152_v11 = vld [vmem:[#allocation2 + $0x1aa0] sm:$0xff]  ;;  %v299_v40 = vld [vmem:[%s5992_s4 + $0x78] sm:$0xff] }
 0x2da   :  { %4692 = vmatpush1.bf16.msra.mxu1 %v4691_v12  ;;  %4182 = vmatprep.subr.bf16.mxu0 %v4181_v13  ;;  %v1150_v12 = vld [vmem:[#allocation2 + $0x1a90] sm:$0xff]  ;;  %v4713_v13 = vpack.c.bf16 %v1155_v6, %v1151_v5  ;;  %v4203_v19 = vpack.c.bf16 %v1152_v11, %v1148_v10  ;;  %v4221_v5 = vpack.c.bf16 %v1193_v0, %v1189_v63  ;;  %v1188_v6 = vld [vmem:[#allocation2 + $0x1bc0] sm:$0xff]  ;;  %v1197_v11 = vld [vmem:[#allocation2 + $0x1c08] sm:$0xff] }
 0x2db   :  { %4694 = vmatprep.subr.bf16.mxu1 %v4693_v17  ;;  %v1159_v17 = vld [vmem:[#allocation2 + $0x1ad8] sm:$0xff]  ;;  %v4715_v20 = vpack.c.bf16 %v1154_v14, %v1150_v12  ;;  %v1194_v10 = vld [vmem:[#allocation2 + $0x1bf0] sm:$0xff]  ;;  %v1201_v12 = vld [vmem:[#allocation2 + $0x1c28] sm:$0xff] }
 0x2dc   :  { %v1203_v14 = vld [vmem:[#allocation2 + $0x1c38] sm:$0xff] }
 0x2dd   :  { %4184 = vmatpush1.bf16.msra.mxu0 %v4183_v23  ;;  %v1160_v23 = vld [vmem:[#allocation2 + $0x1ae0] sm:$0xff]  ;;  %v1223_v51 = vld [vmem:[#allocation2 + $0x1cd8] sm:$0xff] }
 0x2de   :  { %4696 = vmatpush1.bf16.msra.mxu1 %v4695_v24  ;;  %4186 = vmatprep.subr.bf16.mxu0 %v4185_v25  ;;  %v1158_v24 = vld [vmem:[#allocation2 + $0x1ad0] sm:$0xff]  ;;  %v4717_v25 = vpack.c.bf16 %v1163_v18, %v1159_v17  ;;  %v4207_v31 = vpack.c.bf16 %v1160_v23, %v1156_v22  ;;  %v4225_v17 = vpack.c.bf16 %v1201_v12, %v1197_v11  ;;  %v1196_v18 = vld [vmem:[#allocation2 + $0x1c00] sm:$0xff]  ;;  %v1205_v23 = vld [vmem:[#allocation2 + $0x1c48] sm:$0xff] }
 0x2df   :  { %4698 = vmatprep.subr.bf16.mxu1 %v4697_v29  ;;  %v1167_v29 = vld [vmem:[#allocation2 + $0x1b18] sm:$0xff]  ;;  %v4719_v32 = vpack.c.bf16 %v1162_v26, %v1158_v24  ;;  %v1202_v22 = vld [vmem:[#allocation2 + $0x1c30] sm:$0xff]  ;;  %v1209_v24 = vld [vmem:[#allocation2 + $0x1c68] sm:$0xff] }
 0x2e0   :  { %v1211_v26 = vld [vmem:[#allocation2 + $0x1c78] sm:$0xff] }
 0x2e1   :  { %4188 = vmatpush1.bf16.msra.mxu0 %v4187_v35  ;;  %v1168_v35 = vld [vmem:[#allocation2 + $0x1b20] sm:$0xff]  ;;  %v1227_v52 = vld [vmem:[#allocation2 + $0x1cf8] sm:$0xff] }
 0x2e2   :  { %4700 = vmatpush1.bf16.msra.mxu1 %v4699_v36  ;;  %4190 = vmatprep.subr.bf16.mxu0 %v4189_v37  ;;  %v1166_v36 = vld [vmem:[#allocation2 + $0x1b10] sm:$0xff]  ;;  %v4721_v37 = vpack.c.bf16 %v1171_v30, %v1167_v29  ;;  %v4211_v43 = vpack.c.bf16 %v1168_v35, %v1164_v34  ;;  %v4229_v30 = vpack.c.bf16 %v1209_v24, %v1205_v23  ;;  %v1231_v63 = vld [vmem:[#allocation2 + $0x1d18] sm:$0xff] }
 0x2e3   :  { %4702 = vmatprep.subr.bf16.mxu1 %v4701_v41  ;;  %v1175_v41 = vld [vmem:[#allocation2 + $0x1b58] sm:$0xff]  ;;  %v4723_v44 = vpack.c.bf16 %v1170_v38, %v1166_v36  ;;  %v1210_v35 = vld [vmem:[#allocation2 + $0x1c70] sm:$0xff]  ;;  %v1213_v36 = vld [vmem:[#allocation2 + $0x1c88] sm:$0xff] }
 0x2e4   :  { %v1215_v38 = vld [vmem:[#allocation2 + $0x1c98] sm:$0xff] }
 0x2e5   :  { %4192 = vmatpush1.bf16.msra.mxu0 %v4191_v47  ;;  %v1176_v47 = vld [vmem:[#allocation2 + $0x1b60] sm:$0xff]  ;;  %v1235_v0 = vld [vmem:[#allocation2 + $0x1d38] sm:$0xff] }
 0x2e6   :  { %4704 = vmatpush1.bf16.msra.mxu1 %v4703_v48  ;;  %4194 = vmatprep.subr.bf16.mxu0 %v4193_v49  ;;  %v1174_v48 = vld [vmem:[#allocation2 + $0x1b50] sm:$0xff]  ;;  %v4725_v49 = vpack.c.bf16 %v1179_v42, %v1175_v41  ;;  %v4215_v55 = vpack.c.bf16 %v1176_v47, %v1172_v46  ;;  %v4745_v47 = vpack.c.bf16 %v1219_v39, %v1215_v38  ;;  %v1239_v11 = vld [vmem:[#allocation2 + $0x1d58] sm:$0xff] }
 0x2e7   :  { %4706 = vmatprep.subr.bf16.mxu1 %v4705_v53  ;;  %v1183_v53 = vld [vmem:[#allocation2 + $0x1b98] sm:$0xff]  ;;  %v4727_v56 = vpack.c.bf16 %v1178_v50, %v1174_v48  ;;  %v1214_v46 = vld [vmem:[#allocation2 + $0x1c90] sm:$0xff]  ;;  %v1225_v50 = vld [vmem:[#allocation2 + $0x1ce8] sm:$0xff] }
 0x2e8   :  { %v1218_v48 = vld [vmem:[#allocation2 + $0x1cb0] sm:$0xff]  ;;  %v1243_v12 = vld [vmem:[#allocation2 + $0x1d78] sm:$0xff] }
 0x2e9   :  { %4196 = vmatpush1.bf16.msra.mxu0 %v4195_v59  ;;  %v1184_v59 = vld [vmem:[#allocation2 + $0x1ba0] sm:$0xff]  ;;  %v1247_v23 = vld [vmem:[#allocation2 + $0x1d98] sm:$0xff] }
 0x2ea   :  { %4708 = vmatpush1.bf16.msra.mxu1 %v4707_v60  ;;  %4198 = vmatprep.subr.bf16.mxu0 %v4197_v61  ;;  %v1182_v60 = vld [vmem:[#allocation2 + $0x1b90] sm:$0xff]  ;;  %v4729_v61 = vpack.c.bf16 %v1187_v54, %v1183_v53  ;;  %v4219_v3 = vpack.c.bf16 %v1184_v59, %v1180_v58  ;;  %v4747_v54 = vpack.c.bf16 %v1218_v48, %v1214_v46  ;;  %v1251_v24 = vld [vmem:[#allocation2 + $0x1db8] sm:$0xff]  ;;  %v1265_v46 = vld [vmem:[#allocation2 + $0x1e28] sm:$0xff] }
 0x2eb   :  { %4710 = vmatprep.subr.bf16.mxu1 %v4709_v1  ;;  %v1191_v1 = vld [vmem:[#allocation2 + $0x1bd8] sm:$0xff]  ;;  %v4731_v4 = vpack.c.bf16 %v1186_v62, %v1182_v60  ;;  %v1222_v58 = vld [vmem:[#allocation2 + $0x1cd0] sm:$0xff]  ;;  %v4749_v59 = vpack.c.bf16 %v1227_v52, %v1223_v51  ;;  %v1233_v62 = vld [vmem:[#allocation2 + $0x1d28] sm:$0xff] }
 0x2ec   :  { %v1226_v60 = vld [vmem:[#allocation2 + $0x1cf0] sm:$0xff]  ;;  %v1267_v48 = vld [vmem:[#allocation2 + $0x1e38] sm:$0xff]  ;;  %v1260_v52 = vld [vmem:[#allocation2 + $0x1e00] sm:$0xff] }
 0x2ed   :  { %4200 = vmatpush1.bf16.msra.mxu0 %v4199_v7  ;;  %v1192_v7 = vld [vmem:[#allocation2 + $0x1be0] sm:$0xff] }
 0x2ee   :  { %4712 = vmatpush1.bf16.msra.mxu1 %v4711_v8  ;;  %4202 = vmatprep.subr.bf16.mxu0 %v4201_v9  ;;  %v1190_v8 = vld [vmem:[#allocation2 + $0x1bd0] sm:$0xff]  ;;  %v4733_v9 = vpack.c.bf16 %v1195_v2, %v1191_v1  ;;  %v4223_v15 = vpack.c.bf16 %v1192_v7, %v1188_v6  ;;  %v4751_v2 = vpack.c.bf16 %v1226_v60, %v1222_v58  ;;  %v1273_v58 = vld [vmem:[#allocation2 + $0x1e68] sm:$0xff]  ;;  %v1275_v60 = vld [vmem:[#allocation2 + $0x1e78] sm:$0xff] }
 0x2ef   :  { %4714 = vmatprep.subr.bf16.mxu1 %v4713_v13  ;;  %v1199_v13 = vld [vmem:[#allocation2 + $0x1c18] sm:$0xff]  ;;  %v4735_v16 = vpack.c.bf16 %v1194_v10, %v1190_v8  ;;  %v1230_v6 = vld [vmem:[#allocation2 + $0x1d10] sm:$0xff]  ;;  %v4753_v7 = vpack.c.bf16 %v1235_v0, %v1231_v63  ;;  %v1241_v10 = vld [vmem:[#allocation2 + $0x1d68] sm:$0xff] }
 0x2f0   :  { %v1234_v8 = vld [vmem:[#allocation2 + $0x1d30] sm:$0xff]  ;;  %v1268_v0 = vld [vmem:[#allocation2 + $0x1e40] sm:$0xff] }
 0x2f1   :  { %4204 = vmatpush1.bf16.msra.mxu0 %v4203_v19  ;;  %v1200_v19 = vld [vmem:[#allocation2 + $0x1c20] sm:$0xff] }
 0x2f2   :  { %4716 = vmatpush1.bf16.msra.mxu1 %v4715_v20  ;;  %4206 = vmatprep.subr.bf16.mxu0 %v4205_v21  ;;  %v1198_v20 = vld [vmem:[#allocation2 + $0x1c10] sm:$0xff]  ;;  %v4737_v21 = vpack.c.bf16 %v1203_v14, %v1199_v13  ;;  %v4227_v28 = vpack.c.bf16 %v1200_v19, %v1196_v18  ;;  %v4755_v14 = vpack.c.bf16 %v1234_v8, %v1230_v6  ;;  %v1281_v6 = vld [vmem:[#allocation2 + $0x1ea8] sm:$0xff]  ;;  %v1283_v8 = vld [vmem:[#allocation2 + $0x1eb8] sm:$0xff] }
 0x2f3   :  { %4718 = vmatprep.subr.bf16.mxu1 %v4717_v25  ;;  %v1207_v25 = vld [vmem:[#allocation2 + $0x1c58] sm:$0xff]  ;;  %v4739_v29 = vpack.c.bf16 %v1202_v22, %v1198_v20  ;;  %v1238_v18 = vld [vmem:[#allocation2 + $0x1d50] sm:$0xff]  ;;  %v4757_v19 = vpack.c.bf16 %v1243_v12, %v1239_v11  ;;  %v1249_v22 = vld [vmem:[#allocation2 + $0x1da8] sm:$0xff] }
 0x2f4   :  { %v4741_v34 = vpack.c.bf16 %v1211_v26, %v1207_v25  ;;  %v1242_v20 = vld [vmem:[#allocation2 + $0x1d70] sm:$0xff]  ;;  %v1276_v12 = vld [vmem:[#allocation2 + $0x1e80] sm:$0xff] }
 0x2f5   :  { %4208 = vmatpush1.bf16.msra.mxu0 %v4207_v31  ;;  %v1204_v31 = vld [vmem:[#allocation2 + $0x1c40] sm:$0xff]  ;;  %v4759_v26 = vpack.c.bf16 %v1242_v20, %v1238_v18  ;;  %v1289_v18 = vld [vmem:[#allocation2 + $0x1ee8] sm:$0xff]  ;;  %v1291_v20 = vld [vmem:[#allocation2 + $0x1ef8] sm:$0xff] }
 0x2f6   :  { %4720 = vmatpush1.bf16.msra.mxu1 %v4719_v32  ;;  %4210 = vmatprep.subr.bf16.mxu0 %v4209_v33  ;;  %v1208_v32 = vld [vmem:[#allocation2 + $0x1c60] sm:$0xff]  ;;  %v1206_v33 = vld [vmem:[#allocation2 + $0x1c50] sm:$0xff] }
 0x2f7   :  { %4722 = vmatprep.subr.bf16.mxu1 %v4721_v37  ;;  %v1217_v37 = vld [vmem:[#allocation2 + $0x1ca8] sm:$0xff]  ;;  %v4231_v41 = vpack.c.bf16 %v1208_v32, %v1204_v31  ;;  %v4743_v42 = vpack.c.bf16 %v1210_v35, %v1206_v33  ;;  %v4761_v31 = vpack.c.bf16 %v1251_v24, %v1247_v23  ;;  %v1250_v32 = vld [vmem:[#allocation2 + $0x1db0] sm:$0xff]  ;;  %v1255_v35 = vld [vmem:[#allocation2 + $0x1dd8] sm:$0xff] }
 0x2f8   :  { %v1253_v33 = vld [vmem:[#allocation2 + $0x1dc8] sm:$0xff]  ;;  %v1284_v24 = vld [vmem:[#allocation2 + $0x1ec0] sm:$0xff] }
 0x2f9   :  { %4212 = vmatpush1.bf16.msra.mxu0 %v4211_v43  ;;  %v4233_v43 = vpack.c.bf16 %v1217_v37, %v1213_v36  ;;  %v1259_v36 = vld [vmem:[#allocation2 + $0x1df8] sm:$0xff] }
 0x2fa   :  { %4724 = vmatpush1.bf16.msra.mxu1 %v4723_v44  ;;  %4214 = vmatprep.subr.bf16.mxu0 %v4213_v45  ;;  %v1212_v44 = vld [vmem:[#allocation2 + $0x1c80] sm:$0xff] }
 0x2fb   :  { %4726 = vmatprep.subr.bf16.mxu1 %v4725_v49  ;;  %v1216_v45 = vld [vmem:[#allocation2 + $0x1ca0] sm:$0xff]  ;;  %v1221_v49 = vld [vmem:[#allocation2 + $0x1cc8] sm:$0xff] }
 0x2fc   :  { %v4235_v53 = vpack.c.bf16 %v1216_v45, %v1212_v44  ;;  %v1258_v44 = vld [vmem:[#allocation2 + $0x1df0] sm:$0xff]  ;;  %v1261_v45 = vld [vmem:[#allocation2 + $0x1e08] sm:$0xff] }
 0x2fd   :  { %4216 = vmatpush1.bf16.msra.mxu0 %v4215_v55  ;;  %v4237_v55 = vpack.c.bf16 %v1225_v50, %v1221_v49  ;;  %v4257_v51 = vpack.c.bf16 %v1265_v46, %v1261_v45 }
 0x2fe   :  { %4728 = vmatpush1.bf16.msra.mxu1 %v4727_v56  ;;  %4218 = vmatprep.subr.bf16.mxu0 %v4217_v57  ;;  %v1220_v56 = vld [vmem:[#allocation2 + $0x1cc0] sm:$0xff] }
 0x2ff   :  { %4730 = vmatprep.subr.bf16.mxu1 %v4729_v61  ;;  %v1224_v57 = vld [vmem:[#allocation2 + $0x1ce0] sm:$0xff]  ;;  %v1229_v61 = vld [vmem:[#allocation2 + $0x1d08] sm:$0xff] }
 0x300   :  { %v4239_v1 = vpack.c.bf16 %v1224_v57, %v1220_v56  ;;  %v1266_v56 = vld [vmem:[#allocation2 + $0x1e30] sm:$0xff]  ;;  %v1269_v57 = vld [vmem:[#allocation2 + $0x1e48] sm:$0xff] }
 0x301   :  { %4220 = vmatpush1.bf16.msra.mxu0 %v4219_v3  ;;  %v4241_v3 = vpack.c.bf16 %v1233_v62, %v1229_v61  ;;  %v4261_v63 = vpack.c.bf16 %v1273_v58, %v1269_v57 }
 0x302   :  { %4732 = vmatpush1.bf16.msra.mxu1 %v4731_v4  ;;  %4222 = vmatprep.subr.bf16.mxu0 %v4221_v5  ;;  %v1228_v4 = vld [vmem:[#allocation2 + $0x1d00] sm:$0xff] }
 0x303   :  { %4734 = vmatprep.subr.bf16.mxu1 %v4733_v9  ;;  %v1232_v5 = vld [vmem:[#allocation2 + $0x1d20] sm:$0xff]  ;;  %v1237_v9 = vld [vmem:[#allocation2 + $0x1d48] sm:$0xff] }
 0x304   :  { %v4243_v13 = vpack.c.bf16 %v1232_v5, %v1228_v4  ;;  %v1274_v4 = vld [vmem:[#allocation2 + $0x1e70] sm:$0xff]  ;;  %v1277_v5 = vld [vmem:[#allocation2 + $0x1e88] sm:$0xff] }
 0x305   :  { %4224 = vmatpush1.bf16.msra.mxu0 %v4223_v15  ;;  %v4245_v15 = vpack.c.bf16 %v1241_v10, %v1237_v9  ;;  %v4265_v11 = vpack.c.bf16 %v1281_v6, %v1277_v5 }
 0x306   :  { %4736 = vmatpush1.bf16.msra.mxu1 %v4735_v16  ;;  %4226 = vmatprep.subr.bf16.mxu0 %v4225_v17  ;;  %v1236_v16 = vld [vmem:[#allocation2 + $0x1d40] sm:$0xff] }
 0x307   :  { %4738 = vmatprep.subr.bf16.mxu1 %v4737_v21  ;;  %v1240_v17 = vld [vmem:[#allocation2 + $0x1d60] sm:$0xff]  ;;  %v1245_v21 = vld [vmem:[#allocation2 + $0x1d88] sm:$0xff] }
 0x308   :  { %1837 = vmatmul.mubr.f32.vlgmr.msra.gmra.mrb[0].mxu0 %v296_v27  ;;  %v4247_v25 = vpack.c.bf16 %v1240_v17, %v1236_v16  ;;  %v1282_v16 = vld [vmem:[#allocation2 + $0x1eb0] sm:$0xff]  ;;  %v1285_v17 = vld [vmem:[#allocation2 + $0x1ec8] sm:$0xff] }
 0x309   :  { %4228 = vmatpush1.bf16.msra.mxu0 %v4227_v28  ;;  %2405 = vmatmul.mubr.f32.vlgmr.msra.gmra.mrb[0].mxu1 %v296_v27  ;;  %v4249_v27 = vpack.c.bf16 %v1249_v22, %v1245_v21  ;;  %v1244_v28 = vld [vmem:[#allocation2 + $0x1d80] sm:$0xff]  ;;  %v4269_v23 = vpack.c.bf16 %v1289_v18, %v1285_v17 }
 0x30a   :  { %4740 = vmatpush1.bf16.msra.mxu1 %v4739_v29  ;;  %4230 = vmatprep.subr.bf16.mxu0 %v4229_v30  ;;  %v1248_v29 = vld [vmem:[#allocation2 + $0x1da0] sm:$0xff]  ;;  %v1246_v30 = vld [vmem:[#allocation2 + $0x1d90] sm:$0xff] }
 0x30b   :  { %4742 = vmatprep.subr.bf16.mxu1 %v4741_v34  ;;  %1907 = vmatprep.mubr.f32.mxu0 %v299_v40  ;;  %v1257_v34 = vld [vmem:[#allocation2 + $0x1de8] sm:$0xff]  ;;  %v4251_v37 = vpack.c.bf16 %v1248_v29, %v1244_v28  ;;  %v4763_v38 = vpack.c.bf16 %v1250_v32, %v1246_v30  ;;  %v1290_v28 = vld [vmem:[#allocation2 + $0x1ef0] sm:$0xff]  ;;  %v1299_v32 = vld [vmem:[#allocation2 + $0x1f38] sm:$0xff] }
 0x30c   :  { %2475 = vmatprep.mubr.f32.mxu1 %v299_v40  ;;  %v4253_v39 = vpack.c.bf16 %v1257_v34, %v1253_v33  ;;  %v1252_v40 = vld [vmem:[#allocation2 + $0x1dc0] sm:$0xff]  ;;  %v1293_v29 = vld [vmem:[#allocation2 + $0x1f08] sm:$0xff] }
 0x30d   :  { %4232 = vmatpush1.bf16.msra.mxu0 %v4231_v41  ;;  %v1256_v41 = vld [vmem:[#allocation2 + $0x1de0] sm:$0xff]  ;;  %v1297_v30 = vld [vmem:[#allocation2 + $0x1f28] sm:$0xff] }
 0x30e   :  { %4744 = vmatpush1.bf16.msra.mxu1 %v4743_v42  ;;  %4234 = vmatprep.subr.bf16.mxu0 %v4233_v43  ;;  %v1254_v42 = vld [vmem:[#allocation2 + $0x1dd0] sm:$0xff]  ;;  %v4765_v43 = vpack.c.bf16 %v1259_v36, %v1255_v35  ;;  %v4255_v49 = vpack.c.bf16 %v1256_v41, %v1252_v40  ;;  %v4273_v35 = vpack.c.bf16 %v1297_v30, %v1293_v29  ;;  %v1292_v36 = vld [vmem:[#allocation2 + $0x1f00] sm:$0xff]  ;;  %v1301_v41 = vld [vmem:[#allocation2 + $0x1f48] sm:$0xff] }
 0x30f   :  { %4746 = vmatprep.subr.bf16.mxu1 %v4745_v47  ;;  %v1263_v47 = vld [vmem:[#allocation2 + $0x1e18] sm:$0xff]  ;;  %v4767_v50 = vpack.c.bf16 %v1258_v44, %v1254_v42  ;;  %v1298_v40 = vld [vmem:[#allocation2 + $0x1f30] sm:$0xff]  ;;  %v1305_v42 = vld [vmem:[#allocation2 + $0x1f68] sm:$0xff] }
 0x310   :  { %v1307_v44 = vld [vmem:[#allocation2 + $0x1f78] sm:$0xff]  ;;  %v298_v29 = vld [vmem:[%s5992_s4 + $0x70] sm:$0xff] }
 0x311   :  { %4236 = vmatpush1.bf16.msra.mxu0 %v4235_v53  ;;  %v1264_v53 = vld [vmem:[#allocation2 + $0x1e20] sm:$0xff] }
 0x312   :  { %4748 = vmatpush1.bf16.msra.mxu1 %v4747_v54  ;;  %4238 = vmatprep.subr.bf16.mxu0 %v4237_v55  ;;  %v1262_v54 = vld [vmem:[#allocation2 + $0x1e10] sm:$0xff]  ;;  %v4769_v55 = vpack.c.bf16 %v1267_v48, %v1263_v47  ;;  %v4259_v61 = vpack.c.bf16 %v1264_v53, %v1260_v52  ;;  %v4277_v47 = vpack.c.bf16 %v1305_v42, %v1301_v41  ;;  %v1300_v48 = vld [vmem:[#allocation2 + $0x1f40] sm:$0xff]  ;;  %v1309_v53 = vld [vmem:[#allocation2 + $0x1f88] sm:$0xff] }
 0x313   :  { %4750 = vmatprep.subr.bf16.mxu1 %v4749_v59  ;;  %v1271_v59 = vld [vmem:[#allocation2 + $0x1e58] sm:$0xff]  ;;  %v4771_v62 = vpack.c.bf16 %v1266_v56, %v1262_v54  ;;  %v1306_v52 = vld [vmem:[#allocation2 + $0x1f70] sm:$0xff]  ;;  %v1313_v54 = vld [vmem:[#allocation2 + $0x1fa8] sm:$0xff] }
 0x314   :  { %v1315_v56 = vld [vmem:[#allocation2 + $0x1fb8] sm:$0xff]  ;;  %v2547_v41 = vld [vmem:[#allocation6 + $0x1a8] sm:$0xff] }
 0x315   :  { %4240 = vmatpush1.bf16.msra.mxu0 %v4239_v1  ;;  %v1272_v1 = vld [vmem:[#allocation2 + $0x1e60] sm:$0xff] }
 0x316   :  { %4752 = vmatpush1.bf16.msra.mxu1 %v4751_v2  ;;  %4242 = vmatprep.subr.bf16.mxu0 %v4241_v3  ;;  %v1270_v2 = vld [vmem:[#allocation2 + $0x1e50] sm:$0xff]  ;;  %v4773_v3 = vpack.c.bf16 %v1275_v60, %v1271_v59  ;;  %v4263_v9 = vpack.c.bf16 %v1272_v1, %v1268_v0  ;;  %v4281_v59 = vpack.c.bf16 %v1313_v54, %v1309_v53  ;;  %v1308_v60 = vld [vmem:[#allocation2 + $0x1f80] sm:$0xff]  ;;  %v1317_v1 = vld [vmem:[#allocation2 + $0x1fc8] sm:$0xff] }
 0x317   :  { %4754 = vmatprep.subr.bf16.mxu1 %v4753_v7  ;;  %v1279_v7 = vld [vmem:[#allocation2 + $0x1e98] sm:$0xff]  ;;  %v4775_v10 = vpack.c.bf16 %v1274_v4, %v1270_v2  ;;  %v1314_v0 = vld [vmem:[#allocation2 + $0x1fb0] sm:$0xff]  ;;  %v1321_v2 = vld [vmem:[#allocation2 + $0x1fe8] sm:$0xff] }
 0x318   :  { %v1323_v4 = vld [vmem:[#allocation2 + $0x1ff8] sm:$0xff] }
 0x319   :  { %4244 = vmatpush1.bf16.msra.mxu0 %v4243_v13  ;;  %v1280_v13 = vld [vmem:[#allocation2 + $0x1ea0] sm:$0xff] }
 0x31a   :  { %4756 = vmatpush1.bf16.msra.mxu1 %v4755_v14  ;;  %4246 = vmatprep.subr.bf16.mxu0 %v4245_v15  ;;  %v1278_v14 = vld [vmem:[#allocation2 + $0x1e90] sm:$0xff]  ;;  %v4777_v15 = vpack.c.bf16 %v1283_v8, %v1279_v7  ;;  %v4267_v21 = vpack.c.bf16 %v1280_v13, %v1276_v12  ;;  %v4285_v7 = vpack.c.bf16 %v1321_v2, %v1317_v1  ;;  %v1316_v8 = vld [vmem:[#allocation2 + $0x1fc0] sm:$0xff] }
 0x31b   :  { %4758 = vmatprep.subr.bf16.mxu1 %v4757_v19  ;;  %v1287_v19 = vld [vmem:[#allocation2 + $0x1ed8] sm:$0xff]  ;;  %v4779_v22 = vpack.c.bf16 %v1282_v16, %v1278_v14  ;;  %v1322_v12 = vld [vmem:[#allocation2 + $0x1ff0] sm:$0xff]  ;;  %v2510_v13 = vld [vmem:[#allocation6 + $0x80] sm:$0xff] }
 0x31c   :  { %v2511_v14 = vld [vmem:[#allocation6 + $0x88] sm:$0xff]  ;;  %v2549_v53 = vld [vmem:[#allocation6 + $0x1b8] sm:$0xff] }
 0x31d   :  { %4248 = vmatpush1.bf16.msra.mxu0 %v4247_v25  ;;  %v1288_v25 = vld [vmem:[#allocation2 + $0x1ee0] sm:$0xff]  ;;  %v2543_v16 = vld [vmem:[#allocation6 + $0x188] sm:$0xff] }
 0x31e   :  { %4760 = vmatpush1.bf16.msra.mxu1 %v4759_v26  ;;  %4250 = vmatprep.subr.bf16.mxu0 %v4249_v27  ;;  %v1286_v26 = vld [vmem:[#allocation2 + $0x1ed0] sm:$0xff]  ;;  %v4781_v27 = vpack.c.bf16 %v1291_v20, %v1287_v19  ;;  %v4271_v33 = vpack.c.bf16 %v1288_v25, %v1284_v24  ;;  %v4801_v19 = vpack.c.bf16 %v2511_v14, %v2510_v13  ;;  %v2494_v20 = vld [vmem:[#allocation6] sm:$0xff]  ;;  %v2553_v13 = vld [vmem:[#allocation6 + $0x1d8] sm:$0xff] }
 0x31f   :  { %4762 = vmatprep.subr.bf16.mxu1 %v4761_v31  ;;  %v1295_v31 = vld [vmem:[#allocation2 + $0x1f18] sm:$0xff]  ;;  %v4783_v34 = vpack.c.bf16 %v1290_v28, %v1286_v26  ;;  %v2527_v24 = vld [vmem:[#allocation6 + $0x108] sm:$0xff] }
 0x320   :  { %v2512_v25 = vld [vmem:[#allocation6 + $0x90] sm:$0xff]  ;;  %v2513_v26 = vld [vmem:[#allocation6 + $0x98] sm:$0xff]  ;;  %v2551_v1 = vld [vmem:[#allocation6 + $0x1c8] sm:$0xff] }
 0x321   :  { %4252 = vmatpush1.bf16.msra.mxu0 %v4251_v37  ;;  %v1296_v37 = vld [vmem:[#allocation2 + $0x1f20] sm:$0xff] }
 0x322   :  { %4764 = vmatpush1.bf16.msra.mxu1 %v4763_v38  ;;  %4254 = vmatprep.subr.bf16.mxu0 %v4253_v39  ;;  %v1294_v38 = vld [vmem:[#allocation2 + $0x1f10] sm:$0xff]  ;;  %v4785_v39 = vpack.c.bf16 %v1299_v32, %v1295_v31  ;;  %v4275_v45 = vpack.c.bf16 %v1296_v37, %v1292_v36  ;;  %v2545_v28 = vld [vmem:[#allocation6 + $0x198] sm:$0xff]  ;;  %v4805_v32 = vpack.c.bf16 %v2513_v26, %v2512_v25  ;;  %v2554_v26 = vld [vmem:[#allocation6 + $0x1e0] sm:$0xff] }
 0x323   :  { %4766 = vmatprep.subr.bf16.mxu1 %v4765_v43  ;;  %v1303_v43 = vld [vmem:[#allocation2 + $0x1f58] sm:$0xff]  ;;  %v4787_v46 = vpack.c.bf16 %v1298_v40, %v1294_v38  ;;  %v2514_v38 = vld [vmem:[#allocation6 + $0xa0] sm:$0xff]  ;;  %v2523_v25 = vld [vmem:[#allocation6 + $0xe8] sm:$0xff] }
 0x324   :  { %v2529_v37 = vld [vmem:[#allocation6 + $0x118] sm:$0xff]  ;;  %v2546_v40 = vld [vmem:[#allocation6 + $0x1a0] sm:$0xff] }
 0x325   :  { %4256 = vmatpush1.bf16.msra.mxu0 %v4255_v49  ;;  %v1304_v49 = vld [vmem:[#allocation2 + $0x1f60] sm:$0xff] }
 0x326   :  { %4768 = vmatpush1.bf16.msra.mxu1 %v4767_v50  ;;  %4258 = vmatprep.subr.bf16.mxu0 %v4257_v51  ;;  %v1302_v50 = vld [vmem:[#allocation2 + $0x1f50] sm:$0xff]  ;;  %v4789_v51 = vpack.c.bf16 %v1307_v44, %v1303_v43  ;;  %v4279_v57 = vpack.c.bf16 %v1304_v49, %v1300_v48  ;;  %v4841_v48 = vpack.c.bf16 %v2547_v41, %v2546_v40  ;;  %v2557_v40 = vld [vmem:[#allocation6 + $0x1f8] sm:$0xff] }
 0x327   :  { %4770 = vmatprep.subr.bf16.mxu1 %v4769_v55  ;;  %v1311_v55 = vld [vmem:[#allocation2 + $0x1f98] sm:$0xff]  ;;  %v4791_v58 = vpack.c.bf16 %v1306_v52, %v1302_v50  ;;  %v2531_v49 = vld [vmem:[#allocation6 + $0x128] sm:$0xff] }
 0x328   :  { %v2516_v50 = vld [vmem:[#allocation6 + $0xb0] sm:$0xff] }
 0x329   :  { %4260 = vmatpush1.bf16.msra.mxu0 %v4259_v61  ;;  %v1312_v61 = vld [vmem:[#allocation2 + $0x1fa0] sm:$0xff]  ;;  %v2548_v52 = vld [vmem:[#allocation6 + $0x1b0] sm:$0xff] }
 0x32a   :  { %4772 = vmatpush1.bf16.msra.mxu1 %v4771_v62  ;;  %4262 = vmatprep.subr.bf16.mxu0 %v4261_v63  ;;  %v1310_v62 = vld [vmem:[#allocation2 + $0x1f90] sm:$0xff]  ;;  %v4793_v63 = vpack.c.bf16 %v1315_v56, %v1311_v55  ;;  %v4283_v5 = vpack.c.bf16 %v1312_v61, %v1308_v60  ;;  %v4845_v60 = vpack.c.bf16 %v2549_v53, %v2548_v52  ;;  %v2533_v61 = vld [vmem:[#allocation6 + $0x138] sm:$0xff] }
 0x32b   :  { %4774 = vmatprep.subr.bf16.mxu1 %v4773_v3  ;;  %v1319_v3 = vld [vmem:[#allocation2 + $0x1fd8] sm:$0xff]  ;;  %v4795_v6 = vpack.c.bf16 %v1314_v0, %v1310_v62  ;;  %v2518_v62 = vld [vmem:[#allocation6 + $0xc0] sm:$0xff]  ;;  %v1324_v52 = vld [vmem:[#allocation4] sm:$0xf] }
 0x32c   :  { %v2550_v0 = vld [vmem:[#allocation6 + $0x1c0] sm:$0xff]  ;;  %v2508_v41 = vld [vmem:[#allocation6 + $0x70] sm:$0xff] }
 0x32d   :  { %4264 = vmatpush1.bf16.msra.mxu0 %v4263_v9  ;;  %v1320_v9 = vld [vmem:[#allocation2 + $0x1fe0] sm:$0xff] }
 0x32e   :  { %4776 = vmatpush1.bf16.msra.mxu1 %v4775_v10  ;;  %4266 = vmatprep.subr.bf16.mxu0 %v4265_v11  ;;  %v1318_v10 = vld [vmem:[#allocation2 + $0x1fd0] sm:$0xff]  ;;  %v4797_v11 = vpack.c.bf16 %v1323_v4, %v1319_v3  ;;  %v4287_v17 = vpack.c.bf16 %v1320_v9, %v1316_v8  ;;  %v4849_v8 = vpack.c.bf16 %v2551_v1, %v2550_v0 }
 0x32f   :  { %4778 = vmatprep.subr.bf16.mxu1 %v4777_v15  ;;  %v2542_v15 = vld [vmem:[#allocation6 + $0x180] sm:$0xff]  ;;  %v4799_v18 = vpack.c.bf16 %v1322_v12, %v1318_v10  ;;  %v2535_v9 = vld [vmem:[#allocation6 + $0x148] sm:$0xff]  ;;  %v2520_v10 = vld [vmem:[#allocation6 + $0xd0] sm:$0xff] }
 0x330   :  { %v2552_v12 = vld [vmem:[#allocation6 + $0x1d0] sm:$0xff] }
 0x331   :  { %4268 = vmatpush1.bf16.msra.mxu0 %v4267_v21  ;;  %v2495_v21 = vld [vmem:[#allocation6 + $0x8] sm:$0xff] }
 0x332   :  { %4780 = vmatpush1.bf16.msra.mxu1 %v4779_v22  ;;  %4270 = vmatprep.subr.bf16.mxu0 %v4269_v23  ;;  %v2526_v22 = vld [vmem:[#allocation6 + $0x100] sm:$0xff]  ;;  %v4833_v23 = vpack.c.bf16 %v2543_v16, %v2542_v15  ;;  %v4803_v30 = vpack.c.bf16 %v2495_v21, %v2494_v20  ;;  %v2536_v20 = vld [vmem:[#allocation6 + $0x150] sm:$0xff]  ;;  %v2537_v21 = vld [vmem:[#allocation6 + $0x158] sm:$0xff] }
 0x333   :  { %4782 = vmatprep.subr.bf16.mxu1 %v4781_v27  ;;  %v2544_v27 = vld [vmem:[#allocation6 + $0x190] sm:$0xff]  ;;  %v4835_v31 = vpack.c.bf16 %v2527_v24, %v2526_v22  ;;  %v2522_v24 = vld [vmem:[#allocation6 + $0xe0] sm:$0xff] }
 0x334   :  { %v4837_v36 = vpack.c.bf16 %v2545_v28, %v2544_v27  ;;  %v4825_v27 = vpack.c.bf16 %v2523_v25, %v2522_v24  ;;  %v2555_v28 = vld [vmem:[#allocation6 + $0x1e8] sm:$0xff] }
 0x335   :  { %4272 = vmatpush1.bf16.msra.mxu0 %v4271_v33  ;;  %v2496_v33 = vld [vmem:[#allocation6 + $0x10] sm:$0xff]  ;;  %v2716_v24 = vld [vmem:[#allocation9 + $0x40] sm:$0xff] }
 0x336   :  { %4784 = vmatpush1.bf16.msra.mxu1 %v4783_v34  ;;  %4274 = vmatprep.subr.bf16.mxu0 %v4273_v35  ;;  %v2497_v34 = vld [vmem:[#allocation6 + $0x18] sm:$0xff]  ;;  %v2528_v35 = vld [vmem:[#allocation6 + $0x110] sm:$0xff] }
 0x337   :  { %4786 = vmatprep.subr.bf16.mxu1 %v4785_v39  ;;  %v2515_v39 = vld [vmem:[#allocation6 + $0xa8] sm:$0xff]  ;;  %v4807_v42 = vpack.c.bf16 %v2497_v34, %v2496_v33  ;;  %v4839_v43 = vpack.c.bf16 %v2529_v37, %v2528_v35  ;;  %v2538_v33 = vld [vmem:[#allocation6 + $0x160] sm:$0xff]  ;;  %v2525_v37 = vld [vmem:[#allocation6 + $0xf8] sm:$0xff] }
 0x338   :  { %v4809_v44 = vpack.c.bf16 %v2515_v39, %v2514_v38  ;;  %v2539_v34 = vld [vmem:[#allocation6 + $0x168] sm:$0xff]  ;;  %v2556_v38 = vld [vmem:[#allocation6 + $0x1f0] sm:$0xff] }
 0x339   :  { %4276 = vmatpush1.bf16.msra.mxu0 %v4275_v45  ;;  %v2498_v45 = vld [vmem:[#allocation6 + $0x20] sm:$0xff]  ;;  %v4859_v35 = vpack.c.bf16 %v2539_v34, %v2538_v33  ;;  %v2717_v25 = vld [vmem:[#allocation9 + $0x48] sm:$0xff] }
 0x33a   :  { %4788 = vmatpush1.bf16.msra.mxu1 %v4787_v46  ;;  %4278 = vmatprep.subr.bf16.mxu0 %v4277_v47  ;;  %v2499_v46 = vld [vmem:[#allocation6 + $0x28] sm:$0xff]  ;;  %v2530_v47 = vld [vmem:[#allocation6 + $0x120] sm:$0xff] }
 0x33b   :  { %4790 = vmatprep.subr.bf16.mxu1 %v4789_v51  ;;  %v2517_v51 = vld [vmem:[#allocation6 + $0xb8] sm:$0xff]  ;;  %v4811_v54 = vpack.c.bf16 %v2499_v46, %v2498_v45  ;;  %v4843_v55 = vpack.c.bf16 %v2531_v49, %v2530_v47  ;;  %v2540_v45 = vld [vmem:[#allocation6 + $0x170] sm:$0xff]  ;;  %v1326_v49 = vlaneseq  ;;  %v2720_v33 = vld [vmem:[#allocation9 + $0x60] sm:$0xff] }
 0x33c   :  { %v4813_v56 = vpack.c.bf16 %v2517_v51, %v2516_v50  ;;  %v2541_v46 = vld [vmem:[#allocation6 + $0x178] sm:$0xff]  ;;  %v2721_v34 = vld [vmem:[#allocation9 + $0x68] sm:$0xff] }
 0x33d   :  { %4280 = vmatpush1.bf16.msra.mxu0 %v4279_v57  ;;  %v2500_v57 = vld [vmem:[#allocation6 + $0x30] sm:$0xff]  ;;  %v4863_v47 = vpack.c.bf16 %v2541_v46, %v2540_v45  ;;  %v5892_v50 = vshrl.u32 %v1326_v49, 7  ;;  %v2949_v45 = vld [vmem:[#allocation13] sm:$0xff] }
 0x33e   :  { %4792 = vmatpush1.bf16.msra.mxu1 %v4791_v58  ;;  %4282 = vmatprep.subr.bf16.mxu0 %v4281_v59  ;;  %v2501_v58 = vld [vmem:[#allocation6 + $0x38] sm:$0xff]  ;;  %v2532_v59 = vld [vmem:[#allocation6 + $0x130] sm:$0xff] }
 0x33f   :  { %4794 = vmatprep.subr.bf16.mxu1 %v4793_v63  ;;  %v2519_v63 = vld [vmem:[#allocation6 + $0xc8] sm:$0xff]  ;;  %v4815_v2 = vpack.c.bf16 %v2501_v58, %v2500_v57  ;;  %v4847_v3 = vpack.c.bf16 %v2533_v61, %v2532_v59  ;;  %v1328_v51 = vsub.s32 0, %v5892_v50  ;;  %v1336_v53 = vsub.s32 2, %v5892_v50  ;;  %v3036_v49 = vld [vmem:[#allocation16] sm:$0xff] }
 0x340   :  { %v4817_v4 = vpack.c.bf16 %v2519_v63, %v2518_v62  ;;  %v2950_v46 = vld [vmem:[#allocation13 + $0x8] sm:$0xff] }
 0x341   :  { %4284 = vmatpush1.bf16.msra.mxu0 %v4283_v5  ;;  %v2502_v5 = vld [vmem:[#allocation6 + $0x40] sm:$0xff]  ;;  %v1337_v57 = vrot.slane %v1324_v52, %v1336_v53 }
 0x342   :  { %4796 = vmatpush1.bf16.msra.mxu1 %v4795_v6  ;;  %4286 = vmatprep.subr.bf16.mxu0 %v4285_v7  ;;  %v2503_v6 = vld [vmem:[#allocation6 + $0x48] sm:$0xff]  ;;  %v2534_v7 = vld [vmem:[#allocation6 + $0x140] sm:$0xff] }
 0x343   :  { %4798 = vmatprep.subr.bf16.mxu1 %v4797_v11  ;;  %v2521_v11 = vld [vmem:[#allocation6 + $0xd8] sm:$0xff]  ;;  %v4819_v14 = vpack.c.bf16 %v2503_v6, %v2502_v5  ;;  %v4851_v15 = vpack.c.bf16 %v2535_v9, %v2534_v7  ;;  %v2708_v5 = vld [vmem:[#allocation9] sm:$0xff]  ;;  %v2709_v6 = vld [vmem:[#allocation9 + $0x8] sm:$0xff] }
 0x344   :  { %v4821_v16 = vpack.c.bf16 %v2521_v11, %v2520_v10  ;;  %v4869_v11 = vpack.c.bf16 %v2709_v6, %v2708_v5  ;;  %v2948_v53 = vld [vmem:[%s5995_s7] sm:$0xff] }
 0x345   :  { %4288 = vmatpush1.bf16.msra.mxu0 %v4287_v17  ;;  %v2504_v17 = vld [vmem:[#allocation6 + $0x50] sm:$0xff]  ;;  %v3478_v6 = vld [vmem:[#allocation7] ss:$0 sm:$0xff] }
 0x346   :  { %4800 = vmatpush1.bf16.msra.mxu1 %v4799_v18  ;;  %4802 = vmatprep.subr.bf16.mxu0 %v4801_v19  ;;  %v2505_v18 = vld [vmem:[#allocation6 + $0x58] sm:$0xff]  ;;  %v4853_v19 = vpack.c.bf16 %v2553_v13, %v2552_v12 }
 0x347   :  { %4834 = vmatprep.subr.bf16.mxu1 %v4833_v23  ;;  %v4823_v22 = vpack.c.bf16 %v2505_v18, %v2504_v17  ;;  %v4855_v23 = vpack.c.bf16 %v2537_v21, %v2536_v20  ;;  %v2712_v18 = vld [vmem:[#allocation9 + $0x20] sm:$0xff]  ;;  %v2714_v21 = vld [vmem:[#allocation9 + $0x30] sm:$0xff] }
 0x348   :  { %1908 = vmatmul.mubr.f32.vlgmr.msra.gmra.mrb[0].mxu0 %v298_v29 }
 0x349   :  { %2476 = vmatmul.mubr.f32.vlgmr.msra.gmra.mrb[0].mxu1 %v298_v29  ;;  %4804 = vmatpush3.bf16.msra.mxu0 %v4803_v30  ;;  %v2506_v29 = vld [vmem:[#allocation6 + $0x60] sm:$0xff]  ;;  %v2507_v30 = vld [vmem:[#allocation6 + $0x68] sm:$0xff] }
 0x34a   :  { %4836 = vmatpush3.bf16.msra.mxu1 %v4835_v31  ;;  %4806 = vmatprep.subr.bf16.mxu0 %v4805_v32  ;;  %v4857_v31 = vpack.c.bf16 %v2555_v28, %v2554_v26  ;;  %v4827_v32 = vpack.c.bf16 %v2507_v30, %v2506_v29  ;;  %v4881_v26 = vpack.c.bf16 %v2717_v25, %v2716_v24  ;;  %v2719_v28 = vld [vmem:[#allocation9 + $0x58] sm:$0xff]  ;;  %v2725_v30 = vld [vmem:[#allocation10] sm:$0xff] }
 0x34b   :  { %4838 = vmatprep.subr.bf16.mxu1 %v4837_v36  ;;  %v2524_v36 = vld [vmem:[#allocation6 + $0xf0] sm:$0xff] }
 0x34c   :  { %v4829_v39 = vpack.c.bf16 %v2525_v37, %v2524_v36  ;;  %v2872_v36 = vld [vmem:[#allocation12] sm:$0xff]  ;;  %v2873_v37 = vld [vmem:[#allocation12 + $0x8] sm:$0xff] }
 0x34d   :  { %4808 = vmatpush3.bf16.msra.mxu0 %v4807_v42  ;;  %v2509_v42 = vld [vmem:[#allocation6 + $0x78] sm:$0xff] }
 0x34e   :  { %4840 = vmatpush3.bf16.msra.mxu1 %v4839_v43  ;;  %4810 = vmatprep.subr.bf16.mxu0 %v4809_v44  ;;  %v4861_v43 = vpack.c.bf16 %v2557_v40, %v2556_v38  ;;  %v4831_v44 = vpack.c.bf16 %v2509_v42, %v2508_v41  ;;  %v5489_v38 = vmov 0.0   ;;  %v4893_v40 = vpack.c.bf16 %v2873_v37, %v2872_v36  ;;  %v2722_v41 = vld [vmem:[#allocation9 + $0x70] sm:$0xff]  ;;  %v2723_v42 = vld [vmem:[#allocation9 + $0x78] sm:$0xff] }
 0x34f   :  { %4842 = vmatprep.subr.bf16.mxu1 %v4841_v48  ;;  %v5487_v48 = vmov 0.0|0.0   ;;  %v3136_v36 = vld [vmem:[#allocation19 + $0x20] sm:$0xff]  ;;  %v3137_v37 = vld [vmem:[#allocation19 + $0x28] sm:$0xff] }
 0x351   :  { %4812 = vmatpush3.bf16.msra.mxu0 %v4811_v54  ;;  %v1332_v54 = vsub.s32 1, %v5892_v50 }
 0x352   :  { %4844 = vmatpush3.bf16.msra.mxu1 %v4843_v55  ;;  %4814 = vmatprep.subr.bf16.mxu0 %v4813_v56  ;;  %v1340_v55 = vsub.s32 3, %v5892_v50  ;;  %v1329_v56 = vrot.slane %v1324_v52, %v1328_v51 }
 0x353   :  { %4846 = vmatprep.subr.bf16.mxu1 %v4845_v60  ;;  %v1333_v58 = vrot.slane %v1324_v52, %v1332_v54 }
 0x354   :  { %v1341_v59 = vrot.slane %v1324_v52, %v1340_v55  ;;  %v3037_v52 = vld [vmem:[#allocation16 + $0x8] sm:$0xff] }
 0x355   :  { %4816 = vmatpush3.bf16.msra.mxu0 %v4815_v2  ;;  %v4899_v55 = vpack.c.bf16 %v3037_v52, %v3036_v49  ;;  %v3144_v52 = vld [vmem:[#allocation19 + $0x60] sm:$0xff] }
 0x356   :  { %4848 = vmatpush3.bf16.msra.mxu1 %v4847_v3  ;;  %4818 = vmatprep.subr.bf16.mxu0 %v4817_v4 }
 0x357   :  { %4850 = vmatprep.subr.bf16.mxu1 %v4849_v8 }
 0x359   :  { %4820 = vmatpush3.bf16.msra.mxu0 %v4819_v14  ;;  %v2710_v14 = vld [vmem:[#allocation9 + $0x10] sm:$0xff] }
 0x35a   :  { %4852 = vmatpush3.bf16.msra.mxu1 %v4851_v15  ;;  %4822 = vmatprep.subr.bf16.mxu0 %v4821_v16  ;;  %v2711_v15 = vld [vmem:[#allocation9 + $0x18] sm:$0xff] }
 0x35b   :  { %4854 = vmatprep.subr.bf16.mxu1 %v4853_v19  ;;  %v4872_v17 = vpack.c.bf16 %v2711_v15, %v2710_v14  ;;  %v2713_v19 = vld [vmem:[#allocation9 + $0x28] sm:$0xff] }
 0x35c   :  { %v4875_v20 = vpack.c.bf16 %v2713_v19, %v2712_v18  ;;  %v3047_v18 = vld [vmem:[#allocation16 + $0x58] sm:$0xff] }
 0x35d   :  { %4824 = vmatpush3.bf16.msra.mxu0 %v4823_v22  ;;  %v2715_v22 = vld [vmem:[#allocation9 + $0x38] sm:$0xff] }
 0x35e   :  { %4856 = vmatpush3.bf16.msra.mxu1 %v4855_v23  ;;  %4826 = vmatprep.subr.bf16.mxu0 %v4825_v27  ;;  %v4878_v23 = vpack.c.bf16 %v2715_v22, %v2714_v21  ;;  %v2718_v27 = vld [vmem:[#allocation9 + $0x50] sm:$0xff] }
 0x35f   :  { %4858 = vmatprep.subr.bf16.mxu1 %v4857_v31  ;;  %v4884_v29 = vpack.c.bf16 %v2719_v28, %v2718_v27  ;;  %v2726_v31 = vld [vmem:[#allocation10 + $0x8] sm:$0xff]  ;;  %v3048_v22 = vld [vmem:[#allocation16 + $0x60] sm:$0xff] }
 0x360   :  { %v3050_v27 = vld [vmem:[#allocation16 + $0x70] sm:$0xff]  ;;  %v3051_v28 = vld [vmem:[#allocation16 + $0x78] sm:$0xff] }
 0x361   :  { %4828 = vmatpush3.bf16.msra.mxu0 %v4827_v32  ;;  %v4866_v32 = vpack.c.bf16 %v2726_v31, %v2725_v30  ;;  %v3132_v30 = vld [vmem:[#allocation19] sm:$0xff]  ;;  %v3133_v31 = vld [vmem:[#allocation19 + $0x8] sm:$0xff] }
 0x362   :  { %4860 = vmatpush3.bf16.msra.mxu1 %v4859_v35  ;;  %4830 = vmatprep.subr.bf16.mxu0 %v4829_v39  ;;  %v4887_v35 = vpack.c.bf16 %v2721_v34, %v2720_v33  ;;  %v2724_v39 = vld [vmem:[%s5993_s27] sm:$0xff]  ;;  %v4923_v33 = vpack.c.bf16 %v3133_v31, %v3132_v30  ;;  %v3135_v34 = vld [vmem:[#allocation19 + $0x18] sm:$0xff] }
 0x363   :  { %4862 = vmatprep.subr.bf16.mxu1 %v4861_v43  ;;  %v4890_v43 = vpack.c.bf16 %v2723_v42, %v2722_v41  ;;  %v3139_v41 = vld [vmem:[#allocation19 + $0x38] sm:$0xff]  ;;  %v3249_v31 = vld [vmem:[#allocation22 + $0xa8] sm:$0xff] }
 0x364   :  { %v3246_v30 = vld [vmem:[#allocation22 + $0x90] sm:$0xff] }
 0x365   :  { %4832 = vmatpush3.bf16.msra.mxu0 %v4831_v44  ;;  %v2871_v44 = vld [vmem:[%s5994_s25] sm:$0xff] }
 0x366   :  { %4864 = vmatpush3.bf16.msra.mxu1 %v4863_v47  ;;  %4865 = vmatprep.subr.bf16.mxu0 %v5487_v48  ;;  %v4896_v47 = vpack.c.bf16 %v2950_v46, %v2949_v45  ;;  %v3142_v46 = vld [vmem:[#allocation19 + $0x50] sm:$0xff] }
 0x367   :  { %4868 = vmatprep.subr.bf16.mxu1 %v5487_v48 }
 0x41b   :  { %v1909_v60 = vpop.f32.mrb[0].mxu0 }
 0x41c   :  { %v5010_v61 = vadd.f32 %v1909_v60, %v1329_v56  ;;  %v2477_v62 = vpop.f32.mrb[0].mxu1  ;;  %v1911_v63 = vpop.f32.mrb[1].mxu0  ;;  %v3038_v56 = vld [vmem:[#allocation16 + $0x10] sm:$0xff]  ;;  %v3041_v60 = vld [vmem:[#allocation16 + $0x28] sm:$0xff] }
 0x41d   :  { %v5012_v0 = vadd.f32 %v2477_v62, %v1337_v57  ;;  %v5011_v1 = vadd.f32 %v1911_v63, %v1333_v58  ;;  %v2479_v2 = vpop.f32.mrb[1].mxu1  ;;  %v3039_v57 = vld [vmem:[#allocation16 + $0x18] sm:$0xff]  ;;  %v3042_v62 = vld [vmem:[#allocation16 + $0x30] sm:$0xff] }
 0x41e   :  { %v2486_v3 = vmul.f32 0.01, %v5010_v61  ;;  %v5013_v4 = vadd.f32 %v2479_v2, %v1341_v59  ;;  %vm2482_vm0 = vcmp.ge.f32.partialorder %v5010_v61, 0.0  ;;  %v4902_v58 = vpack.c.bf16 %v3039_v57, %v3038_v56  ;;  %v3040_v59 = vld [vmem:[#allocation16 + $0x20] sm:$0xff]  ;;  %v3043_v63 = vld [vmem:[#allocation16 + $0x38] sm:$0xff]  ;;  %v3045_v2 = vld [vmem:[#allocation16 + $0x48] sm:$0xff] }
 0x41f   :  { %v2488_v7 = vmul.f32 0.01, %v5012_v0  ;;  %v2487_v8 = vmul.f32 0.01, %v5011_v1  ;;  %vm2483_vm1 = vcmp.ge.f32.partialorder %v5011_v1, 0.0  ;;  %vm2484_vm2 = vcmp.ge.f32.partialorder %v5012_v0, 0.0 }
 0x420   :  { %v2489_v9 = vmul.f32 0.01, %v5013_v4  ;;  %vm2485_vm3 = vcmp.ge.f32.partialorder %v5013_v4, 0.0  ;;  %v2490_v13 = vsel %vm2482_vm0, %v5010_v61, %v2486_v3  ;;  %v4905_v61 = vpack.c.bf16 %v3041_v60, %v3040_v59  ;;  %v3482_v60 = vld [vmem:[#allocation15] ss:$0 sm:$0xff] }
 0x421   :  { %v2491_v10 = vsel %vm2483_vm1, %v5011_v1, %v2487_v8  ;;  %v2492_v16 = vsel %vm2484_vm2, %v5012_v0, %v2488_v7  ;;  %v4908_v0 = vpack.c.bf16 %v3043_v63, %v3042_v62  ;;  %v3044_v1 = vld [vmem:[#allocation16 + $0x40] sm:$0xff] }
 0x422   :  { %2629 = vmatprep.mubr.f32.mxu0 %v2491_v10  ;;  %v2493_v12 = vsel %vm2485_vm3, %v5013_v4, %v2489_v9  ;;  %v4911_v3 = vpack.c.bf16 %v3045_v2, %v3044_v1  ;;  %v3146_v1 = vld [vmem:[#allocation19 + $0x70] sm:$0xff]  ;;  %v3147_v2 = vld [vmem:[#allocation19 + $0x78] sm:$0xff] }
 0x423   :  { %2699 = vmatprep.mubr.f32.mxu1 %v2493_v12  ;;  %2630 = vmatmul.mubr.f32.vlgmr.msra.gmra.mrb[2].mxu0 %v2490_v13 }
 0x424   :  { %2700 = vmatmul.mubr.f32.vlgmr.msra.gmra.mrb[2].mxu1 %v2492_v16  ;;  %4867 = vmatpush3.bf16.msra.mxu0 %v4866_v32  ;;  %v3134_v32 = vld [vmem:[#allocation19 + $0x10] sm:$0xff] }
 0x425   :  { %4870 = vmatpush3.bf16.msra.mxu1 %v4869_v11  ;;  %4892 = vmatprep.subr.bf16.mxu0 %v5487_v48 }
 0x426   :  { %4871 = vmatprep.subr.bf16.mxu1 %v5487_v48  ;;  %3655 = vmatprep.mubr.msk.f32.mxu0 %vm5488_vm4, %v5489_v38 }
 0x427   :  { %3656 = vmatmul.mubr.msk.f32.vlgmr.msra.gmra.mrb[4].mxu0 %vm2727_vm5, %v2724_v39  ;;  %3690 = vmatprep.mubr.msk.f32.mxu1 %vm5488_vm4, %v5489_v38  ;;  %v4929_v39 = vpack.c.bf16 %v3137_v37, %v3136_v36  ;;  %v3250_v36 = vld [vmem:[#allocation22 + $0xb0] sm:$0xff]  ;;  %v3253_v37 = vld [vmem:[#allocation22 + $0xc8] sm:$0xff] }
 0x428   :  { %4894 = vmatpush3.bf16.msra.mxu0 %v4893_v40  ;;  %3697 = vmatprep.mubr.msk.f32.mxu0 %vm5488_vm4, %v5489_v38  ;;  %v3138_v40 = vld [vmem:[#allocation19 + $0x30] sm:$0xff] }
 0x429   :  { %4873 = vmatpush3.bf16.msra.mxu1 %v4872_v17  ;;  %4895 = vmatprep.subr.bf16.mxu0 %v5487_v48  ;;  %v3046_v17 = vld [vmem:[#allocation16 + $0x50] sm:$0xff]  ;;  %v4932_v42 = vpack.c.bf16 %v3139_v41, %v3138_v40 }
 0x42a   :  { %4874 = vmatprep.subr.bf16.mxu1 %v5487_v48 }
 0x42b   :  { %3698 = vmatmul.mubr.msk.f32.vlgmr.msra.gmra.mrb[6].mxu0 %vm2727_vm5, %v2871_v44  ;;  %v3141_v44 = vld [vmem:[#allocation19 + $0x48] sm:$0xff] }
 0x42c   :  { %4897 = vmatpush3.bf16.msra.mxu0 %v4896_v47  ;;  %3704 = vmatprep.mubr.msk.f32.mxu0 %vm5488_vm4, %v5489_v38  ;;  %v3143_v47 = vld [vmem:[#allocation19 + $0x58] sm:$0xff] }
 0x42d   :  { %4876 = vmatpush3.bf16.msra.mxu1 %v4875_v20  ;;  %4898 = vmatprep.subr.bf16.mxu0 %v5487_v48  ;;  %v4914_v20 = vpack.c.bf16 %v3047_v18, %v3046_v17  ;;  %v4938_v49 = vpack.c.bf16 %v3143_v47, %v3142_v46  ;;  %v3236_v17 = vld [vmem:[#allocation22 + $0x40] sm:$0xff]  ;;  %v3238_v18 = vld [vmem:[#allocation22 + $0x50] sm:$0xff] }
 0x42e   :  { %4877 = vmatprep.subr.bf16.mxu1 %v5487_v48 }
 0x42f   :  { %3705 = vmatmul.mubr.msk.f32.vlgmr.msra.gmra.mrb[8].mxu0 %vm2727_vm5, %v2948_v53  ;;  %v3145_v53 = vld [vmem:[#allocation19 + $0x68] sm:$0xff] }
 0x430   :  { %4900 = vmatpush3.bf16.msra.mxu0 %v4899_v55  ;;  %3739 = vmatprep.mubr.msk.f32.mxu0 %vm5488_vm4, %v5489_v38  ;;  %v4941_v55 = vpack.c.bf16 %v3145_v53, %v3144_v52 }
 0x431   :  { %4879 = vmatpush3.bf16.msra.mxu1 %v4878_v23  ;;  %4901 = vmatprep.subr.bf16.mxu0 %v5487_v48  ;;  %v3049_v23 = vld [vmem:[#allocation16 + $0x68] sm:$0xff] }
 0x432   :  { %4880 = vmatprep.subr.bf16.mxu1 %v5487_v48  ;;  %v4917_v25 = vpack.c.bf16 %v3049_v23, %v3048_v22  ;;  %v3240_v23 = vld [vmem:[#allocation22 + $0x60] sm:$0xff] }
 0x434   :  { %4903 = vmatpush3.bf16.msra.mxu0 %v4902_v58 }
 0x435   :  { %4882 = vmatpush3.bf16.msra.mxu1 %v4881_v26  ;;  %4904 = vmatprep.subr.bf16.mxu0 %v5487_v48 }
 0x436   :  { %4883 = vmatprep.subr.bf16.mxu1 %v5487_v48 }
 0x438   :  { %4906 = vmatpush3.bf16.msra.mxu0 %v4905_v61 }
 0x439   :  { %4885 = vmatpush3.bf16.msra.mxu1 %v4884_v29  ;;  %4907 = vmatprep.subr.bf16.mxu0 %v5487_v48  ;;  %v4920_v29 = vpack.c.bf16 %v3051_v28, %v3050_v27 }
 0x43a   :  { %4886 = vmatprep.subr.bf16.mxu1 %v5487_v48 }
 0x43c   :  { %4909 = vmatpush3.bf16.msra.mxu0 %v4908_v0 }
 0x43d   :  { %4888 = vmatpush3.bf16.msra.mxu1 %v4887_v35  ;;  %4910 = vmatprep.subr.bf16.mxu0 %v5487_v48  ;;  %v4926_v35 = vpack.c.bf16 %v3135_v34, %v3134_v32  ;;  %v3251_v32 = vld [vmem:[#allocation22 + $0xb8] sm:$0xff] }
 0x43e   :  { %4889 = vmatprep.subr.bf16.mxu1 %v5487_v48  ;;  %v4966_v34 = vpack.c.bf16 %v3251_v32, %v3249_v31  ;;  %v3484_v31 = vld [vmem:[#allocation21] ss:$0 sm:$0xff] }
 0x440   :  { %4912 = vmatpush3.bf16.msra.mxu0 %v4911_v3  ;;  %v4944_v3 = vpack.c.bf16 %v3147_v2, %v3146_v1  ;;  %v3350_v1 = vld [vmem:[#allocation25 + $0x8] sm:$0xff]  ;;  %v3367_v2 = vld [vmem:[#allocation25 + $0x90] sm:$0xff] }
 0x441   :  { %4891 = vmatpush3.bf16.msra.mxu1 %v4890_v43  ;;  %4913 = vmatprep.subr.bf16.mxu0 %v5487_v48  ;;  %v3140_v43 = vld [vmem:[#allocation19 + $0x40] sm:$0xff] }
 0x442   :  { %4922 = vmatprep.subr.bf16.mxu1 %v5487_v48  ;;  %v4935_v45 = vpack.c.bf16 %v3141_v44, %v3140_v43  ;;  %v3254_v43 = vld [vmem:[#allocation22 + $0xd0] sm:$0xff] }
 0x444   :  { %4915 = vmatpush3.bf16.msra.mxu0 %v4914_v20  ;;  %v3243_v20 = vld [vmem:[#allocation22 + $0x78] sm:$0xff] }
 0x445   :  { %4916 = vmatprep.subr.bf16.mxu0 %v5487_v48 }
 0x448   :  { %4918 = vmatpush3.bf16.msra.mxu0 %v4917_v25  ;;  %v3245_v25 = vld [vmem:[#allocation22 + $0x88] sm:$0xff] }
 0x449   :  { %4919 = vmatprep.subr.bf16.mxu0 %v5487_v48 }
 0x44c   :  { %4921 = vmatpush3.bf16.msra.mxu0 %v4920_v29  ;;  %v3244_v29 = vld [vmem:[#allocation22 + $0x80] sm:$0xff] }
 0x4f6   :  { %v3518_v4 = vpop.f32.mrb[2].mxu0 }
 0x4f7   :  { %v3553_v5 = vpop.f32.mrb[2].mxu1  ;;  %v3519_v7 = vpop.f32.mrb[3].mxu0 }
 0x4f8   :  { %v3520_v8 = vadd.f32 %v3519_v7, %v3518_v4  ;;  %v3554_v9 = vpop.f32.mrb[3].mxu1  ;;  %v3229_v4 = vld [vmem:[#allocation22 + $0x8] sm:$0xff]  ;;  %v3230_v7 = vld [vmem:[#allocation22 + $0x10] sm:$0xff] }
 0x4f9   :  { %v3555_v10 = vadd.f32 %v3554_v9, %v3553_v5  ;;  %v3231_v5 = vld [vmem:[#allocation22 + $0x18] sm:$0xff] }
 0x4fa   :  { %v2632_v11 = vadd.f32 %v3520_v8, %v3478_v6  ;;  %v2797_v15 = vpop.f32.mrb[4].mxu0  ;;  %v4946_v6 = vpack.c.bf16 %v3231_v5, %v3229_v4  ;;  %v3233_v8 = vld [vmem:[#allocation22 + $0x28] sm:$0xff]  ;;  %v3235_v9 = vld [vmem:[#allocation22 + $0x38] sm:$0xff] }
 0x4fb   :  { %v3657_v16 = vpop.f32.mrb[5].mxu0 }
 0x4fc   :  { %v2702_v12 = vadd.f32 %v3555_v10, %v2632_v11  ;;  %v4950_v11 = vpack.c.bf16 %v3235_v9, %v3233_v8  ;;  %4947 = vmatprep.subr.bf16.mxu0 %v4946_v6  ;;  %v3352_v6 = vld [vmem:[#allocation25 + $0x18] sm:$0xff]  ;;  %v3370_v8 = vld [vmem:[#allocation25 + $0xa8] sm:$0xff] }
 0x4fe   :  { %v2706_v13 = vmul.f32 0.01, %v2702_v12  ;;  %vm2705_vm6 = vcmp.ge.f32.partialorder %v2702_v12, 0.0  ;;  %v2943_v19 = vpop.f32.mrb[6].mxu0 }
 0x4ff   :  { %v3699_v21 = vpop.f32.mrb[7].mxu0 }
 0x500   :  { %v2707_v14 = vsel %vm2705_vm6, %v2702_v12, %v2706_v13  ;;  %v3232_v12 = vld [vmem:[#allocation22 + $0x20] sm:$0xff]  ;;  %v3234_v13 = vld [vmem:[#allocation22 + $0x30] sm:$0xff]  ;;  %v4956_v21 = vpack.c.bf16 %v3238_v18, %v3236_v17 }
 0x501   :  { %3691 = vmatmul.mubr.f32.vlgmr.msra.gmra.mrb[4].mxu1 %v2707_v14  ;;  %v3237_v14 = vld [vmem:[#allocation22 + $0x48] sm:$0xff]  ;;  %v3356_v17 = vld [vmem:[#allocation25 + $0x38] sm:$0xff] }
 0x502   :  { %3774 = vmatprep.mubr.msk.f32.mxu1 %vm5488_vm4, %v5489_v38  ;;  %v3020_v24 = vpop.f32.mrb[8].mxu0  ;;  %4924 = vmatpush3.bf16.msra.mxu1 %v4923_v33  ;;  %v4964_v33 = vpack.c.bf16 %v3246_v30, %v3244_v29  ;;  %v3373_v18 = vld [vmem:[#allocation25 + $0xc0] sm:$0xff]  ;;  %v3360_v29 = vld [vmem:[#allocation25 + $0x58] sm:$0xff] }
 0x503   :  { %v3706_v26 = vpop.f32.mrb[9].mxu0  ;;  %4925 = vmatprep.subr.bf16.mxu1 %v5487_v48 }
 0x504   :  { %v3247_v26 = vld [vmem:[#allocation22 + $0x98] sm:$0xff] }
 0x505   :  { %v4962_v28 = vpack.c.bf16 %v3247_v26, %v3245_v25  ;;  %v3376_v25 = vld [vmem:[#allocation25 + $0xd8] sm:$0xff] }
 0x506   :  { %4927 = vmatpush3.bf16.msra.mxu1 %v4926_v35  ;;  %v3248_v35 = vld [vmem:[#allocation22 + $0xa0] sm:$0xff] }
 0x507   :  { %4928 = vmatprep.subr.bf16.mxu1 %v5487_v48  ;;  %v4968_v40 = vpack.c.bf16 %v3250_v36, %v3248_v35 }
 0x50a   :  { %4930 = vmatpush3.bf16.msra.mxu1 %v4929_v39  ;;  %v3255_v39 = vld [vmem:[#allocation22 + $0xd8] sm:$0xff] }
 0x50b   :  { %4931 = vmatprep.subr.bf16.mxu1 %v5487_v48  ;;  %v4970_v41 = vpack.c.bf16 %v3255_v39, %v3253_v37  ;;  %v3377_v37 = vld [vmem:[#allocation25 + $0xe0] sm:$0xff]  ;;  %v3378_v39 = vld [vmem:[#allocation25 + $0xe8] sm:$0xff] }
 0x50e   :  { %4933 = vmatpush3.bf16.msra.mxu1 %v4932_v42  ;;  %v3252_v42 = vld [vmem:[#allocation22 + $0xc0] sm:$0xff] }
 0x50f   :  { %4934 = vmatprep.subr.bf16.mxu1 %v5487_v48  ;;  %v4972_v44 = vpack.c.bf16 %v3254_v43, %v3252_v42  ;;  %v3362_v42 = vld [vmem:[#allocation25 + $0x68] sm:$0xff] }
 0x512   :  { %4936 = vmatpush3.bf16.msra.mxu1 %v4935_v45  ;;  %v3483_v45 = vld [vmem:[#allocation18] ss:$0 sm:$0xff] }
 0x513   :  { %4937 = vmatprep.subr.bf16.mxu1 %v5487_v48 }
 0x516   :  { %4939 = vmatpush3.bf16.msra.mxu1 %v4938_v49 }
 0x517   :  { %4940 = vmatprep.subr.bf16.mxu1 %v5487_v48 }
 0x51a   :  { %4942 = vmatpush3.bf16.msra.mxu1 %v4941_v55  ;;  %v3257_v55 = vld [vmem:[#allocation22 + $0xe8] sm:$0xff] }
 0x51b   :  { %4943 = vmatprep.subr.bf16.mxu1 %v5487_v48  ;;  %v3228_v48 = vld [vmem:[#allocation22] sm:$0xff] }
 0x51c   :  { %v4948_v10 = vpack.c.bf16 %v3230_v7, %v3228_v48  ;;  %v3351_v48 = vld [vmem:[#allocation25 + $0x10] sm:$0xff]  ;;  %v3369_v7 = vld [vmem:[#allocation25 + $0xa0] sm:$0xff] }
 0x51d   :  { %v4984_v9 = vpack.c.bf16 %v3352_v6, %v3351_v48 }
 0x51e   :  { %4945 = vmatpush3.bf16.msra.mxu1 %v4944_v3  ;;  %v3368_v3 = vld [vmem:[#allocation25 + $0x98] sm:$0xff] }
 0x51f   :  { %v4982_v5 = vpack.c.bf16 %v3368_v3, %v3367_v2  ;;  %v3485_v2 = vld [vmem:[#allocation27] ss:$0 sm:$0xff] }
 0x5d4   :  { %v2867_v56 = vpop.f32.mrb[4].mxu1 }
 0x5d5   :  { %v2868_v57 = vadd.f32 %v2867_v56, %v2797_v15  ;;  %v3692_v58 = vpop.f32.mrb[5].mxu1  ;;  %v3239_v15 = vld [vmem:[#allocation22 + $0x58] sm:$0xff] }
 0x5d6   :  { %v4954_v16 = vpack.c.bf16 %v3239_v15, %v3237_v14  ;;  %v3259_v56 = vld [vmem:[#allocation22 + $0xf8] sm:$0xff]  ;;  %v3256_v58 = vld [vmem:[#allocation22 + $0xe0] sm:$0xff] }
 0x5d7   :  { %v2947_v59 = vadd.f32 %v2943_v19, %v2868_v57  ;;  %v3241_v19 = vld [vmem:[#allocation22 + $0x68] sm:$0xff]  ;;  %v4974_v57 = vpack.c.bf16 %v3259_v56, %v3257_v55  ;;  %v3372_v14 = vld [vmem:[#allocation25 + $0xb8] sm:$0xff] }
 0x5d8   :  { %v4958_v22 = vpack.c.bf16 %v3243_v20, %v3241_v19  ;;  %v3374_v19 = vld [vmem:[#allocation25 + $0xc8] sm:$0xff] }
 0x5d9   :  { %v3024_v61 = vadd.f32 %v3020_v24, %v2947_v59  ;;  %v3242_v24 = vld [vmem:[#allocation22 + $0x70] sm:$0xff] }
 0x5da   :  { %v4960_v27 = vpack.c.bf16 %v3242_v24, %v3240_v23  ;;  %v3258_v59 = vld [vmem:[#allocation22 + $0xf0] sm:$0xff] }
 0x5db   :  { %v3032_v62 = vadd.f32 %v3482_v60, %v3024_v61  ;;  %v4976_v60 = vpack.c.bf16 %v3258_v59, %v3256_v58  ;;  %v3365_v61 = vld [vmem:[#allocation25 + $0x80] sm:$0xff]  ;;  %v3358_v23 = vld [vmem:[#allocation25 + $0x48] sm:$0xff]  ;;  %v3375_v24 = vld [vmem:[#allocation25 + $0xd0] sm:$0xff] }
 0x5dd   :  { %v3034_v63 = vmul.f32 0.01, %v3032_v62  ;;  %vm3033_vm7 = vcmp.ge.f32.partialorder %v3032_v62, 0.0 }
 0x5df   :  { %v3035_v0 = vsel %vm3033_vm7, %v3032_v62, %v3034_v63  ;;  %v3366_v62 = vld [vmem:[#allocation25 + $0x88] sm:$0xff]  ;;  %v3349_v63 = vld [vmem:[#allocation25] sm:$0xff] }
 0x5e0   :  { %3740 = vmatmul.mubr.f32.vlgmr.msra.gmra.mrb[10].mxu0 %v3035_v0  ;;  %v4978_v0 = vpack.c.bf16 %v3366_v62, %v3365_v61  ;;  %v4980_v4 = vpack.c.bf16 %v3350_v1, %v3349_v63 }
 0x5e1   :  { %3336 = vmatprep.mubr.f32.mxu0 %v5489_v38  ;;  %4949 = vmatpush1.bf16.msra.mxu0 %v4948_v10  ;;  %v4952_v38 = vpack.c.bf16 %v3234_v13, %v3232_v12  ;;  %v4986_v10 = vpack.c.bf16 %v3370_v8, %v3369_v7  ;;  %v3354_v12 = vld [vmem:[#allocation25 + $0x28] sm:$0xff]  ;;  %v3371_v13 = vld [vmem:[#allocation25 + $0xb0] sm:$0xff] }
 0x5e2   :  { %4951 = vmatprep.subr.bf16.mxu0 %v4950_v11  ;;  %4979 = vmatprep.subr.bf16.mxu1 %v4978_v0  ;;  %v3353_v11 = vld [vmem:[#allocation25 + $0x20] sm:$0xff] }
 0x5e3   :  { %v4988_v15 = vpack.c.bf16 %v3354_v12, %v3353_v11 }
 0x5e5   :  { %4953 = vmatpush1.bf16.msra.mxu0 %v4952_v38  ;;  %v4990_v38 = vpack.c.bf16 %v3372_v14, %v3371_v13 }
 0x5e6   :  { %4955 = vmatprep.subr.bf16.mxu0 %v4954_v16  ;;  %v3355_v16 = vld [vmem:[#allocation25 + $0x30] sm:$0xff] }
 0x5e7   :  { %v4992_v20 = vpack.c.bf16 %v3356_v17, %v3355_v16 }
 0x5e9   :  { %4957 = vmatpush1.bf16.msra.mxu0 %v4956_v21  ;;  %v4994_v21 = vpack.c.bf16 %v3374_v19, %v3373_v18 }
 0x5ea   :  { %4959 = vmatprep.subr.bf16.mxu0 %v4958_v22  ;;  %v3357_v22 = vld [vmem:[#allocation25 + $0x40] sm:$0xff] }
 0x5eb   :  { %v4996_v26 = vpack.c.bf16 %v3358_v23, %v3357_v22 }
 0x5ed   :  { %4961 = vmatpush1.bf16.msra.mxu0 %v4960_v27  ;;  %v4998_v27 = vpack.c.bf16 %v3376_v25, %v3375_v24 }
 0x5ee   :  { %4963 = vmatprep.subr.bf16.mxu0 %v4962_v28  ;;  %v3359_v28 = vld [vmem:[#allocation25 + $0x50] sm:$0xff] }
 0x5ef   :  { %v5000_v30 = vpack.c.bf16 %v3360_v29, %v3359_v28 }
 0x5f1   :  { %4965 = vmatpush1.bf16.msra.mxu0 %v4964_v33 }
 0x5f2   :  { %4967 = vmatprep.subr.bf16.mxu0 %v4966_v34 }
 0x5f5   :  { %4969 = vmatpush1.bf16.msra.mxu0 %v4968_v40  ;;  %v5002_v40 = vpack.c.bf16 %v3378_v39, %v3377_v37 }
 0x5f6   :  { %4971 = vmatprep.subr.bf16.mxu0 %v4970_v41  ;;  %v3361_v41 = vld [vmem:[#allocation25 + $0x60] sm:$0xff] }
 0x5f7   :  { %v5004_v43 = vpack.c.bf16 %v3362_v42, %v3361_v41 }
 0x5f9   :  { %4973 = vmatpush1.bf16.msra.mxu0 %v4972_v44  ;;  %v3379_v44 = vld [vmem:[#allocation25 + $0xf0] sm:$0xff] }
 0x5fa   :  { %4975 = vmatprep.subr.bf16.mxu0 %v4974_v57 }
 0x5fd   :  { %4977 = vmatpush1.bf16.msra.mxu0 %v4976_v60 }
 0x6b3   :  { %v3125_v46 = vpop.f32.mrb[10].mxu0 }
 0x6b4   :  { %v3126_v47 = vadd.f32 %v3483_v45, %v3125_v46  ;;  %v3741_v49 = vpop.f32.mrb[11].mxu0  ;;  %v3380_v45 = vld [vmem:[#allocation25 + $0xf8] sm:$0xff] }
 0x6b5   :  { %v5006_v46 = vpack.c.bf16 %v3380_v45, %v3379_v44  ;;  %v3364_v49 = vld [vmem:[#allocation25 + $0x78] sm:$0xff] }
 0x6b6   :  { %vm3129_vm8 = vcmp.ge.f32.partialorder %v3126_v47, 0.0  ;;  %v3130_v52 = vmul.f32 0.01, %v3126_v47 }
 0x6b8   :  { %v3131_v53 = vsel %vm3129_vm8, %v3126_v47, %v3130_v52  ;;  %v3363_v47 = vld [vmem:[#allocation25 + $0x70] sm:$0xff] }
 0x6b9   :  { %3775 = vmatmul.mubr.f32.vlgmr.msra.gmra.mrb[6].mxu1 %v3131_v53  ;;  %v5008_v52 = vpack.c.bf16 %v3364_v49, %v3363_v47  ;;  %v3260_v53 = vld [vmem:[#allocation24] sm:$0x3] }
 0x6ba   :  { %4981 = vmatpush3.bf16.msra.mxu1 %v4980_v4  ;;  %v3265_v55 = vrot.slane %v3260_v53, %v1328_v51  ;;  %v3269_v56 = vrot.slane %v3260_v53, %v1332_v54 }
 0x6bb   :  { %4983 = vmatprep.subr.bf16.mxu1 %v4982_v5 }
 0x6be   :  { %4985 = vmatpush3.bf16.msra.mxu1 %v4984_v9 }
 0x6bf   :  { %4987 = vmatprep.subr.bf16.mxu1 %v4986_v10 }
 0x6c2   :  { %4989 = vmatpush3.bf16.msra.mxu1 %v4988_v15 }
 0x6c3   :  { %4991 = vmatprep.subr.bf16.mxu1 %v4990_v38 }
 0x6c6   :  { %4993 = vmatpush3.bf16.msra.mxu1 %v4992_v20 }
 0x6c7   :  { %4995 = vmatprep.subr.bf16.mxu1 %v4994_v21 }
 0x6ca   :  { %4997 = vmatpush3.bf16.msra.mxu1 %v4996_v26 }
 0x6cb   :  { %4999 = vmatprep.subr.bf16.mxu1 %v4998_v27 }
 0x6ce   :  { %5001 = vmatpush3.bf16.msra.mxu1 %v5000_v30 }
 0x6cf   :  { %5003 = vmatprep.subr.bf16.mxu1 %v5002_v40 }
 0x6d2   :  { %5005 = vmatpush3.bf16.msra.mxu1 %v5004_v43 }
 0x6d3   :  { %5007 = vmatprep.subr.bf16.mxu1 %v5006_v46 }
 0x6d6   :  { %5009 = vmatpush3.bf16.msra.mxu1 %v5008_v52 }
 0x78c   :  { %v3221_v32 = vpop.f32.mrb[6].mxu1 }
 0x78d   :  { %v3222_v33 = vadd.f32 %v3484_v31, %v3221_v32  ;;  %v3776_v34 = vpop.f32.mrb[7].mxu1 }
 0x78f   :  { %vm3225_vm9 = vcmp.ge.f32.partialorder %v3222_v33, 0.0  ;;  %v3226_v35 = vmul.f32 0.01, %v3222_v33 }
 0x791   :  { %v3227_v36 = vsel %vm3225_vm9, %v3222_v33, %v3226_v35 }
 0x792   :  { %3337 = vmatmul.mubr.f32.vlgmr.msra.gmra.mrb[12].mxu0 %v3227_v36 }
 0x865   :  { %v3338_v57 = vpop.f32.mrb[12].mxu0 }
 0x866   :  { %v3339_v58 = vadd.f32 %v3338_v57, %v3265_v55  ;;  %v3340_v59 = vpop.f32.mrb[13].mxu0 }
 0x867   :  { %v3341_v60 = vadd.f32 %v3340_v59, %v3269_v56 }
 0x868   :  { %v3345_v61 = vmul.f32 0.01, %v3339_v58  ;;  %vm3343_vm10 = vcmp.ge.f32.partialorder %v3339_v58, 0.0 }
 0x869   :  { %v3346_v62 = vmul.f32 0.01, %v3341_v60  ;;  %vm3344_vm11 = vcmp.ge.f32.partialorder %v3341_v60, 0.0 }
 0x86a   :  { %v3347_v0 = vsel %vm3343_vm10, %v3339_v58, %v3345_v61 }
 0x86b   :  { %v3348_v63 = vsel %vm3344_vm11, %v3341_v60, %v3346_v62 }
 0x86c   :  { %3452 = vmatprep.mubr.f32.mxu1 %v3348_v63 }
 0x86d   :  { %3453 = vmatmul.mubr.f32.vlgmr.msra.gmra.mrb[8].mxu1 %v3347_v0 }
 0x940   :  { %v3648_v1 = vpop.f32.mrb[8].mxu1 }
 0x941   :  { %v3649_v3 = vpop.f32.mrb[9].mxu1 }
 0x942   :  { %v3650_v4 = vadd.f32 %v3649_v3, %v3648_v1 }
 0x944   :  { %v3455_v51 = vadd.f32 %v3650_v4, %v3485_v2 }
 0x946   :  { %v3458_v5 = vsub.f32 0.0, %v3455_v51 }
 0x948   :  { %v3459_v50 = vmul.f32 1.442695, %v3458_v5 }
 0x94a   :  { %5068 = vpow2.f32 %v3459_v50 }
 0x954   :  { %v5069_v54 = vpop.eup %5068 }
 0x955   :  { %v3461_v48 = vadd.f32 1.0, %v5069_v54 }
 0x957   :  { %5070 = vrcp.f32 %v3461_v48 }
 0x961   :  { %v5071_v6 = vpop.eup %5070 }
 0x962   :  { %3464 = vst [vmem:[%s5980_s21] sm:$0xff] %v5071_v6 }
 0x963   :  { %3469 = vsyncpa [#allocation3], 1 }
 0x964   :  { %3470 = vsyncpa [#allocation5], 1 }
 0x965   :  { %3471 = vsyncpa [#allocation8], 1 }
 0x966   :  { %3472 = vsyncpa [#allocation11], 1 }
 0x967   :  { %3473 = vsyncpa [#allocation14], 1 }
 0x968   :  { %3474 = vsyncpa [#allocation17], 1 }
 0x969   :  { %3475 = vsyncpa [#allocation20], 1 }
 0x96a   :  { %3476 = vsyncpa [#allocation23], 1 }
 0x96b   :  { %3477 = vsyncpa [#allocation26], 1 }

</bundles_post_ra>
